<compile_context>
chip_gen: v7x
topology: tpu7x:2x2x1
jax: 0.10.0
libtpu: 0.0.40
codegen_flags: <defaults>
</compile_context>

<pallas_src>
import functools

import numpy as np
import jax
import jax.numpy as jnp
from jax.experimental import pallas as pl
from jax.experimental.pallas import tpu as pltpu


def _accumulate_taps(v, specs, H, W):
    """Accumulate depthwise-conv taps of `v` into per-row accumulators.

    v:     (H*W, C) float32 value (flattened image rows; W == sublane group).
    specs: list of (w_ref, K, acc_rows).  w_ref is a (K*K, W, C) VMEM ref with
           per-tap weights pre-broadcast over W and pre-multiplied by the dx
           edge mask (so no masking is needed here).  acc_rows is a Python list
           of H per-row (W, C) values (None == not yet initialised); mutated in
           place.  All specs share the per-dx roll and the row slices.
    """
    HW = H * W
    pmax = max(k for _, k, _ in specs) // 2
    for dx in range(-pmax, pmax + 1):
        # W-direction shift: one XLU roll of the whole slab.  Values that wrap
        # across an image-row (or array) boundary land only in positions whose
        # weight was pre-zeroed by the dx mask, so no select is needed.
        vdx = v if dx == 0 else pltpu.roll(v, (-dx) % HW, axis=0)
        rows = [vdx[h * W:(h + 1) * W] for h in range(H)]   # free aligned slices
        for w_ref, K, acc in specs:
            P = K // 2
            if abs(dx) > P:
                continue
            for dy in range(-P, P + 1):
                wv = w_ref[(dy + P) * K + (dx + P)]          # (W, C): one vreg
                # H-direction zero padding == simply skip out-of-range rows.
                for h in range(max(0, -dy), min(H, H - dy)):
                    t = rows[h + dy] * wv
                    acc[h] = t if acc[h] is None else acc[h] + t


def _dcspe_kernel(x_ref, w7_ref, weff_ref, w5_ref, w3_ref,
                  b7_ref, b5_ref, bsum_ref, o_ref, *, H, W):
    x = x_ref[...].astype(jnp.float32)                       # (H*W, C)

    # ---- fused pass over x: 7x7 (-> proj(x)) and merged 5x5 (-> x+p5+p3) ----
    acc7 = [None] * H
    acce = [None] * H
    _accumulate_taps(x, [(w7_ref, 7, acc7), (weff_ref, 5, acce)], H, W)

    b7 = b7_ref[...]
    b5 = b5_ref[...]
    bsum = bsum_ref[...]                                      # b5 + 2*b3
    p7_rows = [acc7[h] + b7 for h in range(H)]                # proj(x)
    # running total = proj(x) + x + proj1(x) + proj2(x)  (+ chain's b3, folded)
    tot = [p7_rows[h] + acce[h] + bsum for h in range(H)]

    # ---- chained pass 2: q = proj1(proj(x)) ----
    p7 = jnp.concatenate(p7_rows, axis=0)                     # (H*W, C)
    accq = [None] * H
    _accumulate_taps(p7, [(w5_ref, 5, accq)], H, W)
    q = jnp.concatenate([accq[h] + b5 for h in range(H)], axis=0)

    # ---- chained pass 3: += proj2(q), accumulated straight into `tot` ----
    _accumulate_taps(q, [(w3_ref, 3, tot)], H, W)

    o_ref[...] = jnp.concatenate(tot, axis=0).astype(o_ref.dtype)


def _mask_and_broadcast(w, K, W):
    """(K, K, C) depthwise weights -> (K*K, W, C) per-tap weight rows.

    Each tap row is the per-channel weight replicated over the W sublanes and
    pre-multiplied by the dx edge mask (zero where the rolled window wraps
    around the image-row boundary), so the kernel needs no iota/compare/select:
    one vreg load per tap, pure mul+add on the VPU.
    """
    P = K // 2
    C = w.shape[-1]
    wpos = jnp.arange(W)[None, :]                             # (1, W)
    dx = jnp.arange(-P, P + 1)[:, None]                       # (K, 1)
    mask = ((wpos + dx >= 0) & (wpos + dx < W)).astype(w.dtype)   # (K_dx, W)
    wb = w[:, :, None, :] * mask[None, :, :, None]            # (Kdy, Kdx, W, C)
    return wb.reshape(K * K, W, C)


def dcspe_pallas(x_tokens, H, W, params):
    """x_tokens: (B, 1 + H*W, C).  Returns (B, 1 + H*W, C)."""
    B, N, C = x_tokens.shape
    assert N == 1 + H * W
    assert W == 8, "kernel assumes W == sublane-group size (8)"
    assert C % 128 == 0, "C must be lane-dense (multiple of 128)"
    w7, b7, w5, b5, w3, b3 = params          # wK: (K, K, C), bK: (1, 1, C)

    cls_token = x_tokens[:, 0:1, :]                           # (B, 1, C)
    feat = x_tokens[:, 1:, :]                                 # (B, H*W, C)

    f32 = jnp.float32
    w7f, w5f, w3f = w7.astype(f32), w5.astype(f32), w3.astype(f32)

    # Exact merge of the three branches acting directly on the zero-padded
    # input:  x + proj1(x) + proj2(x)  ==  dwconv5x5_nb(x, w_eff) + (b5 + b3)
    # with    w_eff = w5 + pad(w3) + identity_delta.
    delta = jnp.zeros((5, 5, C), f32).at[2, 2, :].set(1.0)
    w_eff = w5f + jnp.pad(w3f, ((1, 1), (1, 1), (0, 0))) + delta

    # Per-tap (K*K, W, C) weights: sublane-broadcast + dx edge mask folded in.
    w7m = _mask_and_broadcast(w7f, 7, W)
    weffm = _mask_and_broadcast(w_eff, 5, W)
    w5m = _mask_and_broadcast(w5f, 5, W)
    w3m = _mask_and_broadcast(w3f, 3, W)

    # Biases pre-broadcast to one vreg row each.  bsum = b5 + 2*b3 covers the
    # merged-branch constant (b5 + b3) plus the chain's outer b3, folded early.
    b7b = jnp.broadcast_to(b7.reshape(1, C).astype(f32), (W, C))
    b5b = jnp.broadcast_to(b5.reshape(1, C).astype(f32), (W, C))
    bsb = jnp.broadcast_to((b5 + 2.0 * b3).reshape(1, C).astype(f32), (W, C))

    kernel = functools.partial(_dcspe_kernel, H=H, W=W)

    grid_spec = pltpu.PrefetchScalarGridSpec(
        num_scalar_prefetch=0,
        grid=(B,),                                            # 2 steps -> both TCs
        in_specs=[
            pl.BlockSpec((None, H * W, C), lambda b: (b, 0, 0)),   # x (squeezed B)
            pl.BlockSpec((7 * 7, W, C), lambda b: (0, 0, 0)),      # w7  (masked)
            pl.BlockSpec((5 * 5, W, C), lambda b: (0, 0, 0)),      # w_eff
            pl.BlockSpec((5 * 5, W, C), lambda b: (0, 0, 0)),      # w5
            pl.BlockSpec((3 * 3, W, C), lambda b: (0, 0, 0)),      # w3
            pl.BlockSpec((W, C), lambda b: (0, 0)),                # b7
            pl.BlockSpec((W, C), lambda b: (0, 0)),                # b5
            pl.BlockSpec((W, C), lambda b: (0, 0)),                # b5 + 2*b3
        ],
        out_specs=pl.BlockSpec((None, H * W, C), lambda b: (b, 0, 0)),
    )

    y = pl.pallas_call(
        kernel,
        out_shape=jax.ShapeDtypeStruct((B, H * W, C), x_tokens.dtype),
        grid_spec=grid_spec,
        compiler_params=pltpu.CompilerParams(
            dimension_semantics=("parallel",)),
    )(feat, w7m, weffm, w5m, w3m, b7b, b5b, bsb)

    # TODO(synk): TA(dim) definition not provided in the excerpt -> identity.
    return jnp.concatenate([cls_token, y], axis=1)


# ----------------------------- pure-JAX reference -----------------------------
def _ref_dwconv(x_nhwc, w, b, K):
    C = x_nhwc.shape[-1]
    kern = w.reshape(K, K, 1, C)
    y = jax.lax.conv_general_dilated(
        x_nhwc, kern, window_strides=(1, 1), padding="SAME",
        dimension_numbers=("NHWC", "HWIO", "NHWC"), feature_group_count=C,
        precision=jax.lax.Precision.HIGHEST)
    return y + b.reshape(1, 1, 1, C)


def dcspe_reference(x_tokens, H, W, params):
    B, N, C = x_tokens.shape
    w7, b7, w5, b5, w3, b3 = params
    cls_token = x_tokens[:, 0:1, :]
    f = x_tokens[:, 1:, :].reshape(B, H, W, C)
    p7 = _ref_dwconv(f, w7, b7, 7)
    p5 = _ref_dwconv(f, w5, b5, 5)
    p3 = _ref_dwconv(f, w3, b3, 3)
    chain = _ref_dwconv(_ref_dwconv(p7, w5, b5, 5), w3, b3, 3)
    y = (chain + p7 + f + p5 + p3).reshape(B, H * W, C)
    return jnp.concatenate([cls_token, y], axis=1)


if __name__ == "__main__":
    key = jax.random.PRNGKey(0)
    B, C, H, W = 2, 128, 8, 8          # small, lane-friendly (C = 128) shapes
    N = 1 + H * W

    keys = jax.random.split(key, 8)
    x_tokens = jax.random.normal(keys[0], (B, N, C), dtype=jnp.float32)

    # PyTorch depthwise weight (C, 1, K, K) is stored here as (K, K, C);
    # per-channel bias stored as (1, 1, C).
    w7 = 0.05 * jax.random.normal(keys[1], (7, 7, C), dtype=jnp.float32)
    b7 = 0.05 * jax.random.normal(keys[2], (1, 1, C), dtype=jnp.float32)
    w5 = 0.05 * jax.random.normal(keys[3], (5, 5, C), dtype=jnp.float32)
    b5 = 0.05 * jax.random.normal(keys[4], (1, 1, C), dtype=jnp.float32)
    w3 = 0.05 * jax.random.normal(keys[5], (3, 3, C), dtype=jnp.float32)
    b3 = 0.05 * jax.random.normal(keys[6], (1, 1, C), dtype=jnp.float32)
    params = (w7, b7, w5, b5, w3, b3)

    out = dcspe_pallas(x_tokens, H, W, params)
    out = jax.block_until_ready(out)

    ref = jax.block_until_ready(dcspe_reference(x_tokens, H, W, params))
    np.testing.assert_allclose(np.asarray(out), np.asarray(ref),
                               rtol=1e-4, atol=1e-4)

    print("KERNEL_OK")
</pallas_src>

<mosaic_0001>
module attributes {stable_mosaic.version = 11 : i64} {
  func.func @_dcspe_kernel(%arg0: i32, %arg1: memref<1x64x128xf32, #tpu.memory_space<vmem>>, %arg2: memref<49x8x128xf32, #tpu.memory_space<vmem>>, %arg3: memref<25x8x128xf32, #tpu.memory_space<vmem>>, %arg4: memref<25x8x128xf32, #tpu.memory_space<vmem>>, %arg5: memref<9x8x128xf32, #tpu.memory_space<vmem>>, %arg6: memref<8x128xf32, #tpu.memory_space<vmem>>, %arg7: memref<8x128xf32, #tpu.memory_space<vmem>>, %arg8: memref<8x128xf32, #tpu.memory_space<vmem>>, %arg9: memref<1x64x128xf32, #tpu.memory_space<vmem>>) attributes {dimension_semantics = [#tpu.dimension_semantics<parallel>], iteration_bounds = array<i64: 2>, scalar_prefetch = 0 : i64, scratch_operands = 0 : i64, tpu.core_type = #tpu.core_type<tc>, window_params = [{transform_indices = @transform_0, window_bounds = array<i64: 1, 64, 128>}, {pipeline_mode = #tpu.pipeline_mode<synchronous>, transform_indices = @transform_1, window_bounds = array<i64: 49, 8, 128>}, {pipeline_mode = #tpu.pipeline_mode<synchronous>, transform_indices = @transform_2, window_bounds = array<i64: 25, 8, 128>}, {pipeline_mode = #tpu.pipeline_mode<synchronous>, transform_indices = @transform_3, window_bounds = array<i64: 25, 8, 128>}, {pipeline_mode = #tpu.pipeline_mode<synchronous>, transform_indices = @transform_4, window_bounds = array<i64: 9, 8, 128>}, {pipeline_mode = #tpu.pipeline_mode<synchronous>, transform_indices = @transform_5, window_bounds = array<i64: 8, 128>}, {pipeline_mode = #tpu.pipeline_mode<synchronous>, transform_indices = @transform_6, window_bounds = array<i64: 8, 128>}, {pipeline_mode = #tpu.pipeline_mode<synchronous>, transform_indices = @transform_7, window_bounds = array<i64: 8, 128>}, {transform_indices = @transform_8, window_bounds = array<i64: 1, 64, 128>}]} {
    %c0 = arith.constant 0 : index
    %c0_0 = arith.constant 0 : index
    %c0_1 = arith.constant 0 : index
    %0 = vector.load %arg1[%c0, %c0_0, %c0_1] : memref<1x64x128xf32, #tpu.memory_space<vmem>>, vector<1x64x128xf32>
    %1 = vector.shape_cast %0 : vector<1x64x128xf32> to vector<64x128xf32>
    %c3_i32 = arith.constant 3 : i32
    %2 = tpu.dynamic_rotate %1 by %c3_i32 dim 0 : vector<64x128xf32>, i32 -> vector<64x128xf32>
    %3 = vector.extract_strided_slice %2 {offsets = [0, 0], sizes = [8, 128], strides = [1, 1]} : vector<64x128xf32> to vector<8x128xf32>
    %4 = vector.extract_strided_slice %2 {offsets = [8, 0], sizes = [8, 128], strides = [1, 1]} : vector<64x128xf32> to vector<8x128xf32>
    %5 = vector.extract_strided_slice %2 {offsets = [16, 0], sizes = [8, 128], strides = [1, 1]} : vector<64x128xf32> to vector<8x128xf32>
    %6 = vector.extract_strided_slice %2 {offsets = [24, 0], sizes = [8, 128], strides = [1, 1]} : vector<64x128xf32> to vector<8x128xf32>
    %7 = vector.extract_strided_slice %2 {offsets = [32, 0], sizes = [8, 128], strides = [1, 1]} : vector<64x128xf32> to vector<8x128xf32>
    %8 = vector.extract_strided_slice %2 {offsets = [40, 0], sizes = [8, 128], strides = [1, 1]} : vector<64x128xf32> to vector<8x128xf32>
    %9 = vector.extract_strided_slice %2 {offsets = [48, 0], sizes = [8, 128], strides = [1, 1]} : vector<64x128xf32> to vector<8x128xf32>
    %10 = vector.extract_strided_slice %2 {offsets = [56, 0], sizes = [8, 128], strides = [1, 1]} : vector<64x128xf32> to vector<8x128xf32>
    %c0_2 = arith.constant 0 : index
    %c0_3 = arith.constant 0 : index
    %c0_4 = arith.constant 0 : index
    %11 = vector.load %arg2[%c0_2, %c0_3, %c0_4] : memref<49x8x128xf32, #tpu.memory_space<vmem>>, vector<1x8x128xf32>
    %12 = vector.shape_cast %11 : vector<1x8x128xf32> to vector<8x128xf32>
    %13 = arith.mulf %3, %12 : vector<8x128xf32>
    %14 = arith.mulf %4, %12 : vector<8x128xf32>
    %15 = arith.mulf %5, %12 : vector<8x128xf32>
    %16 = arith.mulf %6, %12 : vector<8x128xf32>
    %17 = arith.mulf %7, %12 : vector<8x128xf32>
    %c7 = arith.constant 7 : index
    %c0_5 = arith.constant 0 : index
    %c0_6 = arith.constant 0 : index
    %18 = vector.load %arg2[%c7, %c0_5, %c0_6] : memref<49x8x128xf32, #tpu.memory_space<vmem>>, vector<1x8x128xf32>
    %19 = vector.shape_cast %18 : vector<1x8x128xf32> to vector<8x128xf32>
    %20 = arith.mulf %3, %19 : vector<8x128xf32>
    %21 = arith.mulf %4, %19 : vector<8x128xf32>
    %22 = arith.addf %13, %21 : vector<8x128xf32>
    %23 = arith.mulf %5, %19 : vector<8x128xf32>
    %24 = arith.addf %14, %23 : vector<8x128xf32>
    %25 = arith.mulf %6, %19 : vector<8x128xf32>
    %26 = arith.addf %15, %25 : vector<8x128xf32>
    %27 = arith.mulf %7, %19 : vector<8x128xf32>
    %28 = arith.addf %16, %27 : vector<8x128xf32>
    %29 = arith.mulf %8, %19 : vector<8x128xf32>
    %30 = arith.addf %17, %29 : vector<8x128xf32>
    %c14 = arith.constant 14 : index
    %c0_7 = arith.constant 0 : index
    %c0_8 = arith.constant 0 : index
    %31 = vector.load %arg2[%c14, %c0_7, %c0_8] : memref<49x8x128xf32, #tpu.memory_space<vmem>>, vector<1x8x128xf32>
    %32 = vector.shape_cast %31 : vector<1x8x128xf32> to vector<8x128xf32>
    %33 = arith.mulf %3, %32 : vector<8x128xf32>
    %34 = arith.mulf %4, %32 : vector<8x128xf32>
    %35 = arith.addf %20, %34 : vector<8x128xf32>
    %36 = arith.mulf %5, %32 : vector<8x128xf32>
    %37 = arith.addf %22, %36 : vector<8x128xf32>
    %38 = arith.mulf %6, %32 : vector<8x128xf32>
    %39 = arith.addf %24, %38 : vector<8x128xf32>
    %40 = arith.mulf %7, %32 : vector<8x128xf32>
    %41 = arith.addf %26, %40 : vector<8x128xf32>
    %42 = arith.mulf %8, %32 : vector<8x128xf32>
    %43 = arith.addf %28, %42 : vector<8x128xf32>
    %44 = arith.mulf %9, %32 : vector<8x128xf32>
    %45 = arith.addf %30, %44 : vector<8x128xf32>
    %c21 = arith.constant 21 : index
    %c0_9 = arith.constant 0 : index
    %c0_10 = arith.constant 0 : index
    %46 = vector.load %arg2[%c21, %c0_9, %c0_10] : memref<49x8x128xf32, #tpu.memory_space<vmem>>, vector<1x8x128xf32>
    %47 = vector.shape_cast %46 : vector<1x8x128xf32> to vector<8x128xf32>
    %48 = arith.mulf %3, %47 : vector<8x128xf32>
    %49 = arith.mulf %4, %47 : vector<8x128xf32>
    %50 = arith.addf %33, %49 : vector<8x128xf32>
    %51 = arith.mulf %5, %47 : vector<8x128xf32>
    %52 = arith.addf %35, %51 : vector<8x128xf32>
    %53 = arith.mulf %6, %47 : vector<8x128xf32>
    %54 = arith.addf %37, %53 : vector<8x128xf32>
    %55 = arith.mulf %7, %47 : vector<8x128xf32>
    %56 = arith.addf %39, %55 : vector<8x128xf32>
    %57 = arith.mulf %8, %47 : vector<8x128xf32>
    %58 = arith.addf %41, %57 : vector<8x128xf32>
    %59 = arith.mulf %9, %47 : vector<8x128xf32>
    %60 = arith.addf %43, %59 : vector<8x128xf32>
    %61 = arith.mulf %10, %47 : vector<8x128xf32>
    %62 = arith.addf %45, %61 : vector<8x128xf32>
    %c28 = arith.constant 28 : index
    %c0_11 = arith.constant 0 : index
    %c0_12 = arith.constant 0 : index
    %63 = vector.load %arg2[%c28, %c0_11, %c0_12] : memref<49x8x128xf32, #tpu.memory_space<vmem>>, vector<1x8x128xf32>
    %64 = vector.shape_cast %63 : vector<1x8x128xf32> to vector<8x128xf32>
    %65 = arith.mulf %4, %64 : vector<8x128xf32>
    %66 = arith.addf %48, %65 : vector<8x128xf32>
    %67 = arith.mulf %5, %64 : vector<8x128xf32>
    %68 = arith.addf %50, %67 : vector<8x128xf32>
    %69 = arith.mulf %6, %64 : vector<8x128xf32>
    %70 = arith.addf %52, %69 : vector<8x128xf32>
    %71 = arith.mulf %7, %64 : vector<8x128xf32>
    %72 = arith.addf %54, %71 : vector<8x128xf32>
    %73 = arith.mulf %8, %64 : vector<8x128xf32>
    %74 = arith.addf %56, %73 : vector<8x128xf32>
    %75 = arith.mulf %9, %64 : vector<8x128xf32>
    %76 = arith.addf %58, %75 : vector<8x128xf32>
    %77 = arith.mulf %10, %64 : vector<8x128xf32>
    %78 = arith.addf %60, %77 : vector<8x128xf32>
    %c35 = arith.constant 35 : index
    %c0_13 = arith.constant 0 : index
    %c0_14 = arith.constant 0 : index
    %79 = vector.load %arg2[%c35, %c0_13, %c0_14] : memref<49x8x128xf32, #tpu.memory_space<vmem>>, vector<1x8x128xf32>
    %80 = vector.shape_cast %79 : vector<1x8x128xf32> to vector<8x128xf32>
    %81 = arith.mulf %5, %80 : vector<8x128xf32>
    %82 = arith.addf %66, %81 : vector<8x128xf32>
    %83 = arith.mulf %6, %80 : vector<8x128xf32>
    %84 = arith.addf %68, %83 : vector<8x128xf32>
    %85 = arith.mulf %7, %80 : vector<8x128xf32>
    %86 = arith.addf %70, %85 : vector<8x128xf32>
    %87 = arith.mulf %8, %80 : vector<8x128xf32>
    %88 = arith.addf %72, %87 : vector<8x128xf32>
    %89 = arith.mulf %9, %80 : vector<8x128xf32>
    %90 = arith.addf %74, %89 : vector<8x128xf32>
    %91 = arith.mulf %10, %80 : vector<8x128xf32>
    %92 = arith.addf %76, %91 : vector<8x128xf32>
    %c42 = arith.constant 42 : index
    %c0_15 = arith.constant 0 : index
    %c0_16 = arith.constant 0 : index
    %93 = vector.load %arg2[%c42, %c0_15, %c0_16] : memref<49x8x128xf32, #tpu.memory_space<vmem>>, vector<1x8x128xf32>
    %94 = vector.shape_cast %93 : vector<1x8x128xf32> to vector<8x128xf32>
    %95 = arith.mulf %6, %94 : vector<8x128xf32>
    %96 = arith.addf %82, %95 : vector<8x128xf32>
    %97 = arith.mulf %7, %94 : vector<8x128xf32>
    %98 = arith.addf %84, %97 : vector<8x128xf32>
    %99 = arith.mulf %8, %94 : vector<8x128xf32>
    %100 = arith.addf %86, %99 : vector<8x128xf32>
    %101 = arith.mulf %9, %94 : vector<8x128xf32>
    %102 = arith.addf %88, %101 : vector<8x128xf32>
    %103 = arith.mulf %10, %94 : vector<8x128xf32>
    %104 = arith.addf %90, %103 : vector<8x128xf32>
    %c2_i32 = arith.constant 2 : i32
    %105 = tpu.dynamic_rotate %1 by %c2_i32 dim 0 : vector<64x128xf32>, i32 -> vector<64x128xf32>
    %106 = vector.extract_strided_slice %105 {offsets = [0, 0], sizes = [8, 128], strides = [1, 1]} : vector<64x128xf32> to vector<8x128xf32>
    %107 = vector.extract_strided_slice %105 {offsets = [8, 0], sizes = [8, 128], strides = [1, 1]} : vector<64x128xf32> to vector<8x128xf32>
    %108 = vector.extract_strided_slice %105 {offsets = [16, 0], sizes = [8, 128], strides = [1, 1]} : vector<64x128xf32> to vector<8x128xf32>
    %109 = vector.extract_strided_slice %105 {offsets = [24, 0], sizes = [8, 128], strides = [1, 1]} : vector<64x128xf32> to vector<8x128xf32>
    %110 = vector.extract_strided_slice %105 {offsets = [32, 0], sizes = [8, 128], strides = [1, 1]} : vector<64x128xf32> to vector<8x128xf32>
    %111 = vector.extract_strided_slice %105 {offsets = [40, 0], sizes = [8, 128], strides = [1, 1]} : vector<64x128xf32> to vector<8x128xf32>
    %112 = vector.extract_strided_slice %105 {offsets = [48, 0], sizes = [8, 128], strides = [1, 1]} : vector<64x128xf32> to vector<8x128xf32>
    %113 = vector.extract_strided_slice %105 {offsets = [56, 0], sizes = [8, 128], strides = [1, 1]} : vector<64x128xf32> to vector<8x128xf32>
    %c1 = arith.constant 1 : index
    %c0_17 = arith.constant 0 : index
    %c0_18 = arith.constant 0 : index
    %114 = vector.load %arg2[%c1, %c0_17, %c0_18] : memref<49x8x128xf32, #tpu.memory_space<vmem>>, vector<1x8x128xf32>
    %115 = vector.shape_cast %114 : vector<1x8x128xf32> to vector<8x128xf32>
    %116 = arith.mulf %106, %115 : vector<8x128xf32>
    %117 = arith.addf %102, %116 : vector<8x128xf32>
    %118 = arith.mulf %107, %115 : vector<8x128xf32>
    %119 = arith.addf %104, %118 : vector<8x128xf32>
    %120 = arith.mulf %108, %115 : vector<8x128xf32>
    %121 = arith.addf %92, %120 : vector<8x128xf32>
    %122 = arith.mulf %109, %115 : vector<8x128xf32>
    %123 = arith.addf %78, %122 : vector<8x128xf32>
    %124 = arith.mulf %110, %115 : vector<8x128xf32>
    %125 = arith.addf %62, %124 : vector<8x128xf32>
    %c8 = arith.constant 8 : index
    %c0_19 = arith.constant 0 : index
    %c0_20 = arith.constant 0 : index
    %126 = vector.load %arg2[%c8, %c0_19, %c0_20] : memref<49x8x128xf32, #tpu.memory_space<vmem>>, vector<1x8x128xf32>
    %127 = vector.shape_cast %126 : vector<1x8x128xf32> to vector<8x128xf32>
    %128 = arith.mulf %106, %127 : vector<8x128xf32>
    %129 = arith.addf %100, %128 : vector<8x128xf32>
    %130 = arith.mulf %107, %127 : vector<8x128xf32>
    %131 = arith.addf %117, %130 : vector<8x128xf32>
    %132 = arith.mulf %108, %127 : vector<8x128xf32>
    %133 = arith.addf %119, %132 : vector<8x128xf32>
    %134 = arith.mulf %109, %127 : vector<8x128xf32>
    %135 = arith.addf %121, %134 : vector<8x128xf32>
    %136 = arith.mulf %110, %127 : vector<8x128xf32>
    %137 = arith.addf %123, %136 : vector<8x128xf32>
    %138 = arith.mulf %111, %127 : vector<8x128xf32>
    %139 = arith.addf %125, %138 : vector<8x128xf32>
    %c15 = arith.constant 15 : index
    %c0_21 = arith.constant 0 : index
    %c0_22 = arith.constant 0 : index
    %140 = vector.load %arg2[%c15, %c0_21, %c0_22] : memref<49x8x128xf32, #tpu.memory_space<vmem>>, vector<1x8x128xf32>
    %141 = vector.shape_cast %140 : vector<1x8x128xf32> to vector<8x128xf32>
    %142 = arith.mulf %106, %141 : vector<8x128xf32>
    %143 = arith.addf %98, %142 : vector<8x128xf32>
    %144 = arith.mulf %107, %141 : vector<8x128xf32>
    %145 = arith.addf %129, %144 : vector<8x128xf32>
    %146 = arith.mulf %108, %141 : vector<8x128xf32>
    %147 = arith.addf %131, %146 : vector<8x128xf32>
    %148 = arith.mulf %109, %141 : vector<8x128xf32>
    %149 = arith.addf %133, %148 : vector<8x128xf32>
    %150 = arith.mulf %110, %141 : vector<8x128xf32>
    %151 = arith.addf %135, %150 : vector<8x128xf32>
    %152 = arith.mulf %111, %141 : vector<8x128xf32>
    %153 = arith.addf %137, %152 : vector<8x128xf32>
    %154 = arith.mulf %112, %141 : vector<8x128xf32>
    %155 = arith.addf %139, %154 : vector<8x128xf32>
    %c22 = arith.constant 22 : index
    %c0_23 = arith.constant 0 : index
    %c0_24 = arith.constant 0 : index
    %156 = vector.load %arg2[%c22, %c0_23, %c0_24] : memref<49x8x128xf32, #tpu.memory_space<vmem>>, vector<1x8x128xf32>
    %157 = vector.shape_cast %156 : vector<1x8x128xf32> to vector<8x128xf32>
    %158 = arith.mulf %106, %157 : vector<8x128xf32>
    %159 = arith.addf %96, %158 : vector<8x128xf32>
    %160 = arith.mulf %107, %157 : vector<8x128xf32>
    %161 = arith.addf %143, %160 : vector<8x128xf32>
    %162 = arith.mulf %108, %157 : vector<8x128xf32>
    %163 = arith.addf %145, %162 : vector<8x128xf32>
    %164 = arith.mulf %109, %157 : vector<8x128xf32>
    %165 = arith.addf %147, %164 : vector<8x128xf32>
    %166 = arith.mulf %110, %157 : vector<8x128xf32>
    %167 = arith.addf %149, %166 : vector<8x128xf32>
    %168 = arith.mulf %111, %157 : vector<8x128xf32>
    %169 = arith.addf %151, %168 : vector<8x128xf32>
    %170 = arith.mulf %112, %157 : vector<8x128xf32>
    %171 = arith.addf %153, %170 : vector<8x128xf32>
    %172 = arith.mulf %113, %157 : vector<8x128xf32>
    %173 = arith.addf %155, %172 : vector<8x128xf32>
    %c29 = arith.constant 29 : index
    %c0_25 = arith.constant 0 : index
    %c0_26 = arith.constant 0 : index
    %174 = vector.load %arg2[%c29, %c0_25, %c0_26] : memref<49x8x128xf32, #tpu.memory_space<vmem>>, vector<1x8x128xf32>
    %175 = vector.shape_cast %174 : vector<1x8x128xf32> to vector<8x128xf32>
    %176 = arith.mulf %107, %175 : vector<8x128xf32>
    %177 = arith.addf %159, %176 : vector<8x128xf32>
    %178 = arith.mulf %108, %175 : vector<8x128xf32>
    %179 = arith.addf %161, %178 : vector<8x128xf32>
    %180 = arith.mulf %109, %175 : vector<8x128xf32>
    %181 = arith.addf %163, %180 : vector<8x128xf32>
    %182 = arith.mulf %110, %175 : vector<8x128xf32>
    %183 = arith.addf %165, %182 : vector<8x128xf32>
    %184 = arith.mulf %111, %175 : vector<8x128xf32>
    %185 = arith.addf %167, %184 : vector<8x128xf32>
    %186 = arith.mulf %112, %175 : vector<8x128xf32>
    %187 = arith.addf %169, %186 : vector<8x128xf32>
    %188 = arith.mulf %113, %175 : vector<8x128xf32>
    %189 = arith.addf %171, %188 : vector<8x128xf32>
    %c36 = arith.constant 36 : index
    %c0_27 = arith.constant 0 : index
    %c0_28 = arith.constant 0 : index
    %190 = vector.load %arg2[%c36, %c0_27, %c0_28] : memref<49x8x128xf32, #tpu.memory_space<vmem>>, vector<1x8x128xf32>
    %191 = vector.shape_cast %190 : vector<1x8x128xf32> to vector<8x128xf32>
    %192 = arith.mulf %108, %191 : vector<8x128xf32>
    %193 = arith.addf %177, %192 : vector<8x128xf32>
    %194 = arith.mulf %109, %191 : vector<8x128xf32>
    %195 = arith.addf %179, %194 : vector<8x128xf32>
    %196 = arith.mulf %110, %191 : vector<8x128xf32>
    %197 = arith.addf %181, %196 : vector<8x128xf32>
    %198 = arith.mulf %111, %191 : vector<8x128xf32>
    %199 = arith.addf %183, %198 : vector<8x128xf32>
    %200 = arith.mulf %112, %191 : vector<8x128xf32>
    %201 = arith.addf %185, %200 : vector<8x128xf32>
    %202 = arith.mulf %113, %191 : vector<8x128xf32>
    %203 = arith.addf %187, %202 : vector<8x128xf32>
    %c43 = arith.constant 43 : index
    %c0_29 = arith.constant 0 : index
    %c0_30 = arith.constant 0 : index
    %204 = vector.load %arg2[%c43, %c0_29, %c0_30] : memref<49x8x128xf32, #tpu.memory_space<vmem>>, vector<1x8x128xf32>
    %205 = vector.shape_cast %204 : vector<1x8x128xf32> to vector<8x128xf32>
    %206 = arith.mulf %109, %205 : vector<8x128xf32>
    %207 = arith.addf %193, %206 : vector<8x128xf32>
    %208 = arith.mulf %110, %205 : vector<8x128xf32>
    %209 = arith.addf %195, %208 : vector<8x128xf32>
    %210 = arith.mulf %111, %205 : vector<8x128xf32>
    %211 = arith.addf %197, %210 : vector<8x128xf32>
    %212 = arith.mulf %112, %205 : vector<8x128xf32>
    %213 = arith.addf %199, %212 : vector<8x128xf32>
    %214 = arith.mulf %113, %205 : vector<8x128xf32>
    %215 = arith.addf %201, %214 : vector<8x128xf32>
    %c0_31 = arith.constant 0 : index
    %c0_32 = arith.constant 0 : index
    %c0_33 = arith.constant 0 : index
    %216 = vector.load %arg3[%c0_31, %c0_32, %c0_33] : memref<25x8x128xf32, #tpu.memory_space<vmem>>, vector<1x8x128xf32>
    %217 = vector.shape_cast %216 : vector<1x8x128xf32> to vector<8x128xf32>
    %218 = arith.mulf %106, %217 : vector<8x128xf32>
    %219 = arith.mulf %107, %217 : vector<8x128xf32>
    %220 = arith.mulf %108, %217 : vector<8x128xf32>
    %221 = arith.mulf %109, %217 : vector<8x128xf32>
    %222 = arith.mulf %110, %217 : vector<8x128xf32>
    %223 = arith.mulf %111, %217 : vector<8x128xf32>
    %c5 = arith.constant 5 : index
    %c0_34 = arith.constant 0 : index
    %c0_35 = arith.constant 0 : index
    %224 = vector.load %arg3[%c5, %c0_34, %c0_35] : memref<25x8x128xf32, #tpu.memory_space<vmem>>, vector<1x8x128xf32>
    %225 = vector.shape_cast %224 : vector<1x8x128xf32> to vector<8x128xf32>
    %226 = arith.mulf %106, %225 : vector<8x128xf32>
    %227 = arith.mulf %107, %225 : vector<8x128xf32>
    %228 = arith.addf %218, %227 : vector<8x128xf32>
    %229 = arith.mulf %108, %225 : vector<8x128xf32>
    %230 = arith.addf %219, %229 : vector<8x128xf32>
    %231 = arith.mulf %109, %225 : vector<8x128xf32>
    %232 = arith.addf %220, %231 : vector<8x128xf32>
    %233 = arith.mulf %110, %225 : vector<8x128xf32>
    %234 = arith.addf %221, %233 : vector<8x128xf32>
    %235 = arith.mulf %111, %225 : vector<8x128xf32>
    %236 = arith.addf %222, %235 : vector<8x128xf32>
    %237 = arith.mulf %112, %225 : vector<8x128xf32>
    %238 = arith.addf %223, %237 : vector<8x128xf32>
    %c10 = arith.constant 10 : index
    %c0_36 = arith.constant 0 : index
    %c0_37 = arith.constant 0 : index
    %239 = vector.load %arg3[%c10, %c0_36, %c0_37] : memref<25x8x128xf32, #tpu.memory_space<vmem>>, vector<1x8x128xf32>
    %240 = vector.shape_cast %239 : vector<1x8x128xf32> to vector<8x128xf32>
    %241 = arith.mulf %106, %240 : vector<8x128xf32>
    %242 = arith.mulf %107, %240 : vector<8x128xf32>
    %243 = arith.addf %226, %242 : vector<8x128xf32>
    %244 = arith.mulf %108, %240 : vector<8x128xf32>
    %245 = arith.addf %228, %244 : vector<8x128xf32>
    %246 = arith.mulf %109, %240 : vector<8x128xf32>
    %247 = arith.addf %230, %246 : vector<8x128xf32>
    %248 = arith.mulf %110, %240 : vector<8x128xf32>
    %249 = arith.addf %232, %248 : vector<8x128xf32>
    %250 = arith.mulf %111, %240 : vector<8x128xf32>
    %251 = arith.addf %234, %250 : vector<8x128xf32>
    %252 = arith.mulf %112, %240 : vector<8x128xf32>
    %253 = arith.addf %236, %252 : vector<8x128xf32>
    %254 = arith.mulf %113, %240 : vector<8x128xf32>
    %255 = arith.addf %238, %254 : vector<8x128xf32>
    %c15_38 = arith.constant 15 : index
    %c0_39 = arith.constant 0 : index
    %c0_40 = arith.constant 0 : index
    %256 = vector.load %arg3[%c15_38, %c0_39, %c0_40] : memref<25x8x128xf32, #tpu.memory_space<vmem>>, vector<1x8x128xf32>
    %257 = vector.shape_cast %256 : vector<1x8x128xf32> to vector<8x128xf32>
    %258 = arith.mulf %107, %257 : vector<8x128xf32>
    %259 = arith.addf %241, %258 : vector<8x128xf32>
    %260 = arith.mulf %108, %257 : vector<8x128xf32>
    %261 = arith.addf %243, %260 : vector<8x128xf32>
    %262 = arith.mulf %109, %257 : vector<8x128xf32>
    %263 = arith.addf %245, %262 : vector<8x128xf32>
    %264 = arith.mulf %110, %257 : vector<8x128xf32>
    %265 = arith.addf %247, %264 : vector<8x128xf32>
    %266 = arith.mulf %111, %257 : vector<8x128xf32>
    %267 = arith.addf %249, %266 : vector<8x128xf32>
    %268 = arith.mulf %112, %257 : vector<8x128xf32>
    %269 = arith.addf %251, %268 : vector<8x128xf32>
    %270 = arith.mulf %113, %257 : vector<8x128xf32>
    %271 = arith.addf %253, %270 : vector<8x128xf32>
    %c20 = arith.constant 20 : index
    %c0_41 = arith.constant 0 : index
    %c0_42 = arith.constant 0 : index
    %272 = vector.load %arg3[%c20, %c0_41, %c0_42] : memref<25x8x128xf32, #tpu.memory_space<vmem>>, vector<1x8x128xf32>
    %273 = vector.shape_cast %272 : vector<1x8x128xf32> to vector<8x128xf32>
    %274 = arith.mulf %108, %273 : vector<8x128xf32>
    %275 = arith.addf %259, %274 : vector<8x128xf32>
    %276 = arith.mulf %109, %273 : vector<8x128xf32>
    %277 = arith.addf %261, %276 : vector<8x128xf32>
    %278 = arith.mulf %110, %273 : vector<8x128xf32>
    %279 = arith.addf %263, %278 : vector<8x128xf32>
    %280 = arith.mulf %111, %273 : vector<8x128xf32>
    %281 = arith.addf %265, %280 : vector<8x128xf32>
    %282 = arith.mulf %112, %273 : vector<8x128xf32>
    %283 = arith.addf %267, %282 : vector<8x128xf32>
    %284 = arith.mulf %113, %273 : vector<8x128xf32>
    %285 = arith.addf %269, %284 : vector<8x128xf32>
    %c1_i32 = arith.constant 1 : i32
    %286 = tpu.dynamic_rotate %1 by %c1_i32 dim 0 : vector<64x128xf32>, i32 -> vector<64x128xf32>
    %287 = vector.extract_strided_slice %286 {offsets = [0, 0], sizes = [8, 128], strides = [1, 1]} : vector<64x128xf32> to vector<8x128xf32>
    %288 = vector.extract_strided_slice %286 {offsets = [8, 0], sizes = [8, 128], strides = [1, 1]} : vector<64x128xf32> to vector<8x128xf32>
    %289 = vector.extract_strided_slice %286 {offsets = [16, 0], sizes = [8, 128], strides = [1, 1]} : vector<64x128xf32> to vector<8x128xf32>
    %290 = vector.extract_strided_slice %286 {offsets = [24, 0], sizes = [8, 128], strides = [1, 1]} : vector<64x128xf32> to vector<8x128xf32>
    %291 = vector.extract_strided_slice %286 {offsets = [32, 0], sizes = [8, 128], strides = [1, 1]} : vector<64x128xf32> to vector<8x128xf32>
    %292 = vector.extract_strided_slice %286 {offsets = [40, 0], sizes = [8, 128], strides = [1, 1]} : vector<64x128xf32> to vector<8x128xf32>
    %293 = vector.extract_strided_slice %286 {offsets = [48, 0], sizes = [8, 128], strides = [1, 1]} : vector<64x128xf32> to vector<8x128xf32>
    %294 = vector.extract_strided_slice %286 {offsets = [56, 0], sizes = [8, 128], strides = [1, 1]} : vector<64x128xf32> to vector<8x128xf32>
    %c2 = arith.constant 2 : index
    %c0_43 = arith.constant 0 : index
    %c0_44 = arith.constant 0 : index
    %295 = vector.load %arg2[%c2, %c0_43, %c0_44] : memref<49x8x128xf32, #tpu.memory_space<vmem>>, vector<1x8x128xf32>
    %296 = vector.shape_cast %295 : vector<1x8x128xf32> to vector<8x128xf32>
    %297 = arith.mulf %287, %296 : vector<8x128xf32>
    %298 = arith.addf %213, %297 : vector<8x128xf32>
    %299 = arith.mulf %288, %296 : vector<8x128xf32>
    %300 = arith.addf %215, %299 : vector<8x128xf32>
    %301 = arith.mulf %289, %296 : vector<8x128xf32>
    %302 = arith.addf %203, %301 : vector<8x128xf32>
    %303 = arith.mulf %290, %296 : vector<8x128xf32>
    %304 = arith.addf %189, %303 : vector<8x128xf32>
    %305 = arith.mulf %291, %296 : vector<8x128xf32>
    %306 = arith.addf %173, %305 : vector<8x128xf32>
    %c9 = arith.constant 9 : index
    %c0_45 = arith.constant 0 : index
    %c0_46 = arith.constant 0 : index
    %307 = vector.load %arg2[%c9, %c0_45, %c0_46] : memref<49x8x128xf32, #tpu.memory_space<vmem>>, vector<1x8x128xf32>
    %308 = vector.shape_cast %307 : vector<1x8x128xf32> to vector<8x128xf32>
    %309 = arith.mulf %287, %308 : vector<8x128xf32>
    %310 = arith.addf %211, %309 : vector<8x128xf32>
    %311 = arith.mulf %288, %308 : vector<8x128xf32>
    %312 = arith.addf %298, %311 : vector<8x128xf32>
    %313 = arith.mulf %289, %308 : vector<8x128xf32>
    %314 = arith.addf %300, %313 : vector<8x128xf32>
    %315 = arith.mulf %290, %308 : vector<8x128xf32>
    %316 = arith.addf %302, %315 : vector<8x128xf32>
    %317 = arith.mulf %291, %308 : vector<8x128xf32>
    %318 = arith.addf %304, %317 : vector<8x128xf32>
    %319 = arith.mulf %292, %308 : vector<8x128xf32>
    %320 = arith.addf %306, %319 : vector<8x128xf32>
    %c16 = arith.constant 16 : index
    %c0_47 = arith.constant 0 : index
    %c0_48 = arith.constant 0 : index
    %321 = vector.load %arg2[%c16, %c0_47, %c0_48] : memref<49x8x128xf32, #tpu.memory_space<vmem>>, vector<1x8x128xf32>
    %322 = vector.shape_cast %321 : vector<1x8x128xf32> to vector<8x128xf32>
    %323 = arith.mulf %287, %322 : vector<8x128xf32>
    %324 = arith.addf %209, %323 : vector<8x128xf32>
    %325 = arith.mulf %288, %322 : vector<8x128xf32>
    %326 = arith.addf %310, %325 : vector<8x128xf32>
    %327 = arith.mulf %289, %322 : vector<8x128xf32>
    %328 = arith.addf %312, %327 : vector<8x128xf32>
    %329 = arith.mulf %290, %322 : vector<8x128xf32>
    %330 = arith.addf %314, %329 : vector<8x128xf32>
    %331 = arith.mulf %291, %322 : vector<8x128xf32>
    %332 = arith.addf %316, %331 : vector<8x128xf32>
    %333 = arith.mulf %292, %322 : vector<8x128xf32>
    %334 = arith.addf %318, %333 : vector<8x128xf32>
    %335 = arith.mulf %293, %322 : vector<8x128xf32>
    %336 = arith.addf %320, %335 : vector<8x128xf32>
    %c23 = arith.constant 23 : index
    %c0_49 = arith.constant 0 : index
    %c0_50 = arith.constant 0 : index
    %337 = vector.load %arg2[%c23, %c0_49, %c0_50] : memref<49x8x128xf32, #tpu.memory_space<vmem>>, vector<1x8x128xf32>
    %338 = vector.shape_cast %337 : vector<1x8x128xf32> to vector<8x128xf32>
    %339 = arith.mulf %287, %338 : vector<8x128xf32>
    %340 = arith.addf %207, %339 : vector<8x128xf32>
    %341 = arith.mulf %288, %338 : vector<8x128xf32>
    %342 = arith.addf %324, %341 : vector<8x128xf32>
    %343 = arith.mulf %289, %338 : vector<8x128xf32>
    %344 = arith.addf %326, %343 : vector<8x128xf32>
    %345 = arith.mulf %290, %338 : vector<8x128xf32>
    %346 = arith.addf %328, %345 : vector<8x128xf32>
    %347 = arith.mulf %291, %338 : vector<8x128xf32>
    %348 = arith.addf %330, %347 : vector<8x128xf32>
    %349 = arith.mulf %292, %338 : vector<8x128xf32>
    %350 = arith.addf %332, %349 : vector<8x128xf32>
    %351 = arith.mulf %293, %338 : vector<8x128xf32>
    %352 = arith.addf %334, %351 : vector<8x128xf32>
    %353 = arith.mulf %294, %338 : vector<8x128xf32>
    %354 = arith.addf %336, %353 : vector<8x128xf32>
    %c30 = arith.constant 30 : index
    %c0_51 = arith.constant 0 : index
    %c0_52 = arith.constant 0 : index
    %355 = vector.load %arg2[%c30, %c0_51, %c0_52] : memref<49x8x128xf32, #tpu.memory_space<vmem>>, vector<1x8x128xf32>
    %356 = vector.shape_cast %355 : vector<1x8x128xf32> to vector<8x128xf32>
    %357 = arith.mulf %288, %356 : vector<8x128xf32>
    %358 = arith.addf %340, %357 : vector<8x128xf32>
    %359 = arith.mulf %289, %356 : vector<8x128xf32>
    %360 = arith.addf %342, %359 : vector<8x128xf32>
    %361 = arith.mulf %290, %356 : vector<8x128xf32>
    %362 = arith.addf %344, %361 : vector<8x128xf32>
    %363 = arith.mulf %291, %356 : vector<8x128xf32>
    %364 = arith.addf %346, %363 : vector<8x128xf32>
    %365 = arith.mulf %292, %356 : vector<8x128xf32>
    %366 = arith.addf %348, %365 : vector<8x128xf32>
    %367 = arith.mulf %293, %356 : vector<8x128xf32>
    %368 = arith.addf %350, %367 : vector<8x128xf32>
    %369 = arith.mulf %294, %356 : vector<8x128xf32>
    %370 = arith.addf %352, %369 : vector<8x128xf32>
    %c37 = arith.constant 37 : index
    %c0_53 = arith.constant 0 : index
    %c0_54 = arith.constant 0 : index
    %371 = vector.load %arg2[%c37, %c0_53, %c0_54] : memref<49x8x128xf32, #tpu.memory_space<vmem>>, vector<1x8x128xf32>
    %372 = vector.shape_cast %371 : vector<1x8x128xf32> to vector<8x128xf32>
    %373 = arith.mulf %289, %372 : vector<8x128xf32>
    %374 = arith.addf %358, %373 : vector<8x128xf32>
    %375 = arith.mulf %290, %372 : vector<8x128xf32>
    %376 = arith.addf %360, %375 : vector<8x128xf32>
    %377 = arith.mulf %291, %372 : vector<8x128xf32>
    %378 = arith.addf %362, %377 : vector<8x128xf32>
    %379 = arith.mulf %292, %372 : vector<8x128xf32>
    %380 = arith.addf %364, %379 : vector<8x128xf32>
    %381 = arith.mulf %293, %372 : vector<8x128xf32>
    %382 = arith.addf %366, %381 : vector<8x128xf32>
    %383 = arith.mulf %294, %372 : vector<8x128xf32>
    %384 = arith.addf %368, %383 : vector<8x128xf32>
    %c44 = arith.constant 44 : index
    %c0_55 = arith.constant 0 : index
    %c0_56 = arith.constant 0 : index
    %385 = vector.load %arg2[%c44, %c0_55, %c0_56] : memref<49x8x128xf32, #tpu.memory_space<vmem>>, vector<1x8x128xf32>
    %386 = vector.shape_cast %385 : vector<1x8x128xf32> to vector<8x128xf32>
    %387 = arith.mulf %290, %386 : vector<8x128xf32>
    %388 = arith.addf %374, %387 : vector<8x128xf32>
    %389 = arith.mulf %291, %386 : vector<8x128xf32>
    %390 = arith.addf %376, %389 : vector<8x128xf32>
    %391 = arith.mulf %292, %386 : vector<8x128xf32>
    %392 = arith.addf %378, %391 : vector<8x128xf32>
    %393 = arith.mulf %293, %386 : vector<8x128xf32>
    %394 = arith.addf %380, %393 : vector<8x128xf32>
    %395 = arith.mulf %294, %386 : vector<8x128xf32>
    %396 = arith.addf %382, %395 : vector<8x128xf32>
    %c1_57 = arith.constant 1 : index
    %c0_58 = arith.constant 0 : index
    %c0_59 = arith.constant 0 : index
    %397 = vector.load %arg3[%c1_57, %c0_58, %c0_59] : memref<25x8x128xf32, #tpu.memory_space<vmem>>, vector<1x8x128xf32>
    %398 = vector.shape_cast %397 : vector<1x8x128xf32> to vector<8x128xf32>
    %399 = arith.mulf %287, %398 : vector<8x128xf32>
    %400 = arith.addf %279, %399 : vector<8x128xf32>
    %401 = arith.mulf %288, %398 : vector<8x128xf32>
    %402 = arith.addf %281, %401 : vector<8x128xf32>
    %403 = arith.mulf %289, %398 : vector<8x128xf32>
    %404 = arith.addf %283, %403 : vector<8x128xf32>
    %405 = arith.mulf %290, %398 : vector<8x128xf32>
    %406 = arith.addf %285, %405 : vector<8x128xf32>
    %407 = arith.mulf %291, %398 : vector<8x128xf32>
    %408 = arith.addf %271, %407 : vector<8x128xf32>
    %409 = arith.mulf %292, %398 : vector<8x128xf32>
    %410 = arith.addf %255, %409 : vector<8x128xf32>
    %c6 = arith.constant 6 : index
    %c0_60 = arith.constant 0 : index
    %c0_61 = arith.constant 0 : index
    %411 = vector.load %arg3[%c6, %c0_60, %c0_61] : memref<25x8x128xf32, #tpu.memory_space<vmem>>, vector<1x8x128xf32>
    %412 = vector.shape_cast %411 : vector<1x8x128xf32> to vector<8x128xf32>
    %413 = arith.mulf %287, %412 : vector<8x128xf32>
    %414 = arith.addf %277, %413 : vector<8x128xf32>
    %415 = arith.mulf %288, %412 : vector<8x128xf32>
    %416 = arith.addf %400, %415 : vector<8x128xf32>
    %417 = arith.mulf %289, %412 : vector<8x128xf32>
    %418 = arith.addf %402, %417 : vector<8x128xf32>
    %419 = arith.mulf %290, %412 : vector<8x128xf32>
    %420 = arith.addf %404, %419 : vector<8x128xf32>
    %421 = arith.mulf %291, %412 : vector<8x128xf32>
    %422 = arith.addf %406, %421 : vector<8x128xf32>
    %423 = arith.mulf %292, %412 : vector<8x128xf32>
    %424 = arith.addf %408, %423 : vector<8x128xf32>
    %425 = arith.mulf %293, %412 : vector<8x128xf32>
    %426 = arith.addf %410, %425 : vector<8x128xf32>
    %c11 = arith.constant 11 : index
    %c0_62 = arith.constant 0 : index
    %c0_63 = arith.constant 0 : index
    %427 = vector.load %arg3[%c11, %c0_62, %c0_63] : memref<25x8x128xf32, #tpu.memory_space<vmem>>, vector<1x8x128xf32>
    %428 = vector.shape_cast %427 : vector<1x8x128xf32> to vector<8x128xf32>
    %429 = arith.mulf %287, %428 : vector<8x128xf32>
    %430 = arith.addf %275, %429 : vector<8x128xf32>
    %431 = arith.mulf %288, %428 : vector<8x128xf32>
    %432 = arith.addf %414, %431 : vector<8x128xf32>
    %433 = arith.mulf %289, %428 : vector<8x128xf32>
    %434 = arith.addf %416, %433 : vector<8x128xf32>
    %435 = arith.mulf %290, %428 : vector<8x128xf32>
    %436 = arith.addf %418, %435 : vector<8x128xf32>
    %437 = arith.mulf %291, %428 : vector<8x128xf32>
    %438 = arith.addf %420, %437 : vector<8x128xf32>
    %439 = arith.mulf %292, %428 : vector<8x128xf32>
    %440 = arith.addf %422, %439 : vector<8x128xf32>
    %441 = arith.mulf %293, %428 : vector<8x128xf32>
    %442 = arith.addf %424, %441 : vector<8x128xf32>
    %443 = arith.mulf %294, %428 : vector<8x128xf32>
    %444 = arith.addf %426, %443 : vector<8x128xf32>
    %c16_64 = arith.constant 16 : index
    %c0_65 = arith.constant 0 : index
    %c0_66 = arith.constant 0 : index
    %445 = vector.load %arg3[%c16_64, %c0_65, %c0_66] : memref<25x8x128xf32, #tpu.memory_space<vmem>>, vector<1x8x128xf32>
    %446 = vector.shape_cast %445 : vector<1x8x128xf32> to vector<8x128xf32>
    %447 = arith.mulf %288, %446 : vector<8x128xf32>
    %448 = arith.addf %430, %447 : vector<8x128xf32>
    %449 = arith.mulf %289, %446 : vector<8x128xf32>
    %450 = arith.addf %432, %449 : vector<8x128xf32>
    %451 = arith.mulf %290, %446 : vector<8x128xf32>
    %452 = arith.addf %434, %451 : vector<8x128xf32>
    %453 = arith.mulf %291, %446 : vector<8x128xf32>
    %454 = arith.addf %436, %453 : vector<8x128xf32>
    %455 = arith.mulf %292, %446 : vector<8x128xf32>
    %456 = arith.addf %438, %455 : vector<8x128xf32>
    %457 = arith.mulf %293, %446 : vector<8x128xf32>
    %458 = arith.addf %440, %457 : vector<8x128xf32>
    %459 = arith.mulf %294, %446 : vector<8x128xf32>
    %460 = arith.addf %442, %459 : vector<8x128xf32>
    %c21_67 = arith.constant 21 : index
    %c0_68 = arith.constant 0 : index
    %c0_69 = arith.constant 0 : index
    %461 = vector.load %arg3[%c21_67, %c0_68, %c0_69] : memref<25x8x128xf32, #tpu.memory_space<vmem>>, vector<1x8x128xf32>
    %462 = vector.shape_cast %461 : vector<1x8x128xf32> to vector<8x128xf32>
    %463 = arith.mulf %289, %462 : vector<8x128xf32>
    %464 = arith.addf %448, %463 : vector<8x128xf32>
    %465 = arith.mulf %290, %462 : vector<8x128xf32>
    %466 = arith.addf %450, %465 : vector<8x128xf32>
    %467 = arith.mulf %291, %462 : vector<8x128xf32>
    %468 = arith.addf %452, %467 : vector<8x128xf32>
    %469 = arith.mulf %292, %462 : vector<8x128xf32>
    %470 = arith.addf %454, %469 : vector<8x128xf32>
    %471 = arith.mulf %293, %462 : vector<8x128xf32>
    %472 = arith.addf %456, %471 : vector<8x128xf32>
    %473 = arith.mulf %294, %462 : vector<8x128xf32>
    %474 = arith.addf %458, %473 : vector<8x128xf32>
    %475 = vector.extract_strided_slice %1 {offsets = [0, 0], sizes = [8, 128], strides = [1, 1]} : vector<64x128xf32> to vector<8x128xf32>
    %476 = vector.extract_strided_slice %1 {offsets = [8, 0], sizes = [8, 128], strides = [1, 1]} : vector<64x128xf32> to vector<8x128xf32>
    %477 = vector.extract_strided_slice %1 {offsets = [16, 0], sizes = [8, 128], strides = [1, 1]} : vector<64x128xf32> to vector<8x128xf32>
    %478 = vector.extract_strided_slice %1 {offsets = [24, 0], sizes = [8, 128], strides = [1, 1]} : vector<64x128xf32> to vector<8x128xf32>
    %479 = vector.extract_strided_slice %1 {offsets = [32, 0], sizes = [8, 128], strides = [1, 1]} : vector<64x128xf32> to vector<8x128xf32>
    %480 = vector.extract_strided_slice %1 {offsets = [40, 0], sizes = [8, 128], strides = [1, 1]} : vector<64x128xf32> to vector<8x128xf32>
    %481 = vector.extract_strided_slice %1 {offsets = [48, 0], sizes = [8, 128], strides = [1, 1]} : vector<64x128xf32> to vector<8x128xf32>
    %482 = vector.extract_strided_slice %1 {offsets = [56, 0], sizes = [8, 128], strides = [1, 1]} : vector<64x128xf32> to vector<8x128xf32>
    %c3 = arith.constant 3 : index
    %c0_70 = arith.constant 0 : index
    %c0_71 = arith.constant 0 : index
    %483 = vector.load %arg2[%c3, %c0_70, %c0_71] : memref<49x8x128xf32, #tpu.memory_space<vmem>>, vector<1x8x128xf32>
    %484 = vector.shape_cast %483 : vector<1x8x128xf32> to vector<8x128xf32>
    %485 = arith.mulf %475, %484 : vector<8x128xf32>
    %486 = arith.addf %394, %485 : vector<8x128xf32>
    %487 = arith.mulf %476, %484 : vector<8x128xf32>
    %488 = arith.addf %396, %487 : vector<8x128xf32>
    %489 = arith.mulf %477, %484 : vector<8x128xf32>
    %490 = arith.addf %384, %489 : vector<8x128xf32>
    %491 = arith.mulf %478, %484 : vector<8x128xf32>
    %492 = arith.addf %370, %491 : vector<8x128xf32>
    %493 = arith.mulf %479, %484 : vector<8x128xf32>
    %494 = arith.addf %354, %493 : vector<8x128xf32>
    %c10_72 = arith.constant 10 : index
    %c0_73 = arith.constant 0 : index
    %c0_74 = arith.constant 0 : index
    %495 = vector.load %arg2[%c10_72, %c0_73, %c0_74] : memref<49x8x128xf32, #tpu.memory_space<vmem>>, vector<1x8x128xf32>
    %496 = vector.shape_cast %495 : vector<1x8x128xf32> to vector<8x128xf32>
    %497 = arith.mulf %475, %496 : vector<8x128xf32>
    %498 = arith.addf %392, %497 : vector<8x128xf32>
    %499 = arith.mulf %476, %496 : vector<8x128xf32>
    %500 = arith.addf %486, %499 : vector<8x128xf32>
    %501 = arith.mulf %477, %496 : vector<8x128xf32>
    %502 = arith.addf %488, %501 : vector<8x128xf32>
    %503 = arith.mulf %478, %496 : vector<8x128xf32>
    %504 = arith.addf %490, %503 : vector<8x128xf32>
    %505 = arith.mulf %479, %496 : vector<8x128xf32>
    %506 = arith.addf %492, %505 : vector<8x128xf32>
    %507 = arith.mulf %480, %496 : vector<8x128xf32>
    %508 = arith.addf %494, %507 : vector<8x128xf32>
    %c17 = arith.constant 17 : index
    %c0_75 = arith.constant 0 : index
    %c0_76 = arith.constant 0 : index
    %509 = vector.load %arg2[%c17, %c0_75, %c0_76] : memref<49x8x128xf32, #tpu.memory_space<vmem>>, vector<1x8x128xf32>
    %510 = vector.shape_cast %509 : vector<1x8x128xf32> to vector<8x128xf32>
    %511 = arith.mulf %475, %510 : vector<8x128xf32>
    %512 = arith.addf %390, %511 : vector<8x128xf32>
    %513 = arith.mulf %476, %510 : vector<8x128xf32>
    %514 = arith.addf %498, %513 : vector<8x128xf32>
    %515 = arith.mulf %477, %510 : vector<8x128xf32>
    %516 = arith.addf %500, %515 : vector<8x128xf32>
    %517 = arith.mulf %478, %510 : vector<8x128xf32>
    %518 = arith.addf %502, %517 : vector<8x128xf32>
    %519 = arith.mulf %479, %510 : vector<8x128xf32>
    %520 = arith.addf %504, %519 : vector<8x128xf32>
    %521 = arith.mulf %480, %510 : vector<8x128xf32>
    %522 = arith.addf %506, %521 : vector<8x128xf32>
    %523 = arith.mulf %481, %510 : vector<8x128xf32>
    %524 = arith.addf %508, %523 : vector<8x128xf32>
    %c24 = arith.constant 24 : index
    %c0_77 = arith.constant 0 : index
    %c0_78 = arith.constant 0 : index
    %525 = vector.load %arg2[%c24, %c0_77, %c0_78] : memref<49x8x128xf32, #tpu.memory_space<vmem>>, vector<1x8x128xf32>
    %526 = vector.shape_cast %525 : vector<1x8x128xf32> to vector<8x128xf32>
    %527 = arith.mulf %475, %526 : vector<8x128xf32>
    %528 = arith.addf %388, %527 : vector<8x128xf32>
    %529 = arith.mulf %476, %526 : vector<8x128xf32>
    %530 = arith.addf %512, %529 : vector<8x128xf32>
    %531 = arith.mulf %477, %526 : vector<8x128xf32>
    %532 = arith.addf %514, %531 : vector<8x128xf32>
    %533 = arith.mulf %478, %526 : vector<8x128xf32>
    %534 = arith.addf %516, %533 : vector<8x128xf32>
    %535 = arith.mulf %479, %526 : vector<8x128xf32>
    %536 = arith.addf %518, %535 : vector<8x128xf32>
    %537 = arith.mulf %480, %526 : vector<8x128xf32>
    %538 = arith.addf %520, %537 : vector<8x128xf32>
    %539 = arith.mulf %481, %526 : vector<8x128xf32>
    %540 = arith.addf %522, %539 : vector<8x128xf32>
    %541 = arith.mulf %482, %526 : vector<8x128xf32>
    %542 = arith.addf %524, %541 : vector<8x128xf32>
    %c31 = arith.constant 31 : index
    %c0_79 = arith.constant 0 : index
    %c0_80 = arith.constant 0 : index
    %543 = vector.load %arg2[%c31, %c0_79, %c0_80] : memref<49x8x128xf32, #tpu.memory_space<vmem>>, vector<1x8x128xf32>
    %544 = vector.shape_cast %543 : vector<1x8x128xf32> to vector<8x128xf32>
    %545 = arith.mulf %476, %544 : vector<8x128xf32>
    %546 = arith.addf %528, %545 : vector<8x128xf32>
    %547 = arith.mulf %477, %544 : vector<8x128xf32>
    %548 = arith.addf %530, %547 : vector<8x128xf32>
    %549 = arith.mulf %478, %544 : vector<8x128xf32>
    %550 = arith.addf %532, %549 : vector<8x128xf32>
    %551 = arith.mulf %479, %544 : vector<8x128xf32>
    %552 = arith.addf %534, %551 : vector<8x128xf32>
    %553 = arith.mulf %480, %544 : vector<8x128xf32>
    %554 = arith.addf %536, %553 : vector<8x128xf32>
    %555 = arith.mulf %481, %544 : vector<8x128xf32>
    %556 = arith.addf %538, %555 : vector<8x128xf32>
    %557 = arith.mulf %482, %544 : vector<8x128xf32>
    %558 = arith.addf %540, %557 : vector<8x128xf32>
    %c38 = arith.constant 38 : index
    %c0_81 = arith.constant 0 : index
    %c0_82 = arith.constant 0 : index
    %559 = vector.load %arg2[%c38, %c0_81, %c0_82] : memref<49x8x128xf32, #tpu.memory_space<vmem>>, vector<1x8x128xf32>
    %560 = vector.shape_cast %559 : vector<1x8x128xf32> to vector<8x128xf32>
    %561 = arith.mulf %477, %560 : vector<8x128xf32>
    %562 = arith.addf %546, %561 : vector<8x128xf32>
    %563 = arith.mulf %478, %560 : vector<8x128xf32>
    %564 = arith.addf %548, %563 : vector<8x128xf32>
    %565 = arith.mulf %479, %560 : vector<8x128xf32>
    %566 = arith.addf %550, %565 : vector<8x128xf32>
    %567 = arith.mulf %480, %560 : vector<8x128xf32>
    %568 = arith.addf %552, %567 : vector<8x128xf32>
    %569 = arith.mulf %481, %560 : vector<8x128xf32>
    %570 = arith.addf %554, %569 : vector<8x128xf32>
    %571 = arith.mulf %482, %560 : vector<8x128xf32>
    %572 = arith.addf %556, %571 : vector<8x128xf32>
    %c45 = arith.constant 45 : index
    %c0_83 = arith.constant 0 : index
    %c0_84 = arith.constant 0 : index
    %573 = vector.load %arg2[%c45, %c0_83, %c0_84] : memref<49x8x128xf32, #tpu.memory_space<vmem>>, vector<1x8x128xf32>
    %574 = vector.shape_cast %573 : vector<1x8x128xf32> to vector<8x128xf32>
    %575 = arith.mulf %478, %574 : vector<8x128xf32>
    %576 = arith.addf %562, %575 : vector<8x128xf32>
    %577 = arith.mulf %479, %574 : vector<8x128xf32>
    %578 = arith.addf %564, %577 : vector<8x128xf32>
    %579 = arith.mulf %480, %574 : vector<8x128xf32>
    %580 = arith.addf %566, %579 : vector<8x128xf32>
    %581 = arith.mulf %481, %574 : vector<8x128xf32>
    %582 = arith.addf %568, %581 : vector<8x128xf32>
    %583 = arith.mulf %482, %574 : vector<8x128xf32>
    %584 = arith.addf %570, %583 : vector<8x128xf32>
    %c2_85 = arith.constant 2 : index
    %c0_86 = arith.constant 0 : index
    %c0_87 = arith.constant 0 : index
    %585 = vector.load %arg3[%c2_85, %c0_86, %c0_87] : memref<25x8x128xf32, #tpu.memory_space<vmem>>, vector<1x8x128xf32>
    %586 = vector.shape_cast %585 : vector<1x8x128xf32> to vector<8x128xf32>
    %587 = arith.mulf %475, %586 : vector<8x128xf32>
    %588 = arith.addf %468, %587 : vector<8x128xf32>
    %589 = arith.mulf %476, %586 : vector<8x128xf32>
    %590 = arith.addf %470, %589 : vector<8x128xf32>
    %591 = arith.mulf %477, %586 : vector<8x128xf32>
    %592 = arith.addf %472, %591 : vector<8x128xf32>
    %593 = arith.mulf %478, %586 : vector<8x128xf32>
    %594 = arith.addf %474, %593 : vector<8x128xf32>
    %595 = arith.mulf %479, %586 : vector<8x128xf32>
    %596 = arith.addf %460, %595 : vector<8x128xf32>
    %597 = arith.mulf %480, %586 : vector<8x128xf32>
    %598 = arith.addf %444, %597 : vector<8x128xf32>
    %c7_88 = arith.constant 7 : index
    %c0_89 = arith.constant 0 : index
    %c0_90 = arith.constant 0 : index
    %599 = vector.load %arg3[%c7_88, %c0_89, %c0_90] : memref<25x8x128xf32, #tpu.memory_space<vmem>>, vector<1x8x128xf32>
    %600 = vector.shape_cast %599 : vector<1x8x128xf32> to vector<8x128xf32>
    %601 = arith.mulf %475, %600 : vector<8x128xf32>
    %602 = arith.addf %466, %601 : vector<8x128xf32>
    %603 = arith.mulf %476, %600 : vector<8x128xf32>
    %604 = arith.addf %588, %603 : vector<8x128xf32>
    %605 = arith.mulf %477, %600 : vector<8x128xf32>
    %606 = arith.addf %590, %605 : vector<8x128xf32>
    %607 = arith.mulf %478, %600 : vector<8x128xf32>
    %608 = arith.addf %592, %607 : vector<8x128xf32>
    %609 = arith.mulf %479, %600 : vector<8x128xf32>
    %610 = arith.addf %594, %609 : vector<8x128xf32>
    %611 = arith.mulf %480, %600 : vector<8x128xf32>
    %612 = arith.addf %596, %611 : vector<8x128xf32>
    %613 = arith.mulf %481, %600 : vector<8x128xf32>
    %614 = arith.addf %598, %613 : vector<8x128xf32>
    %c12 = arith.constant 12 : index
    %c0_91 = arith.constant 0 : index
    %c0_92 = arith.constant 0 : index
    %615 = vector.load %arg3[%c12, %c0_91, %c0_92] : memref<25x8x128xf32, #tpu.memory_space<vmem>>, vector<1x8x128xf32>
    %616 = vector.shape_cast %615 : vector<1x8x128xf32> to vector<8x128xf32>
    %617 = arith.mulf %475, %616 : vector<8x128xf32>
    %618 = arith.addf %464, %617 : vector<8x128xf32>
    %619 = arith.mulf %476, %616 : vector<8x128xf32>
    %620 = arith.addf %602, %619 : vector<8x128xf32>
    %621 = arith.mulf %477, %616 : vector<8x128xf32>
    %622 = arith.addf %604, %621 : vector<8x128xf32>
    %623 = arith.mulf %478, %616 : vector<8x128xf32>
    %624 = arith.addf %606, %623 : vector<8x128xf32>
    %625 = arith.mulf %479, %616 : vector<8x128xf32>
    %626 = arith.addf %608, %625 : vector<8x128xf32>
    %627 = arith.mulf %480, %616 : vector<8x128xf32>
    %628 = arith.addf %610, %627 : vector<8x128xf32>
    %629 = arith.mulf %481, %616 : vector<8x128xf32>
    %630 = arith.addf %612, %629 : vector<8x128xf32>
    %631 = arith.mulf %482, %616 : vector<8x128xf32>
    %632 = arith.addf %614, %631 : vector<8x128xf32>
    %c17_93 = arith.constant 17 : index
    %c0_94 = arith.constant 0 : index
    %c0_95 = arith.constant 0 : index
    %633 = vector.load %arg3[%c17_93, %c0_94, %c0_95] : memref<25x8x128xf32, #tpu.memory_space<vmem>>, vector<1x8x128xf32>
    %634 = vector.shape_cast %633 : vector<1x8x128xf32> to vector<8x128xf32>
    %635 = arith.mulf %476, %634 : vector<8x128xf32>
    %636 = arith.addf %618, %635 : vector<8x128xf32>
    %637 = arith.mulf %477, %634 : vector<8x128xf32>
    %638 = arith.addf %620, %637 : vector<8x128xf32>
    %639 = arith.mulf %478, %634 : vector<8x128xf32>
    %640 = arith.addf %622, %639 : vector<8x128xf32>
    %641 = arith.mulf %479, %634 : vector<8x128xf32>
    %642 = arith.addf %624, %641 : vector<8x128xf32>
    %643 = arith.mulf %480, %634 : vector<8x128xf32>
    %644 = arith.addf %626, %643 : vector<8x128xf32>
    %645 = arith.mulf %481, %634 : vector<8x128xf32>
    %646 = arith.addf %628, %645 : vector<8x128xf32>
    %647 = arith.mulf %482, %634 : vector<8x128xf32>
    %648 = arith.addf %630, %647 : vector<8x128xf32>
    %c22_96 = arith.constant 22 : index
    %c0_97 = arith.constant 0 : index
    %c0_98 = arith.constant 0 : index
    %649 = vector.load %arg3[%c22_96, %c0_97, %c0_98] : memref<25x8x128xf32, #tpu.memory_space<vmem>>, vector<1x8x128xf32>
    %650 = vector.shape_cast %649 : vector<1x8x128xf32> to vector<8x128xf32>
    %651 = arith.mulf %477, %650 : vector<8x128xf32>
    %652 = arith.addf %636, %651 : vector<8x128xf32>
    %653 = arith.mulf %478, %650 : vector<8x128xf32>
    %654 = arith.addf %638, %653 : vector<8x128xf32>
    %655 = arith.mulf %479, %650 : vector<8x128xf32>
    %656 = arith.addf %640, %655 : vector<8x128xf32>
    %657 = arith.mulf %480, %650 : vector<8x128xf32>
    %658 = arith.addf %642, %657 : vector<8x128xf32>
    %659 = arith.mulf %481, %650 : vector<8x128xf32>
    %660 = arith.addf %644, %659 : vector<8x128xf32>
    %661 = arith.mulf %482, %650 : vector<8x128xf32>
    %662 = arith.addf %646, %661 : vector<8x128xf32>
    %c63_i32 = arith.constant 63 : i32
    %663 = tpu.dynamic_rotate %1 by %c63_i32 dim 0 : vector<64x128xf32>, i32 -> vector<64x128xf32>
    %664 = vector.extract_strided_slice %663 {offsets = [0, 0], sizes = [8, 128], strides = [1, 1]} : vector<64x128xf32> to vector<8x128xf32>
    %665 = vector.extract_strided_slice %663 {offsets = [8, 0], sizes = [8, 128], strides = [1, 1]} : vector<64x128xf32> to vector<8x128xf32>
    %666 = vector.extract_strided_slice %663 {offsets = [16, 0], sizes = [8, 128], strides = [1, 1]} : vector<64x128xf32> to vector<8x128xf32>
    %667 = vector.extract_strided_slice %663 {offsets = [24, 0], sizes = [8, 128], strides = [1, 1]} : vector<64x128xf32> to vector<8x128xf32>
    %668 = vector.extract_strided_slice %663 {offsets = [32, 0], sizes = [8, 128], strides = [1, 1]} : vector<64x128xf32> to vector<8x128xf32>
    %669 = vector.extract_strided_slice %663 {offsets = [40, 0], sizes = [8, 128], strides = [1, 1]} : vector<64x128xf32> to vector<8x128xf32>
    %670 = vector.extract_strided_slice %663 {offsets = [48, 0], sizes = [8, 128], strides = [1, 1]} : vector<64x128xf32> to vector<8x128xf32>
    %671 = vector.extract_strided_slice %663 {offsets = [56, 0], sizes = [8, 128], strides = [1, 1]} : vector<64x128xf32> to vector<8x128xf32>
    %c4 = arith.constant 4 : index
    %c0_99 = arith.constant 0 : index
    %c0_100 = arith.constant 0 : index
    %672 = vector.load %arg2[%c4, %c0_99, %c0_100] : memref<49x8x128xf32, #tpu.memory_space<vmem>>, vector<1x8x128xf32>
    %673 = vector.shape_cast %672 : vector<1x8x128xf32> to vector<8x128xf32>
    %674 = arith.mulf %664, %673 : vector<8x128xf32>
    %675 = arith.addf %582, %674 : vector<8x128xf32>
    %676 = arith.mulf %665, %673 : vector<8x128xf32>
    %677 = arith.addf %584, %676 : vector<8x128xf32>
    %678 = arith.mulf %666, %673 : vector<8x128xf32>
    %679 = arith.addf %572, %678 : vector<8x128xf32>
    %680 = arith.mulf %667, %673 : vector<8x128xf32>
    %681 = arith.addf %558, %680 : vector<8x128xf32>
    %682 = arith.mulf %668, %673 : vector<8x128xf32>
    %683 = arith.addf %542, %682 : vector<8x128xf32>
    %c11_101 = arith.constant 11 : index
    %c0_102 = arith.constant 0 : index
    %c0_103 = arith.constant 0 : index
    %684 = vector.load %arg2[%c11_101, %c0_102, %c0_103] : memref<49x8x128xf32, #tpu.memory_space<vmem>>, vector<1x8x128xf32>
    %685 = vector.shape_cast %684 : vector<1x8x128xf32> to vector<8x128xf32>
    %686 = arith.mulf %664, %685 : vector<8x128xf32>
    %687 = arith.addf %580, %686 : vector<8x128xf32>
    %688 = arith.mulf %665, %685 : vector<8x128xf32>
    %689 = arith.addf %675, %688 : vector<8x128xf32>
    %690 = arith.mulf %666, %685 : vector<8x128xf32>
    %691 = arith.addf %677, %690 : vector<8x128xf32>
    %692 = arith.mulf %667, %685 : vector<8x128xf32>
    %693 = arith.addf %679, %692 : vector<8x128xf32>
    %694 = arith.mulf %668, %685 : vector<8x128xf32>
    %695 = arith.addf %681, %694 : vector<8x128xf32>
    %696 = arith.mulf %669, %685 : vector<8x128xf32>
    %697 = arith.addf %683, %696 : vector<8x128xf32>
    %c18 = arith.constant 18 : index
    %c0_104 = arith.constant 0 : index
    %c0_105 = arith.constant 0 : index
    %698 = vector.load %arg2[%c18, %c0_104, %c0_105] : memref<49x8x128xf32, #tpu.memory_space<vmem>>, vector<1x8x128xf32>
    %699 = vector.shape_cast %698 : vector<1x8x128xf32> to vector<8x128xf32>
    %700 = arith.mulf %664, %699 : vector<8x128xf32>
    %701 = arith.addf %578, %700 : vector<8x128xf32>
    %702 = arith.mulf %665, %699 : vector<8x128xf32>
    %703 = arith.addf %687, %702 : vector<8x128xf32>
    %704 = arith.mulf %666, %699 : vector<8x128xf32>
    %705 = arith.addf %689, %704 : vector<8x128xf32>
    %706 = arith.mulf %667, %699 : vector<8x128xf32>
    %707 = arith.addf %691, %706 : vector<8x128xf32>
    %708 = arith.mulf %668, %699 : vector<8x128xf32>
    %709 = arith.addf %693, %708 : vector<8x128xf32>
    %710 = arith.mulf %669, %699 : vector<8x128xf32>
    %711 = arith.addf %695, %710 : vector<8x128xf32>
    %712 = arith.mulf %670, %699 : vector<8x128xf32>
    %713 = arith.addf %697, %712 : vector<8x128xf32>
    %c25 = arith.constant 25 : index
    %c0_106 = arith.constant 0 : index
    %c0_107 = arith.constant 0 : index
    %714 = vector.load %arg2[%c25, %c0_106, %c0_107] : memref<49x8x128xf32, #tpu.memory_space<vmem>>, vector<1x8x128xf32>
    %715 = vector.shape_cast %714 : vector<1x8x128xf32> to vector<8x128xf32>
    %716 = arith.mulf %664, %715 : vector<8x128xf32>
    %717 = arith.addf %576, %716 : vector<8x128xf32>
    %718 = arith.mulf %665, %715 : vector<8x128xf32>
    %719 = arith.addf %701, %718 : vector<8x128xf32>
    %720 = arith.mulf %666, %715 : vector<8x128xf32>
    %721 = arith.addf %703, %720 : vector<8x128xf32>
    %722 = arith.mulf %667, %715 : vector<8x128xf32>
    %723 = arith.addf %705, %722 : vector<8x128xf32>
    %724 = arith.mulf %668, %715 : vector<8x128xf32>
    %725 = arith.addf %707, %724 : vector<8x128xf32>
    %726 = arith.mulf %669, %715 : vector<8x128xf32>
    %727 = arith.addf %709, %726 : vector<8x128xf32>
    %728 = arith.mulf %670, %715 : vector<8x128xf32>
    %729 = arith.addf %711, %728 : vector<8x128xf32>
    %730 = arith.mulf %671, %715 : vector<8x128xf32>
    %731 = arith.addf %713, %730 : vector<8x128xf32>
    %c32 = arith.constant 32 : index
    %c0_108 = arith.constant 0 : index
    %c0_109 = arith.constant 0 : index
    %732 = vector.load %arg2[%c32, %c0_108, %c0_109] : memref<49x8x128xf32, #tpu.memory_space<vmem>>, vector<1x8x128xf32>
    %733 = vector.shape_cast %732 : vector<1x8x128xf32> to vector<8x128xf32>
    %734 = arith.mulf %665, %733 : vector<8x128xf32>
    %735 = arith.addf %717, %734 : vector<8x128xf32>
    %736 = arith.mulf %666, %733 : vector<8x128xf32>
    %737 = arith.addf %719, %736 : vector<8x128xf32>
    %738 = arith.mulf %667, %733 : vector<8x128xf32>
    %739 = arith.addf %721, %738 : vector<8x128xf32>
    %740 = arith.mulf %668, %733 : vector<8x128xf32>
    %741 = arith.addf %723, %740 : vector<8x128xf32>
    %742 = arith.mulf %669, %733 : vector<8x128xf32>
    %743 = arith.addf %725, %742 : vector<8x128xf32>
    %744 = arith.mulf %670, %733 : vector<8x128xf32>
    %745 = arith.addf %727, %744 : vector<8x128xf32>
    %746 = arith.mulf %671, %733 : vector<8x128xf32>
    %747 = arith.addf %729, %746 : vector<8x128xf32>
    %c39 = arith.constant 39 : index
    %c0_110 = arith.constant 0 : index
    %c0_111 = arith.constant 0 : index
    %748 = vector.load %arg2[%c39, %c0_110, %c0_111] : memref<49x8x128xf32, #tpu.memory_space<vmem>>, vector<1x8x128xf32>
    %749 = vector.shape_cast %748 : vector<1x8x128xf32> to vector<8x128xf32>
    %750 = arith.mulf %666, %749 : vector<8x128xf32>
    %751 = arith.addf %735, %750 : vector<8x128xf32>
    %752 = arith.mulf %667, %749 : vector<8x128xf32>
    %753 = arith.addf %737, %752 : vector<8x128xf32>
    %754 = arith.mulf %668, %749 : vector<8x128xf32>
    %755 = arith.addf %739, %754 : vector<8x128xf32>
    %756 = arith.mulf %669, %749 : vector<8x128xf32>
    %757 = arith.addf %741, %756 : vector<8x128xf32>
    %758 = arith.mulf %670, %749 : vector<8x128xf32>
    %759 = arith.addf %743, %758 : vector<8x128xf32>
    %760 = arith.mulf %671, %749 : vector<8x128xf32>
    %761 = arith.addf %745, %760 : vector<8x128xf32>
    %c46 = arith.constant 46 : index
    %c0_112 = arith.constant 0 : index
    %c0_113 = arith.constant 0 : index
    %762 = vector.load %arg2[%c46, %c0_112, %c0_113] : memref<49x8x128xf32, #tpu.memory_space<vmem>>, vector<1x8x128xf32>
    %763 = vector.shape_cast %762 : vector<1x8x128xf32> to vector<8x128xf32>
    %764 = arith.mulf %667, %763 : vector<8x128xf32>
    %765 = arith.addf %751, %764 : vector<8x128xf32>
    %766 = arith.mulf %668, %763 : vector<8x128xf32>
    %767 = arith.addf %753, %766 : vector<8x128xf32>
    %768 = arith.mulf %669, %763 : vector<8x128xf32>
    %769 = arith.addf %755, %768 : vector<8x128xf32>
    %770 = arith.mulf %670, %763 : vector<8x128xf32>
    %771 = arith.addf %757, %770 : vector<8x128xf32>
    %772 = arith.mulf %671, %763 : vector<8x128xf32>
    %773 = arith.addf %759, %772 : vector<8x128xf32>
    %c3_114 = arith.constant 3 : index
    %c0_115 = arith.constant 0 : index
    %c0_116 = arith.constant 0 : index
    %774 = vector.load %arg3[%c3_114, %c0_115, %c0_116] : memref<25x8x128xf32, #tpu.memory_space<vmem>>, vector<1x8x128xf32>
    %775 = vector.shape_cast %774 : vector<1x8x128xf32> to vector<8x128xf32>
    %776 = arith.mulf %664, %775 : vector<8x128xf32>
    %777 = arith.addf %656, %776 : vector<8x128xf32>
    %778 = arith.mulf %665, %775 : vector<8x128xf32>
    %779 = arith.addf %658, %778 : vector<8x128xf32>
    %780 = arith.mulf %666, %775 : vector<8x128xf32>
    %781 = arith.addf %660, %780 : vector<8x128xf32>
    %782 = arith.mulf %667, %775 : vector<8x128xf32>
    %783 = arith.addf %662, %782 : vector<8x128xf32>
    %784 = arith.mulf %668, %775 : vector<8x128xf32>
    %785 = arith.addf %648, %784 : vector<8x128xf32>
    %786 = arith.mulf %669, %775 : vector<8x128xf32>
    %787 = arith.addf %632, %786 : vector<8x128xf32>
    %c8_117 = arith.constant 8 : index
    %c0_118 = arith.constant 0 : index
    %c0_119 = arith.constant 0 : index
    %788 = vector.load %arg3[%c8_117, %c0_118, %c0_119] : memref<25x8x128xf32, #tpu.memory_space<vmem>>, vector<1x8x128xf32>
    %789 = vector.shape_cast %788 : vector<1x8x128xf32> to vector<8x128xf32>
    %790 = arith.mulf %664, %789 : vector<8x128xf32>
    %791 = arith.addf %654, %790 : vector<8x128xf32>
    %792 = arith.mulf %665, %789 : vector<8x128xf32>
    %793 = arith.addf %777, %792 : vector<8x128xf32>
    %794 = arith.mulf %666, %789 : vector<8x128xf32>
    %795 = arith.addf %779, %794 : vector<8x128xf32>
    %796 = arith.mulf %667, %789 : vector<8x128xf32>
    %797 = arith.addf %781, %796 : vector<8x128xf32>
    %798 = arith.mulf %668, %789 : vector<8x128xf32>
    %799 = arith.addf %783, %798 : vector<8x128xf32>
    %800 = arith.mulf %669, %789 : vector<8x128xf32>
    %801 = arith.addf %785, %800 : vector<8x128xf32>
    %802 = arith.mulf %670, %789 : vector<8x128xf32>
    %803 = arith.addf %787, %802 : vector<8x128xf32>
    %c13 = arith.constant 13 : index
    %c0_120 = arith.constant 0 : index
    %c0_121 = arith.constant 0 : index
    %804 = vector.load %arg3[%c13, %c0_120, %c0_121] : memref<25x8x128xf32, #tpu.memory_space<vmem>>, vector<1x8x128xf32>
    %805 = vector.shape_cast %804 : vector<1x8x128xf32> to vector<8x128xf32>
    %806 = arith.mulf %664, %805 : vector<8x128xf32>
    %807 = arith.addf %652, %806 : vector<8x128xf32>
    %808 = arith.mulf %665, %805 : vector<8x128xf32>
    %809 = arith.addf %791, %808 : vector<8x128xf32>
    %810 = arith.mulf %666, %805 : vector<8x128xf32>
    %811 = arith.addf %793, %810 : vector<8x128xf32>
    %812 = arith.mulf %667, %805 : vector<8x128xf32>
    %813 = arith.addf %795, %812 : vector<8x128xf32>
    %814 = arith.mulf %668, %805 : vector<8x128xf32>
    %815 = arith.addf %797, %814 : vector<8x128xf32>
    %816 = arith.mulf %669, %805 : vector<8x128xf32>
    %817 = arith.addf %799, %816 : vector<8x128xf32>
    %818 = arith.mulf %670, %805 : vector<8x128xf32>
    %819 = arith.addf %801, %818 : vector<8x128xf32>
    %820 = arith.mulf %671, %805 : vector<8x128xf32>
    %821 = arith.addf %803, %820 : vector<8x128xf32>
    %c18_122 = arith.constant 18 : index
    %c0_123 = arith.constant 0 : index
    %c0_124 = arith.constant 0 : index
    %822 = vector.load %arg3[%c18_122, %c0_123, %c0_124] : memref<25x8x128xf32, #tpu.memory_space<vmem>>, vector<1x8x128xf32>
    %823 = vector.shape_cast %822 : vector<1x8x128xf32> to vector<8x128xf32>
    %824 = arith.mulf %665, %823 : vector<8x128xf32>
    %825 = arith.addf %807, %824 : vector<8x128xf32>
    %826 = arith.mulf %666, %823 : vector<8x128xf32>
    %827 = arith.addf %809, %826 : vector<8x128xf32>
    %828 = arith.mulf %667, %823 : vector<8x128xf32>
    %829 = arith.addf %811, %828 : vector<8x128xf32>
    %830 = arith.mulf %668, %823 : vector<8x128xf32>
    %831 = arith.addf %813, %830 : vector<8x128xf32>
    %832 = arith.mulf %669, %823 : vector<8x128xf32>
    %833 = arith.addf %815, %832 : vector<8x128xf32>
    %834 = arith.mulf %670, %823 : vector<8x128xf32>
    %835 = arith.addf %817, %834 : vector<8x128xf32>
    %836 = arith.mulf %671, %823 : vector<8x128xf32>
    %837 = arith.addf %819, %836 : vector<8x128xf32>
    %c23_125 = arith.constant 23 : index
    %c0_126 = arith.constant 0 : index
    %c0_127 = arith.constant 0 : index
    %838 = vector.load %arg3[%c23_125, %c0_126, %c0_127] : memref<25x8x128xf32, #tpu.memory_space<vmem>>, vector<1x8x128xf32>
    %839 = vector.shape_cast %838 : vector<1x8x128xf32> to vector<8x128xf32>
    %840 = arith.mulf %666, %839 : vector<8x128xf32>
    %841 = arith.addf %825, %840 : vector<8x128xf32>
    %842 = arith.mulf %667, %839 : vector<8x128xf32>
    %843 = arith.addf %827, %842 : vector<8x128xf32>
    %844 = arith.mulf %668, %839 : vector<8x128xf32>
    %845 = arith.addf %829, %844 : vector<8x128xf32>
    %846 = arith.mulf %669, %839 : vector<8x128xf32>
    %847 = arith.addf %831, %846 : vector<8x128xf32>
    %848 = arith.mulf %670, %839 : vector<8x128xf32>
    %849 = arith.addf %833, %848 : vector<8x128xf32>
    %850 = arith.mulf %671, %839 : vector<8x128xf32>
    %851 = arith.addf %835, %850 : vector<8x128xf32>
    %c62_i32 = arith.constant 62 : i32
    %852 = tpu.dynamic_rotate %1 by %c62_i32 dim 0 : vector<64x128xf32>, i32 -> vector<64x128xf32>
    %853 = vector.extract_strided_slice %852 {offsets = [0, 0], sizes = [8, 128], strides = [1, 1]} : vector<64x128xf32> to vector<8x128xf32>
    %854 = vector.extract_strided_slice %852 {offsets = [8, 0], sizes = [8, 128], strides = [1, 1]} : vector<64x128xf32> to vector<8x128xf32>
    %855 = vector.extract_strided_slice %852 {offsets = [16, 0], sizes = [8, 128], strides = [1, 1]} : vector<64x128xf32> to vector<8x128xf32>
    %856 = vector.extract_strided_slice %852 {offsets = [24, 0], sizes = [8, 128], strides = [1, 1]} : vector<64x128xf32> to vector<8x128xf32>
    %857 = vector.extract_strided_slice %852 {offsets = [32, 0], sizes = [8, 128], strides = [1, 1]} : vector<64x128xf32> to vector<8x128xf32>
    %858 = vector.extract_strided_slice %852 {offsets = [40, 0], sizes = [8, 128], strides = [1, 1]} : vector<64x128xf32> to vector<8x128xf32>
    %859 = vector.extract_strided_slice %852 {offsets = [48, 0], sizes = [8, 128], strides = [1, 1]} : vector<64x128xf32> to vector<8x128xf32>
    %860 = vector.extract_strided_slice %852 {offsets = [56, 0], sizes = [8, 128], strides = [1, 1]} : vector<64x128xf32> to vector<8x128xf32>
    %c5_128 = arith.constant 5 : index
    %c0_129 = arith.constant 0 : index
    %c0_130 = arith.constant 0 : index
    %861 = vector.load %arg2[%c5_128, %c0_129, %c0_130] : memref<49x8x128xf32, #tpu.memory_space<vmem>>, vector<1x8x128xf32>
    %862 = vector.shape_cast %861 : vector<1x8x128xf32> to vector<8x128xf32>
    %863 = arith.mulf %853, %862 : vector<8x128xf32>
    %864 = arith.addf %771, %863 : vector<8x128xf32>
    %865 = arith.mulf %854, %862 : vector<8x128xf32>
    %866 = arith.addf %773, %865 : vector<8x128xf32>
    %867 = arith.mulf %855, %862 : vector<8x128xf32>
    %868 = arith.addf %761, %867 : vector<8x128xf32>
    %869 = arith.mulf %856, %862 : vector<8x128xf32>
    %870 = arith.addf %747, %869 : vector<8x128xf32>
    %871 = arith.mulf %857, %862 : vector<8x128xf32>
    %872 = arith.addf %731, %871 : vector<8x128xf32>
    %c12_131 = arith.constant 12 : index
    %c0_132 = arith.constant 0 : index
    %c0_133 = arith.constant 0 : index
    %873 = vector.load %arg2[%c12_131, %c0_132, %c0_133] : memref<49x8x128xf32, #tpu.memory_space<vmem>>, vector<1x8x128xf32>
    %874 = vector.shape_cast %873 : vector<1x8x128xf32> to vector<8x128xf32>
    %875 = arith.mulf %853, %874 : vector<8x128xf32>
    %876 = arith.addf %769, %875 : vector<8x128xf32>
    %877 = arith.mulf %854, %874 : vector<8x128xf32>
    %878 = arith.addf %864, %877 : vector<8x128xf32>
    %879 = arith.mulf %855, %874 : vector<8x128xf32>
    %880 = arith.addf %866, %879 : vector<8x128xf32>
    %881 = arith.mulf %856, %874 : vector<8x128xf32>
    %882 = arith.addf %868, %881 : vector<8x128xf32>
    %883 = arith.mulf %857, %874 : vector<8x128xf32>
    %884 = arith.addf %870, %883 : vector<8x128xf32>
    %885 = arith.mulf %858, %874 : vector<8x128xf32>
    %886 = arith.addf %872, %885 : vector<8x128xf32>
    %c19 = arith.constant 19 : index
    %c0_134 = arith.constant 0 : index
    %c0_135 = arith.constant 0 : index
    %887 = vector.load %arg2[%c19, %c0_134, %c0_135] : memref<49x8x128xf32, #tpu.memory_space<vmem>>, vector<1x8x128xf32>
    %888 = vector.shape_cast %887 : vector<1x8x128xf32> to vector<8x128xf32>
    %889 = arith.mulf %853, %888 : vector<8x128xf32>
    %890 = arith.addf %767, %889 : vector<8x128xf32>
    %891 = arith.mulf %854, %888 : vector<8x128xf32>
    %892 = arith.addf %876, %891 : vector<8x128xf32>
    %893 = arith.mulf %855, %888 : vector<8x128xf32>
    %894 = arith.addf %878, %893 : vector<8x128xf32>
    %895 = arith.mulf %856, %888 : vector<8x128xf32>
    %896 = arith.addf %880, %895 : vector<8x128xf32>
    %897 = arith.mulf %857, %888 : vector<8x128xf32>
    %898 = arith.addf %882, %897 : vector<8x128xf32>
    %899 = arith.mulf %858, %888 : vector<8x128xf32>
    %900 = arith.addf %884, %899 : vector<8x128xf32>
    %901 = arith.mulf %859, %888 : vector<8x128xf32>
    %902 = arith.addf %886, %901 : vector<8x128xf32>
    %c26 = arith.constant 26 : index
    %c0_136 = arith.constant 0 : index
    %c0_137 = arith.constant 0 : index
    %903 = vector.load %arg2[%c26, %c0_136, %c0_137] : memref<49x8x128xf32, #tpu.memory_space<vmem>>, vector<1x8x128xf32>
    %904 = vector.shape_cast %903 : vector<1x8x128xf32> to vector<8x128xf32>
    %905 = arith.mulf %853, %904 : vector<8x128xf32>
    %906 = arith.addf %765, %905 : vector<8x128xf32>
    %907 = arith.mulf %854, %904 : vector<8x128xf32>
    %908 = arith.addf %890, %907 : vector<8x128xf32>
    %909 = arith.mulf %855, %904 : vector<8x128xf32>
    %910 = arith.addf %892, %909 : vector<8x128xf32>
    %911 = arith.mulf %856, %904 : vector<8x128xf32>
    %912 = arith.addf %894, %911 : vector<8x128xf32>
    %913 = arith.mulf %857, %904 : vector<8x128xf32>
    %914 = arith.addf %896, %913 : vector<8x128xf32>
    %915 = arith.mulf %858, %904 : vector<8x128xf32>
    %916 = arith.addf %898, %915 : vector<8x128xf32>
    %917 = arith.mulf %859, %904 : vector<8x128xf32>
    %918 = arith.addf %900, %917 : vector<8x128xf32>
    %919 = arith.mulf %860, %904 : vector<8x128xf32>
    %920 = arith.addf %902, %919 : vector<8x128xf32>
    %c33 = arith.constant 33 : index
    %c0_138 = arith.constant 0 : index
    %c0_139 = arith.constant 0 : index
    %921 = vector.load %arg2[%c33, %c0_138, %c0_139] : memref<49x8x128xf32, #tpu.memory_space<vmem>>, vector<1x8x128xf32>
    %922 = vector.shape_cast %921 : vector<1x8x128xf32> to vector<8x128xf32>
    %923 = arith.mulf %854, %922 : vector<8x128xf32>
    %924 = arith.addf %906, %923 : vector<8x128xf32>
    %925 = arith.mulf %855, %922 : vector<8x128xf32>
    %926 = arith.addf %908, %925 : vector<8x128xf32>
    %927 = arith.mulf %856, %922 : vector<8x128xf32>
    %928 = arith.addf %910, %927 : vector<8x128xf32>
    %929 = arith.mulf %857, %922 : vector<8x128xf32>
    %930 = arith.addf %912, %929 : vector<8x128xf32>
    %931 = arith.mulf %858, %922 : vector<8x128xf32>
    %932 = arith.addf %914, %931 : vector<8x128xf32>
    %933 = arith.mulf %859, %922 : vector<8x128xf32>
    %934 = arith.addf %916, %933 : vector<8x128xf32>
    %935 = arith.mulf %860, %922 : vector<8x128xf32>
    %936 = arith.addf %918, %935 : vector<8x128xf32>
    %c40 = arith.constant 40 : index
    %c0_140 = arith.constant 0 : index
    %c0_141 = arith.constant 0 : index
    %937 = vector.load %arg2[%c40, %c0_140, %c0_141] : memref<49x8x128xf32, #tpu.memory_space<vmem>>, vector<1x8x128xf32>
    %938 = vector.shape_cast %937 : vector<1x8x128xf32> to vector<8x128xf32>
    %939 = arith.mulf %855, %938 : vector<8x128xf32>
    %940 = arith.addf %924, %939 : vector<8x128xf32>
    %941 = arith.mulf %856, %938 : vector<8x128xf32>
    %942 = arith.addf %926, %941 : vector<8x128xf32>
    %943 = arith.mulf %857, %938 : vector<8x128xf32>
    %944 = arith.addf %928, %943 : vector<8x128xf32>
    %945 = arith.mulf %858, %938 : vector<8x128xf32>
    %946 = arith.addf %930, %945 : vector<8x128xf32>
    %947 = arith.mulf %859, %938 : vector<8x128xf32>
    %948 = arith.addf %932, %947 : vector<8x128xf32>
    %949 = arith.mulf %860, %938 : vector<8x128xf32>
    %950 = arith.addf %934, %949 : vector<8x128xf32>
    %c47 = arith.constant 47 : index
    %c0_142 = arith.constant 0 : index
    %c0_143 = arith.constant 0 : index
    %951 = vector.load %arg2[%c47, %c0_142, %c0_143] : memref<49x8x128xf32, #tpu.memory_space<vmem>>, vector<1x8x128xf32>
    %952 = vector.shape_cast %951 : vector<1x8x128xf32> to vector<8x128xf32>
    %953 = arith.mulf %856, %952 : vector<8x128xf32>
    %954 = arith.addf %940, %953 : vector<8x128xf32>
    %955 = arith.mulf %857, %952 : vector<8x128xf32>
    %956 = arith.addf %942, %955 : vector<8x128xf32>
    %957 = arith.mulf %858, %952 : vector<8x128xf32>
    %958 = arith.addf %944, %957 : vector<8x128xf32>
    %959 = arith.mulf %859, %952 : vector<8x128xf32>
    %960 = arith.addf %946, %959 : vector<8x128xf32>
    %961 = arith.mulf %860, %952 : vector<8x128xf32>
    %962 = arith.addf %948, %961 : vector<8x128xf32>
    %c4_144 = arith.constant 4 : index
    %c0_145 = arith.constant 0 : index
    %c0_146 = arith.constant 0 : index
    %963 = vector.load %arg3[%c4_144, %c0_145, %c0_146] : memref<25x8x128xf32, #tpu.memory_space<vmem>>, vector<1x8x128xf32>
    %964 = vector.shape_cast %963 : vector<1x8x128xf32> to vector<8x128xf32>
    %965 = arith.mulf %853, %964 : vector<8x128xf32>
    %966 = arith.addf %845, %965 : vector<8x128xf32>
    %967 = arith.mulf %854, %964 : vector<8x128xf32>
    %968 = arith.addf %847, %967 : vector<8x128xf32>
    %969 = arith.mulf %855, %964 : vector<8x128xf32>
    %970 = arith.addf %849, %969 : vector<8x128xf32>
    %971 = arith.mulf %856, %964 : vector<8x128xf32>
    %972 = arith.addf %851, %971 : vector<8x128xf32>
    %973 = arith.mulf %857, %964 : vector<8x128xf32>
    %974 = arith.addf %837, %973 : vector<8x128xf32>
    %975 = arith.mulf %858, %964 : vector<8x128xf32>
    %976 = arith.addf %821, %975 : vector<8x128xf32>
    %c9_147 = arith.constant 9 : index
    %c0_148 = arith.constant 0 : index
    %c0_149 = arith.constant 0 : index
    %977 = vector.load %arg3[%c9_147, %c0_148, %c0_149] : memref<25x8x128xf32, #tpu.memory_space<vmem>>, vector<1x8x128xf32>
    %978 = vector.shape_cast %977 : vector<1x8x128xf32> to vector<8x128xf32>
    %979 = arith.mulf %853, %978 : vector<8x128xf32>
    %980 = arith.addf %843, %979 : vector<8x128xf32>
    %981 = arith.mulf %854, %978 : vector<8x128xf32>
    %982 = arith.addf %966, %981 : vector<8x128xf32>
    %983 = arith.mulf %855, %978 : vector<8x128xf32>
    %984 = arith.addf %968, %983 : vector<8x128xf32>
    %985 = arith.mulf %856, %978 : vector<8x128xf32>
    %986 = arith.addf %970, %985 : vector<8x128xf32>
    %987 = arith.mulf %857, %978 : vector<8x128xf32>
    %988 = arith.addf %972, %987 : vector<8x128xf32>
    %989 = arith.mulf %858, %978 : vector<8x128xf32>
    %990 = arith.addf %974, %989 : vector<8x128xf32>
    %991 = arith.mulf %859, %978 : vector<8x128xf32>
    %992 = arith.addf %976, %991 : vector<8x128xf32>
    %c14_150 = arith.constant 14 : index
    %c0_151 = arith.constant 0 : index
    %c0_152 = arith.constant 0 : index
    %993 = vector.load %arg3[%c14_150, %c0_151, %c0_152] : memref<25x8x128xf32, #tpu.memory_space<vmem>>, vector<1x8x128xf32>
    %994 = vector.shape_cast %993 : vector<1x8x128xf32> to vector<8x128xf32>
    %995 = arith.mulf %853, %994 : vector<8x128xf32>
    %996 = arith.addf %841, %995 : vector<8x128xf32>
    %997 = arith.mulf %854, %994 : vector<8x128xf32>
    %998 = arith.addf %980, %997 : vector<8x128xf32>
    %999 = arith.mulf %855, %994 : vector<8x128xf32>
    %1000 = arith.addf %982, %999 : vector<8x128xf32>
    %1001 = arith.mulf %856, %994 : vector<8x128xf32>
    %1002 = arith.addf %984, %1001 : vector<8x128xf32>
    %1003 = arith.mulf %857, %994 : vector<8x128xf32>
    %1004 = arith.addf %986, %1003 : vector<8x128xf32>
    %1005 = arith.mulf %858, %994 : vector<8x128xf32>
    %1006 = arith.addf %988, %1005 : vector<8x128xf32>
    %1007 = arith.mulf %859, %994 : vector<8x128xf32>
    %1008 = arith.addf %990, %1007 : vector<8x128xf32>
    %1009 = arith.mulf %860, %994 : vector<8x128xf32>
    %1010 = arith.addf %992, %1009 : vector<8x128xf32>
    %c19_153 = arith.constant 19 : index
    %c0_154 = arith.constant 0 : index
    %c0_155 = arith.constant 0 : index
    %1011 = vector.load %arg3[%c19_153, %c0_154, %c0_155] : memref<25x8x128xf32, #tpu.memory_space<vmem>>, vector<1x8x128xf32>
    %1012 = vector.shape_cast %1011 : vector<1x8x128xf32> to vector<8x128xf32>
    %1013 = arith.mulf %854, %1012 : vector<8x128xf32>
    %1014 = arith.addf %996, %1013 : vector<8x128xf32>
    %1015 = arith.mulf %855, %1012 : vector<8x128xf32>
    %1016 = arith.addf %998, %1015 : vector<8x128xf32>
    %1017 = arith.mulf %856, %1012 : vector<8x128xf32>
    %1018 = arith.addf %1000, %1017 : vector<8x128xf32>
    %1019 = arith.mulf %857, %1012 : vector<8x128xf32>
    %1020 = arith.addf %1002, %1019 : vector<8x128xf32>
    %1021 = arith.mulf %858, %1012 : vector<8x128xf32>
    %1022 = arith.addf %1004, %1021 : vector<8x128xf32>
    %1023 = arith.mulf %859, %1012 : vector<8x128xf32>
    %1024 = arith.addf %1006, %1023 : vector<8x128xf32>
    %1025 = arith.mulf %860, %1012 : vector<8x128xf32>
    %1026 = arith.addf %1008, %1025 : vector<8x128xf32>
    %c24_156 = arith.constant 24 : index
    %c0_157 = arith.constant 0 : index
    %c0_158 = arith.constant 0 : index
    %1027 = vector.load %arg3[%c24_156, %c0_157, %c0_158] : memref<25x8x128xf32, #tpu.memory_space<vmem>>, vector<1x8x128xf32>
    %1028 = vector.shape_cast %1027 : vector<1x8x128xf32> to vector<8x128xf32>
    %1029 = arith.mulf %855, %1028 : vector<8x128xf32>
    %1030 = arith.addf %1014, %1029 : vector<8x128xf32>
    %1031 = arith.mulf %856, %1028 : vector<8x128xf32>
    %1032 = arith.addf %1016, %1031 : vector<8x128xf32>
    %1033 = arith.mulf %857, %1028 : vector<8x128xf32>
    %1034 = arith.addf %1018, %1033 : vector<8x128xf32>
    %1035 = arith.mulf %858, %1028 : vector<8x128xf32>
    %1036 = arith.addf %1020, %1035 : vector<8x128xf32>
    %1037 = arith.mulf %859, %1028 : vector<8x128xf32>
    %1038 = arith.addf %1022, %1037 : vector<8x128xf32>
    %1039 = arith.mulf %860, %1028 : vector<8x128xf32>
    %1040 = arith.addf %1024, %1039 : vector<8x128xf32>
    %c61_i32 = arith.constant 61 : i32
    %1041 = tpu.dynamic_rotate %1 by %c61_i32 dim 0 : vector<64x128xf32>, i32 -> vector<64x128xf32>
    %1042 = vector.extract_strided_slice %1041 {offsets = [0, 0], sizes = [8, 128], strides = [1, 1]} : vector<64x128xf32> to vector<8x128xf32>
    %1043 = vector.extract_strided_slice %1041 {offsets = [8, 0], sizes = [8, 128], strides = [1, 1]} : vector<64x128xf32> to vector<8x128xf32>
    %1044 = vector.extract_strided_slice %1041 {offsets = [16, 0], sizes = [8, 128], strides = [1, 1]} : vector<64x128xf32> to vector<8x128xf32>
    %1045 = vector.extract_strided_slice %1041 {offsets = [24, 0], sizes = [8, 128], strides = [1, 1]} : vector<64x128xf32> to vector<8x128xf32>
    %1046 = vector.extract_strided_slice %1041 {offsets = [32, 0], sizes = [8, 128], strides = [1, 1]} : vector<64x128xf32> to vector<8x128xf32>
    %1047 = vector.extract_strided_slice %1041 {offsets = [40, 0], sizes = [8, 128], strides = [1, 1]} : vector<64x128xf32> to vector<8x128xf32>
    %1048 = vector.extract_strided_slice %1041 {offsets = [48, 0], sizes = [8, 128], strides = [1, 1]} : vector<64x128xf32> to vector<8x128xf32>
    %1049 = vector.extract_strided_slice %1041 {offsets = [56, 0], sizes = [8, 128], strides = [1, 1]} : vector<64x128xf32> to vector<8x128xf32>
    %c6_159 = arith.constant 6 : index
    %c0_160 = arith.constant 0 : index
    %c0_161 = arith.constant 0 : index
    %1050 = vector.load %arg2[%c6_159, %c0_160, %c0_161] : memref<49x8x128xf32, #tpu.memory_space<vmem>>, vector<1x8x128xf32>
    %1051 = vector.shape_cast %1050 : vector<1x8x128xf32> to vector<8x128xf32>
    %1052 = arith.mulf %1042, %1051 : vector<8x128xf32>
    %1053 = arith.addf %960, %1052 : vector<8x128xf32>
    %1054 = arith.mulf %1043, %1051 : vector<8x128xf32>
    %1055 = arith.addf %962, %1054 : vector<8x128xf32>
    %1056 = arith.mulf %1044, %1051 : vector<8x128xf32>
    %1057 = arith.addf %950, %1056 : vector<8x128xf32>
    %1058 = arith.mulf %1045, %1051 : vector<8x128xf32>
    %1059 = arith.addf %936, %1058 : vector<8x128xf32>
    %1060 = arith.mulf %1046, %1051 : vector<8x128xf32>
    %1061 = arith.addf %920, %1060 : vector<8x128xf32>
    %c13_162 = arith.constant 13 : index
    %c0_163 = arith.constant 0 : index
    %c0_164 = arith.constant 0 : index
    %1062 = vector.load %arg2[%c13_162, %c0_163, %c0_164] : memref<49x8x128xf32, #tpu.memory_space<vmem>>, vector<1x8x128xf32>
    %1063 = vector.shape_cast %1062 : vector<1x8x128xf32> to vector<8x128xf32>
    %1064 = arith.mulf %1042, %1063 : vector<8x128xf32>
    %1065 = arith.addf %958, %1064 : vector<8x128xf32>
    %1066 = arith.mulf %1043, %1063 : vector<8x128xf32>
    %1067 = arith.addf %1053, %1066 : vector<8x128xf32>
    %1068 = arith.mulf %1044, %1063 : vector<8x128xf32>
    %1069 = arith.addf %1055, %1068 : vector<8x128xf32>
    %1070 = arith.mulf %1045, %1063 : vector<8x128xf32>
    %1071 = arith.addf %1057, %1070 : vector<8x128xf32>
    %1072 = arith.mulf %1046, %1063 : vector<8x128xf32>
    %1073 = arith.addf %1059, %1072 : vector<8x128xf32>
    %1074 = arith.mulf %1047, %1063 : vector<8x128xf32>
    %1075 = arith.addf %1061, %1074 : vector<8x128xf32>
    %c20_165 = arith.constant 20 : index
    %c0_166 = arith.constant 0 : index
    %c0_167 = arith.constant 0 : index
    %1076 = vector.load %arg2[%c20_165, %c0_166, %c0_167] : memref<49x8x128xf32, #tpu.memory_space<vmem>>, vector<1x8x128xf32>
    %1077 = vector.shape_cast %1076 : vector<1x8x128xf32> to vector<8x128xf32>
    %1078 = arith.mulf %1042, %1077 : vector<8x128xf32>
    %1079 = arith.addf %956, %1078 : vector<8x128xf32>
    %1080 = arith.mulf %1043, %1077 : vector<8x128xf32>
    %1081 = arith.addf %1065, %1080 : vector<8x128xf32>
    %1082 = arith.mulf %1044, %1077 : vector<8x128xf32>
    %1083 = arith.addf %1067, %1082 : vector<8x128xf32>
    %1084 = arith.mulf %1045, %1077 : vector<8x128xf32>
    %1085 = arith.addf %1069, %1084 : vector<8x128xf32>
    %1086 = arith.mulf %1046, %1077 : vector<8x128xf32>
    %1087 = arith.addf %1071, %1086 : vector<8x128xf32>
    %1088 = arith.mulf %1047, %1077 : vector<8x128xf32>
    %1089 = arith.addf %1073, %1088 : vector<8x128xf32>
    %1090 = arith.mulf %1048, %1077 : vector<8x128xf32>
    %1091 = arith.addf %1075, %1090 : vector<8x128xf32>
    %c27 = arith.constant 27 : index
    %c0_168 = arith.constant 0 : index
    %c0_169 = arith.constant 0 : index
    %1092 = vector.load %arg2[%c27, %c0_168, %c0_169] : memref<49x8x128xf32, #tpu.memory_space<vmem>>, vector<1x8x128xf32>
    %1093 = vector.shape_cast %1092 : vector<1x8x128xf32> to vector<8x128xf32>
    %1094 = arith.mulf %1042, %1093 : vector<8x128xf32>
    %1095 = arith.addf %954, %1094 : vector<8x128xf32>
    %1096 = arith.mulf %1043, %1093 : vector<8x128xf32>
    %1097 = arith.addf %1079, %1096 : vector<8x128xf32>
    %1098 = arith.mulf %1044, %1093 : vector<8x128xf32>
    %1099 = arith.addf %1081, %1098 : vector<8x128xf32>
    %1100 = arith.mulf %1045, %1093 : vector<8x128xf32>
    %1101 = arith.addf %1083, %1100 : vector<8x128xf32>
    %1102 = arith.mulf %1046, %1093 : vector<8x128xf32>
    %1103 = arith.addf %1085, %1102 : vector<8x128xf32>
    %1104 = arith.mulf %1047, %1093 : vector<8x128xf32>
    %1105 = arith.addf %1087, %1104 : vector<8x128xf32>
    %1106 = arith.mulf %1048, %1093 : vector<8x128xf32>
    %1107 = arith.addf %1089, %1106 : vector<8x128xf32>
    %1108 = arith.mulf %1049, %1093 : vector<8x128xf32>
    %1109 = arith.addf %1091, %1108 : vector<8x128xf32>
    %c34 = arith.constant 34 : index
    %c0_170 = arith.constant 0 : index
    %c0_171 = arith.constant 0 : index
    %1110 = vector.load %arg2[%c34, %c0_170, %c0_171] : memref<49x8x128xf32, #tpu.memory_space<vmem>>, vector<1x8x128xf32>
    %1111 = vector.shape_cast %1110 : vector<1x8x128xf32> to vector<8x128xf32>
    %1112 = arith.mulf %1043, %1111 : vector<8x128xf32>
    %1113 = arith.addf %1095, %1112 : vector<8x128xf32>
    %1114 = arith.mulf %1044, %1111 : vector<8x128xf32>
    %1115 = arith.addf %1097, %1114 : vector<8x128xf32>
    %1116 = arith.mulf %1045, %1111 : vector<8x128xf32>
    %1117 = arith.addf %1099, %1116 : vector<8x128xf32>
    %1118 = arith.mulf %1046, %1111 : vector<8x128xf32>
    %1119 = arith.addf %1101, %1118 : vector<8x128xf32>
    %1120 = arith.mulf %1047, %1111 : vector<8x128xf32>
    %1121 = arith.addf %1103, %1120 : vector<8x128xf32>
    %1122 = arith.mulf %1048, %1111 : vector<8x128xf32>
    %1123 = arith.addf %1105, %1122 : vector<8x128xf32>
    %1124 = arith.mulf %1049, %1111 : vector<8x128xf32>
    %1125 = arith.addf %1107, %1124 : vector<8x128xf32>
    %c41 = arith.constant 41 : index
    %c0_172 = arith.constant 0 : index
    %c0_173 = arith.constant 0 : index
    %1126 = vector.load %arg2[%c41, %c0_172, %c0_173] : memref<49x8x128xf32, #tpu.memory_space<vmem>>, vector<1x8x128xf32>
    %1127 = vector.shape_cast %1126 : vector<1x8x128xf32> to vector<8x128xf32>
    %1128 = arith.mulf %1044, %1127 : vector<8x128xf32>
    %1129 = arith.addf %1113, %1128 : vector<8x128xf32>
    %1130 = arith.mulf %1045, %1127 : vector<8x128xf32>
    %1131 = arith.addf %1115, %1130 : vector<8x128xf32>
    %1132 = arith.mulf %1046, %1127 : vector<8x128xf32>
    %1133 = arith.addf %1117, %1132 : vector<8x128xf32>
    %1134 = arith.mulf %1047, %1127 : vector<8x128xf32>
    %1135 = arith.addf %1119, %1134 : vector<8x128xf32>
    %1136 = arith.mulf %1048, %1127 : vector<8x128xf32>
    %1137 = arith.addf %1121, %1136 : vector<8x128xf32>
    %1138 = arith.mulf %1049, %1127 : vector<8x128xf32>
    %1139 = arith.addf %1123, %1138 : vector<8x128xf32>
    %c48 = arith.constant 48 : index
    %c0_174 = arith.constant 0 : index
    %c0_175 = arith.constant 0 : index
    %1140 = vector.load %arg2[%c48, %c0_174, %c0_175] : memref<49x8x128xf32, #tpu.memory_space<vmem>>, vector<1x8x128xf32>
    %1141 = vector.shape_cast %1140 : vector<1x8x128xf32> to vector<8x128xf32>
    %1142 = arith.mulf %1045, %1141 : vector<8x128xf32>
    %1143 = arith.addf %1129, %1142 : vector<8x128xf32>
    %1144 = arith.mulf %1046, %1141 : vector<8x128xf32>
    %1145 = arith.addf %1131, %1144 : vector<8x128xf32>
    %1146 = arith.mulf %1047, %1141 : vector<8x128xf32>
    %1147 = arith.addf %1133, %1146 : vector<8x128xf32>
    %1148 = arith.mulf %1048, %1141 : vector<8x128xf32>
    %1149 = arith.addf %1135, %1148 : vector<8x128xf32>
    %1150 = arith.mulf %1049, %1141 : vector<8x128xf32>
    %1151 = arith.addf %1137, %1150 : vector<8x128xf32>
    %c0_176 = arith.constant 0 : index
    %c0_177 = arith.constant 0 : index
    %1152 = vector.load %arg6[%c0_176, %c0_177] : memref<8x128xf32, #tpu.memory_space<vmem>>, vector<8x128xf32>
    %c0_178 = arith.constant 0 : index
    %c0_179 = arith.constant 0 : index
    %1153 = vector.load %arg7[%c0_178, %c0_179] : memref<8x128xf32, #tpu.memory_space<vmem>>, vector<8x128xf32>
    %c0_180 = arith.constant 0 : index
    %c0_181 = arith.constant 0 : index
    %1154 = vector.load %arg8[%c0_180, %c0_181] : memref<8x128xf32, #tpu.memory_space<vmem>>, vector<8x128xf32>
    %1155 = arith.addf %1143, %1152 : vector<8x128xf32>
    %1156 = arith.addf %1145, %1152 : vector<8x128xf32>
    %1157 = arith.addf %1147, %1152 : vector<8x128xf32>
    %1158 = arith.addf %1149, %1152 : vector<8x128xf32>
    %1159 = arith.addf %1151, %1152 : vector<8x128xf32>
    %1160 = arith.addf %1139, %1152 : vector<8x128xf32>
    %1161 = arith.addf %1125, %1152 : vector<8x128xf32>
    %1162 = arith.addf %1109, %1152 : vector<8x128xf32>
    %1163 = arith.addf %1155, %1030 : vector<8x128xf32>
    %1164 = arith.addf %1163, %1154 : vector<8x128xf32>
    %1165 = arith.addf %1156, %1032 : vector<8x128xf32>
    %1166 = arith.addf %1165, %1154 : vector<8x128xf32>
    %1167 = arith.addf %1157, %1034 : vector<8x128xf32>
    %1168 = arith.addf %1167, %1154 : vector<8x128xf32>
    %1169 = arith.addf %1158, %1036 : vector<8x128xf32>
    %1170 = arith.addf %1169, %1154 : vector<8x128xf32>
    %1171 = arith.addf %1159, %1038 : vector<8x128xf32>
    %1172 = arith.addf %1171, %1154 : vector<8x128xf32>
    %1173 = arith.addf %1160, %1040 : vector<8x128xf32>
    %1174 = arith.addf %1173, %1154 : vector<8x128xf32>
    %1175 = arith.addf %1161, %1026 : vector<8x128xf32>
    %1176 = arith.addf %1175, %1154 : vector<8x128xf32>
    %1177 = arith.addf %1162, %1010 : vector<8x128xf32>
    %1178 = arith.addf %1177, %1154 : vector<8x128xf32>
    %1179 = tpu.concatenate %1155, %1156, %1157, %1158, %1159, %1160, %1161, %1162 in 0 : vector<8x128xf32>, vector<8x128xf32>, vector<8x128xf32>, vector<8x128xf32>, vector<8x128xf32>, vector<8x128xf32>, vector<8x128xf32>, vector<8x128xf32> -> vector<64x128xf32>
    %c2_i32_182 = arith.constant 2 : i32
    %1180 = tpu.dynamic_rotate %1179 by %c2_i32_182 dim 0 : vector<64x128xf32>, i32 -> vector<64x128xf32>
    %1181 = vector.extract_strided_slice %1180 {offsets = [0, 0], sizes = [8, 128], strides = [1, 1]} : vector<64x128xf32> to vector<8x128xf32>
    %1182 = vector.extract_strided_slice %1180 {offsets = [8, 0], sizes = [8, 128], strides = [1, 1]} : vector<64x128xf32> to vector<8x128xf32>
    %1183 = vector.extract_strided_slice %1180 {offsets = [16, 0], sizes = [8, 128], strides = [1, 1]} : vector<64x128xf32> to vector<8x128xf32>
    %1184 = vector.extract_strided_slice %1180 {offsets = [24, 0], sizes = [8, 128], strides = [1, 1]} : vector<64x128xf32> to vector<8x128xf32>
    %1185 = vector.extract_strided_slice %1180 {offsets = [32, 0], sizes = [8, 128], strides = [1, 1]} : vector<64x128xf32> to vector<8x128xf32>
    %1186 = vector.extract_strided_slice %1180 {offsets = [40, 0], sizes = [8, 128], strides = [1, 1]} : vector<64x128xf32> to vector<8x128xf32>
    %1187 = vector.extract_strided_slice %1180 {offsets = [48, 0], sizes = [8, 128], strides = [1, 1]} : vector<64x128xf32> to vector<8x128xf32>
    %1188 = vector.extract_strided_slice %1180 {offsets = [56, 0], sizes = [8, 128], strides = [1, 1]} : vector<64x128xf32> to vector<8x128xf32>
    %c0_183 = arith.constant 0 : index
    %c0_184 = arith.constant 0 : index
    %c0_185 = arith.constant 0 : index
    %1189 = vector.load %arg4[%c0_183, %c0_184, %c0_185] : memref<25x8x128xf32, #tpu.memory_space<vmem>>, vector<1x8x128xf32>
    %1190 = vector.shape_cast %1189 : vector<1x8x128xf32> to vector<8x128xf32>
    %1191 = arith.mulf %1181, %1190 : vector<8x128xf32>
    %1192 = arith.mulf %1182, %1190 : vector<8x128xf32>
    %1193 = arith.mulf %1183, %1190 : vector<8x128xf32>
    %1194 = arith.mulf %1184, %1190 : vector<8x128xf32>
    %1195 = arith.mulf %1185, %1190 : vector<8x128xf32>
    %1196 = arith.mulf %1186, %1190 : vector<8x128xf32>
    %c5_186 = arith.constant 5 : index
    %c0_187 = arith.constant 0 : index
    %c0_188 = arith.constant 0 : index
    %1197 = vector.load %arg4[%c5_186, %c0_187, %c0_188] : memref<25x8x128xf32, #tpu.memory_space<vmem>>, vector<1x8x128xf32>
    %1198 = vector.shape_cast %1197 : vector<1x8x128xf32> to vector<8x128xf32>
    %1199 = arith.mulf %1181, %1198 : vector<8x128xf32>
    %1200 = arith.mulf %1182, %1198 : vector<8x128xf32>
    %1201 = arith.addf %1191, %1200 : vector<8x128xf32>
    %1202 = arith.mulf %1183, %1198 : vector<8x128xf32>
    %1203 = arith.addf %1192, %1202 : vector<8x128xf32>
    %1204 = arith.mulf %1184, %1198 : vector<8x128xf32>
    %1205 = arith.addf %1193, %1204 : vector<8x128xf32>
    %1206 = arith.mulf %1185, %1198 : vector<8x128xf32>
    %1207 = arith.addf %1194, %1206 : vector<8x128xf32>
    %1208 = arith.mulf %1186, %1198 : vector<8x128xf32>
    %1209 = arith.addf %1195, %1208 : vector<8x128xf32>
    %1210 = arith.mulf %1187, %1198 : vector<8x128xf32>
    %1211 = arith.addf %1196, %1210 : vector<8x128xf32>
    %c10_189 = arith.constant 10 : index
    %c0_190 = arith.constant 0 : index
    %c0_191 = arith.constant 0 : index
    %1212 = vector.load %arg4[%c10_189, %c0_190, %c0_191] : memref<25x8x128xf32, #tpu.memory_space<vmem>>, vector<1x8x128xf32>
    %1213 = vector.shape_cast %1212 : vector<1x8x128xf32> to vector<8x128xf32>
    %1214 = arith.mulf %1181, %1213 : vector<8x128xf32>
    %1215 = arith.mulf %1182, %1213 : vector<8x128xf32>
    %1216 = arith.addf %1199, %1215 : vector<8x128xf32>
    %1217 = arith.mulf %1183, %1213 : vector<8x128xf32>
    %1218 = arith.addf %1201, %1217 : vector<8x128xf32>
    %1219 = arith.mulf %1184, %1213 : vector<8x128xf32>
    %1220 = arith.addf %1203, %1219 : vector<8x128xf32>
    %1221 = arith.mulf %1185, %1213 : vector<8x128xf32>
    %1222 = arith.addf %1205, %1221 : vector<8x128xf32>
    %1223 = arith.mulf %1186, %1213 : vector<8x128xf32>
    %1224 = arith.addf %1207, %1223 : vector<8x128xf32>
    %1225 = arith.mulf %1187, %1213 : vector<8x128xf32>
    %1226 = arith.addf %1209, %1225 : vector<8x128xf32>
    %1227 = arith.mulf %1188, %1213 : vector<8x128xf32>
    %1228 = arith.addf %1211, %1227 : vector<8x128xf32>
    %c15_192 = arith.constant 15 : index
    %c0_193 = arith.constant 0 : index
    %c0_194 = arith.constant 0 : index
    %1229 = vector.load %arg4[%c15_192, %c0_193, %c0_194] : memref<25x8x128xf32, #tpu.memory_space<vmem>>, vector<1x8x128xf32>
    %1230 = vector.shape_cast %1229 : vector<1x8x128xf32> to vector<8x128xf32>
    %1231 = arith.mulf %1182, %1230 : vector<8x128xf32>
    %1232 = arith.addf %1214, %1231 : vector<8x128xf32>
    %1233 = arith.mulf %1183, %1230 : vector<8x128xf32>
    %1234 = arith.addf %1216, %1233 : vector<8x128xf32>
    %1235 = arith.mulf %1184, %1230 : vector<8x128xf32>
    %1236 = arith.addf %1218, %1235 : vector<8x128xf32>
    %1237 = arith.mulf %1185, %1230 : vector<8x128xf32>
    %1238 = arith.addf %1220, %1237 : vector<8x128xf32>
    %1239 = arith.mulf %1186, %1230 : vector<8x128xf32>
    %1240 = arith.addf %1222, %1239 : vector<8x128xf32>
    %1241 = arith.mulf %1187, %1230 : vector<8x128xf32>
    %1242 = arith.addf %1224, %1241 : vector<8x128xf32>
    %1243 = arith.mulf %1188, %1230 : vector<8x128xf32>
    %1244 = arith.addf %1226, %1243 : vector<8x128xf32>
    %c20_195 = arith.constant 20 : index
    %c0_196 = arith.constant 0 : index
    %c0_197 = arith.constant 0 : index
    %1245 = vector.load %arg4[%c20_195, %c0_196, %c0_197] : memref<25x8x128xf32, #tpu.memory_space<vmem>>, vector<1x8x128xf32>
    %1246 = vector.shape_cast %1245 : vector<1x8x128xf32> to vector<8x128xf32>
    %1247 = arith.mulf %1183, %1246 : vector<8x128xf32>
    %1248 = arith.addf %1232, %1247 : vector<8x128xf32>
    %1249 = arith.mulf %1184, %1246 : vector<8x128xf32>
    %1250 = arith.addf %1234, %1249 : vector<8x128xf32>
    %1251 = arith.mulf %1185, %1246 : vector<8x128xf32>
    %1252 = arith.addf %1236, %1251 : vector<8x128xf32>
    %1253 = arith.mulf %1186, %1246 : vector<8x128xf32>
    %1254 = arith.addf %1238, %1253 : vector<8x128xf32>
    %1255 = arith.mulf %1187, %1246 : vector<8x128xf32>
    %1256 = arith.addf %1240, %1255 : vector<8x128xf32>
    %1257 = arith.mulf %1188, %1246 : vector<8x128xf32>
    %1258 = arith.addf %1242, %1257 : vector<8x128xf32>
    %c1_i32_198 = arith.constant 1 : i32
    %1259 = tpu.dynamic_rotate %1179 by %c1_i32_198 dim 0 : vector<64x128xf32>, i32 -> vector<64x128xf32>
    %1260 = vector.extract_strided_slice %1259 {offsets = [0, 0], sizes = [8, 128], strides = [1, 1]} : vector<64x128xf32> to vector<8x128xf32>
    %1261 = vector.extract_strided_slice %1259 {offsets = [8, 0], sizes = [8, 128], strides = [1, 1]} : vector<64x128xf32> to vector<8x128xf32>
    %1262 = vector.extract_strided_slice %1259 {offsets = [16, 0], sizes = [8, 128], strides = [1, 1]} : vector<64x128xf32> to vector<8x128xf32>
    %1263 = vector.extract_strided_slice %1259 {offsets = [24, 0], sizes = [8, 128], strides = [1, 1]} : vector<64x128xf32> to vector<8x128xf32>
    %1264 = vector.extract_strided_slice %1259 {offsets = [32, 0], sizes = [8, 128], strides = [1, 1]} : vector<64x128xf32> to vector<8x128xf32>
    %1265 = vector.extract_strided_slice %1259 {offsets = [40, 0], sizes = [8, 128], strides = [1, 1]} : vector<64x128xf32> to vector<8x128xf32>
    %1266 = vector.extract_strided_slice %1259 {offsets = [48, 0], sizes = [8, 128], strides = [1, 1]} : vector<64x128xf32> to vector<8x128xf32>
    %1267 = vector.extract_strided_slice %1259 {offsets = [56, 0], sizes = [8, 128], strides = [1, 1]} : vector<64x128xf32> to vector<8x128xf32>
    %c1_199 = arith.constant 1 : index
    %c0_200 = arith.constant 0 : index
    %c0_201 = arith.constant 0 : index
    %1268 = vector.load %arg4[%c1_199, %c0_200, %c0_201] : memref<25x8x128xf32, #tpu.memory_space<vmem>>, vector<1x8x128xf32>
    %1269 = vector.shape_cast %1268 : vector<1x8x128xf32> to vector<8x128xf32>
    %1270 = arith.mulf %1260, %1269 : vector<8x128xf32>
    %1271 = arith.addf %1252, %1270 : vector<8x128xf32>
    %1272 = arith.mulf %1261, %1269 : vector<8x128xf32>
    %1273 = arith.addf %1254, %1272 : vector<8x128xf32>
    %1274 = arith.mulf %1262, %1269 : vector<8x128xf32>
    %1275 = arith.addf %1256, %1274 : vector<8x128xf32>
    %1276 = arith.mulf %1263, %1269 : vector<8x128xf32>
    %1277 = arith.addf %1258, %1276 : vector<8x128xf32>
    %1278 = arith.mulf %1264, %1269 : vector<8x128xf32>
    %1279 = arith.addf %1244, %1278 : vector<8x128xf32>
    %1280 = arith.mulf %1265, %1269 : vector<8x128xf32>
    %1281 = arith.addf %1228, %1280 : vector<8x128xf32>
    %c6_202 = arith.constant 6 : index
    %c0_203 = arith.constant 0 : index
    %c0_204 = arith.constant 0 : index
    %1282 = vector.load %arg4[%c6_202, %c0_203, %c0_204] : memref<25x8x128xf32, #tpu.memory_space<vmem>>, vector<1x8x128xf32>
    %1283 = vector.shape_cast %1282 : vector<1x8x128xf32> to vector<8x128xf32>
    %1284 = arith.mulf %1260, %1283 : vector<8x128xf32>
    %1285 = arith.addf %1250, %1284 : vector<8x128xf32>
    %1286 = arith.mulf %1261, %1283 : vector<8x128xf32>
    %1287 = arith.addf %1271, %1286 : vector<8x128xf32>
    %1288 = arith.mulf %1262, %1283 : vector<8x128xf32>
    %1289 = arith.addf %1273, %1288 : vector<8x128xf32>
    %1290 = arith.mulf %1263, %1283 : vector<8x128xf32>
    %1291 = arith.addf %1275, %1290 : vector<8x128xf32>
    %1292 = arith.mulf %1264, %1283 : vector<8x128xf32>
    %1293 = arith.addf %1277, %1292 : vector<8x128xf32>
    %1294 = arith.mulf %1265, %1283 : vector<8x128xf32>
    %1295 = arith.addf %1279, %1294 : vector<8x128xf32>
    %1296 = arith.mulf %1266, %1283 : vector<8x128xf32>
    %1297 = arith.addf %1281, %1296 : vector<8x128xf32>
    %c11_205 = arith.constant 11 : index
    %c0_206 = arith.constant 0 : index
    %c0_207 = arith.constant 0 : index
    %1298 = vector.load %arg4[%c11_205, %c0_206, %c0_207] : memref<25x8x128xf32, #tpu.memory_space<vmem>>, vector<1x8x128xf32>
    %1299 = vector.shape_cast %1298 : vector<1x8x128xf32> to vector<8x128xf32>
    %1300 = arith.mulf %1260, %1299 : vector<8x128xf32>
    %1301 = arith.addf %1248, %1300 : vector<8x128xf32>
    %1302 = arith.mulf %1261, %1299 : vector<8x128xf32>
    %1303 = arith.addf %1285, %1302 : vector<8x128xf32>
    %1304 = arith.mulf %1262, %1299 : vector<8x128xf32>
    %1305 = arith.addf %1287, %1304 : vector<8x128xf32>
    %1306 = arith.mulf %1263, %1299 : vector<8x128xf32>
    %1307 = arith.addf %1289, %1306 : vector<8x128xf32>
    %1308 = arith.mulf %1264, %1299 : vector<8x128xf32>
    %1309 = arith.addf %1291, %1308 : vector<8x128xf32>
    %1310 = arith.mulf %1265, %1299 : vector<8x128xf32>
    %1311 = arith.addf %1293, %1310 : vector<8x128xf32>
    %1312 = arith.mulf %1266, %1299 : vector<8x128xf32>
    %1313 = arith.addf %1295, %1312 : vector<8x128xf32>
    %1314 = arith.mulf %1267, %1299 : vector<8x128xf32>
    %1315 = arith.addf %1297, %1314 : vector<8x128xf32>
    %c16_208 = arith.constant 16 : index
    %c0_209 = arith.constant 0 : index
    %c0_210 = arith.constant 0 : index
    %1316 = vector.load %arg4[%c16_208, %c0_209, %c0_210] : memref<25x8x128xf32, #tpu.memory_space<vmem>>, vector<1x8x128xf32>
    %1317 = vector.shape_cast %1316 : vector<1x8x128xf32> to vector<8x128xf32>
    %1318 = arith.mulf %1261, %1317 : vector<8x128xf32>
    %1319 = arith.addf %1301, %1318 : vector<8x128xf32>
    %1320 = arith.mulf %1262, %1317 : vector<8x128xf32>
    %1321 = arith.addf %1303, %1320 : vector<8x128xf32>
    %1322 = arith.mulf %1263, %1317 : vector<8x128xf32>
    %1323 = arith.addf %1305, %1322 : vector<8x128xf32>
    %1324 = arith.mulf %1264, %1317 : vector<8x128xf32>
    %1325 = arith.addf %1307, %1324 : vector<8x128xf32>
    %1326 = arith.mulf %1265, %1317 : vector<8x128xf32>
    %1327 = arith.addf %1309, %1326 : vector<8x128xf32>
    %1328 = arith.mulf %1266, %1317 : vector<8x128xf32>
    %1329 = arith.addf %1311, %1328 : vector<8x128xf32>
    %1330 = arith.mulf %1267, %1317 : vector<8x128xf32>
    %1331 = arith.addf %1313, %1330 : vector<8x128xf32>
    %c21_211 = arith.constant 21 : index
    %c0_212 = arith.constant 0 : index
    %c0_213 = arith.constant 0 : index
    %1332 = vector.load %arg4[%c21_211, %c0_212, %c0_213] : memref<25x8x128xf32, #tpu.memory_space<vmem>>, vector<1x8x128xf32>
    %1333 = vector.shape_cast %1332 : vector<1x8x128xf32> to vector<8x128xf32>
    %1334 = arith.mulf %1262, %1333 : vector<8x128xf32>
    %1335 = arith.addf %1319, %1334 : vector<8x128xf32>
    %1336 = arith.mulf %1263, %1333 : vector<8x128xf32>
    %1337 = arith.addf %1321, %1336 : vector<8x128xf32>
    %1338 = arith.mulf %1264, %1333 : vector<8x128xf32>
    %1339 = arith.addf %1323, %1338 : vector<8x128xf32>
    %1340 = arith.mulf %1265, %1333 : vector<8x128xf32>
    %1341 = arith.addf %1325, %1340 : vector<8x128xf32>
    %1342 = arith.mulf %1266, %1333 : vector<8x128xf32>
    %1343 = arith.addf %1327, %1342 : vector<8x128xf32>
    %1344 = arith.mulf %1267, %1333 : vector<8x128xf32>
    %1345 = arith.addf %1329, %1344 : vector<8x128xf32>
    %1346 = vector.extract_strided_slice %1179 {offsets = [0, 0], sizes = [8, 128], strides = [1, 1]} : vector<64x128xf32> to vector<8x128xf32>
    %1347 = vector.extract_strided_slice %1179 {offsets = [8, 0], sizes = [8, 128], strides = [1, 1]} : vector<64x128xf32> to vector<8x128xf32>
    %1348 = vector.extract_strided_slice %1179 {offsets = [16, 0], sizes = [8, 128], strides = [1, 1]} : vector<64x128xf32> to vector<8x128xf32>
    %1349 = vector.extract_strided_slice %1179 {offsets = [24, 0], sizes = [8, 128], strides = [1, 1]} : vector<64x128xf32> to vector<8x128xf32>
    %1350 = vector.extract_strided_slice %1179 {offsets = [32, 0], sizes = [8, 128], strides = [1, 1]} : vector<64x128xf32> to vector<8x128xf32>
    %1351 = vector.extract_strided_slice %1179 {offsets = [40, 0], sizes = [8, 128], strides = [1, 1]} : vector<64x128xf32> to vector<8x128xf32>
    %1352 = vector.extract_strided_slice %1179 {offsets = [48, 0], sizes = [8, 128], strides = [1, 1]} : vector<64x128xf32> to vector<8x128xf32>
    %1353 = vector.extract_strided_slice %1179 {offsets = [56, 0], sizes = [8, 128], strides = [1, 1]} : vector<64x128xf32> to vector<8x128xf32>
    %c2_214 = arith.constant 2 : index
    %c0_215 = arith.constant 0 : index
    %c0_216 = arith.constant 0 : index
    %1354 = vector.load %arg4[%c2_214, %c0_215, %c0_216] : memref<25x8x128xf32, #tpu.memory_space<vmem>>, vector<1x8x128xf32>
    %1355 = vector.shape_cast %1354 : vector<1x8x128xf32> to vector<8x128xf32>
    %1356 = arith.mulf %1346, %1355 : vector<8x128xf32>
    %1357 = arith.addf %1339, %1356 : vector<8x128xf32>
    %1358 = arith.mulf %1347, %1355 : vector<8x128xf32>
    %1359 = arith.addf %1341, %1358 : vector<8x128xf32>
    %1360 = arith.mulf %1348, %1355 : vector<8x128xf32>
    %1361 = arith.addf %1343, %1360 : vector<8x128xf32>
    %1362 = arith.mulf %1349, %1355 : vector<8x128xf32>
    %1363 = arith.addf %1345, %1362 : vector<8x128xf32>
    %1364 = arith.mulf %1350, %1355 : vector<8x128xf32>
    %1365 = arith.addf %1331, %1364 : vector<8x128xf32>
    %1366 = arith.mulf %1351, %1355 : vector<8x128xf32>
    %1367 = arith.addf %1315, %1366 : vector<8x128xf32>
    %c7_217 = arith.constant 7 : index
    %c0_218 = arith.constant 0 : index
    %c0_219 = arith.constant 0 : index
    %1368 = vector.load %arg4[%c7_217, %c0_218, %c0_219] : memref<25x8x128xf32, #tpu.memory_space<vmem>>, vector<1x8x128xf32>
    %1369 = vector.shape_cast %1368 : vector<1x8x128xf32> to vector<8x128xf32>
    %1370 = arith.mulf %1346, %1369 : vector<8x128xf32>
    %1371 = arith.addf %1337, %1370 : vector<8x128xf32>
    %1372 = arith.mulf %1347, %1369 : vector<8x128xf32>
    %1373 = arith.addf %1357, %1372 : vector<8x128xf32>
    %1374 = arith.mulf %1348, %1369 : vector<8x128xf32>
    %1375 = arith.addf %1359, %1374 : vector<8x128xf32>
    %1376 = arith.mulf %1349, %1369 : vector<8x128xf32>
    %1377 = arith.addf %1361, %1376 : vector<8x128xf32>
    %1378 = arith.mulf %1350, %1369 : vector<8x128xf32>
    %1379 = arith.addf %1363, %1378 : vector<8x128xf32>
    %1380 = arith.mulf %1351, %1369 : vector<8x128xf32>
    %1381 = arith.addf %1365, %1380 : vector<8x128xf32>
    %1382 = arith.mulf %1352, %1369 : vector<8x128xf32>
    %1383 = arith.addf %1367, %1382 : vector<8x128xf32>
    %c12_220 = arith.constant 12 : index
    %c0_221 = arith.constant 0 : index
    %c0_222 = arith.constant 0 : index
    %1384 = vector.load %arg4[%c12_220, %c0_221, %c0_222] : memref<25x8x128xf32, #tpu.memory_space<vmem>>, vector<1x8x128xf32>
    %1385 = vector.shape_cast %1384 : vector<1x8x128xf32> to vector<8x128xf32>
    %1386 = arith.mulf %1346, %1385 : vector<8x128xf32>
    %1387 = arith.addf %1335, %1386 : vector<8x128xf32>
    %1388 = arith.mulf %1347, %1385 : vector<8x128xf32>
    %1389 = arith.addf %1371, %1388 : vector<8x128xf32>
    %1390 = arith.mulf %1348, %1385 : vector<8x128xf32>
    %1391 = arith.addf %1373, %1390 : vector<8x128xf32>
    %1392 = arith.mulf %1349, %1385 : vector<8x128xf32>
    %1393 = arith.addf %1375, %1392 : vector<8x128xf32>
    %1394 = arith.mulf %1350, %1385 : vector<8x128xf32>
    %1395 = arith.addf %1377, %1394 : vector<8x128xf32>
    %1396 = arith.mulf %1351, %1385 : vector<8x128xf32>
    %1397 = arith.addf %1379, %1396 : vector<8x128xf32>
    %1398 = arith.mulf %1352, %1385 : vector<8x128xf32>
    %1399 = arith.addf %1381, %1398 : vector<8x128xf32>
    %1400 = arith.mulf %1353, %1385 : vector<8x128xf32>
    %1401 = arith.addf %1383, %1400 : vector<8x128xf32>
    %c17_223 = arith.constant 17 : index
    %c0_224 = arith.constant 0 : index
    %c0_225 = arith.constant 0 : index
    %1402 = vector.load %arg4[%c17_223, %c0_224, %c0_225] : memref<25x8x128xf32, #tpu.memory_space<vmem>>, vector<1x8x128xf32>
    %1403 = vector.shape_cast %1402 : vector<1x8x128xf32> to vector<8x128xf32>
    %1404 = arith.mulf %1347, %1403 : vector<8x128xf32>
    %1405 = arith.addf %1387, %1404 : vector<8x128xf32>
    %1406 = arith.mulf %1348, %1403 : vector<8x128xf32>
    %1407 = arith.addf %1389, %1406 : vector<8x128xf32>
    %1408 = arith.mulf %1349, %1403 : vector<8x128xf32>
    %1409 = arith.addf %1391, %1408 : vector<8x128xf32>
    %1410 = arith.mulf %1350, %1403 : vector<8x128xf32>
    %1411 = arith.addf %1393, %1410 : vector<8x128xf32>
    %1412 = arith.mulf %1351, %1403 : vector<8x128xf32>
    %1413 = arith.addf %1395, %1412 : vector<8x128xf32>
    %1414 = arith.mulf %1352, %1403 : vector<8x128xf32>
    %1415 = arith.addf %1397, %1414 : vector<8x128xf32>
    %1416 = arith.mulf %1353, %1403 : vector<8x128xf32>
    %1417 = arith.addf %1399, %1416 : vector<8x128xf32>
    %c22_226 = arith.constant 22 : index
    %c0_227 = arith.constant 0 : index
    %c0_228 = arith.constant 0 : index
    %1418 = vector.load %arg4[%c22_226, %c0_227, %c0_228] : memref<25x8x128xf32, #tpu.memory_space<vmem>>, vector<1x8x128xf32>
    %1419 = vector.shape_cast %1418 : vector<1x8x128xf32> to vector<8x128xf32>
    %1420 = arith.mulf %1348, %1419 : vector<8x128xf32>
    %1421 = arith.addf %1405, %1420 : vector<8x128xf32>
    %1422 = arith.mulf %1349, %1419 : vector<8x128xf32>
    %1423 = arith.addf %1407, %1422 : vector<8x128xf32>
    %1424 = arith.mulf %1350, %1419 : vector<8x128xf32>
    %1425 = arith.addf %1409, %1424 : vector<8x128xf32>
    %1426 = arith.mulf %1351, %1419 : vector<8x128xf32>
    %1427 = arith.addf %1411, %1426 : vector<8x128xf32>
    %1428 = arith.mulf %1352, %1419 : vector<8x128xf32>
    %1429 = arith.addf %1413, %1428 : vector<8x128xf32>
    %1430 = arith.mulf %1353, %1419 : vector<8x128xf32>
    %1431 = arith.addf %1415, %1430 : vector<8x128xf32>
    %c63_i32_229 = arith.constant 63 : i32
    %1432 = tpu.dynamic_rotate %1179 by %c63_i32_229 dim 0 : vector<64x128xf32>, i32 -> vector<64x128xf32>
    %1433 = vector.extract_strided_slice %1432 {offsets = [0, 0], sizes = [8, 128], strides = [1, 1]} : vector<64x128xf32> to vector<8x128xf32>
    %1434 = vector.extract_strided_slice %1432 {offsets = [8, 0], sizes = [8, 128], strides = [1, 1]} : vector<64x128xf32> to vector<8x128xf32>
    %1435 = vector.extract_strided_slice %1432 {offsets = [16, 0], sizes = [8, 128], strides = [1, 1]} : vector<64x128xf32> to vector<8x128xf32>
    %1436 = vector.extract_strided_slice %1432 {offsets = [24, 0], sizes = [8, 128], strides = [1, 1]} : vector<64x128xf32> to vector<8x128xf32>
    %1437 = vector.extract_strided_slice %1432 {offsets = [32, 0], sizes = [8, 128], strides = [1, 1]} : vector<64x128xf32> to vector<8x128xf32>
    %1438 = vector.extract_strided_slice %1432 {offsets = [40, 0], sizes = [8, 128], strides = [1, 1]} : vector<64x128xf32> to vector<8x128xf32>
    %1439 = vector.extract_strided_slice %1432 {offsets = [48, 0], sizes = [8, 128], strides = [1, 1]} : vector<64x128xf32> to vector<8x128xf32>
    %1440 = vector.extract_strided_slice %1432 {offsets = [56, 0], sizes = [8, 128], strides = [1, 1]} : vector<64x128xf32> to vector<8x128xf32>
    %c3_230 = arith.constant 3 : index
    %c0_231 = arith.constant 0 : index
    %c0_232 = arith.constant 0 : index
    %1441 = vector.load %arg4[%c3_230, %c0_231, %c0_232] : memref<25x8x128xf32, #tpu.memory_space<vmem>>, vector<1x8x128xf32>
    %1442 = vector.shape_cast %1441 : vector<1x8x128xf32> to vector<8x128xf32>
    %1443 = arith.mulf %1433, %1442 : vector<8x128xf32>
    %1444 = arith.addf %1425, %1443 : vector<8x128xf32>
    %1445 = arith.mulf %1434, %1442 : vector<8x128xf32>
    %1446 = arith.addf %1427, %1445 : vector<8x128xf32>
    %1447 = arith.mulf %1435, %1442 : vector<8x128xf32>
    %1448 = arith.addf %1429, %1447 : vector<8x128xf32>
    %1449 = arith.mulf %1436, %1442 : vector<8x128xf32>
    %1450 = arith.addf %1431, %1449 : vector<8x128xf32>
    %1451 = arith.mulf %1437, %1442 : vector<8x128xf32>
    %1452 = arith.addf %1417, %1451 : vector<8x128xf32>
    %1453 = arith.mulf %1438, %1442 : vector<8x128xf32>
    %1454 = arith.addf %1401, %1453 : vector<8x128xf32>
    %c8_233 = arith.constant 8 : index
    %c0_234 = arith.constant 0 : index
    %c0_235 = arith.constant 0 : index
    %1455 = vector.load %arg4[%c8_233, %c0_234, %c0_235] : memref<25x8x128xf32, #tpu.memory_space<vmem>>, vector<1x8x128xf32>
    %1456 = vector.shape_cast %1455 : vector<1x8x128xf32> to vector<8x128xf32>
    %1457 = arith.mulf %1433, %1456 : vector<8x128xf32>
    %1458 = arith.addf %1423, %1457 : vector<8x128xf32>
    %1459 = arith.mulf %1434, %1456 : vector<8x128xf32>
    %1460 = arith.addf %1444, %1459 : vector<8x128xf32>
    %1461 = arith.mulf %1435, %1456 : vector<8x128xf32>
    %1462 = arith.addf %1446, %1461 : vector<8x128xf32>
    %1463 = arith.mulf %1436, %1456 : vector<8x128xf32>
    %1464 = arith.addf %1448, %1463 : vector<8x128xf32>
    %1465 = arith.mulf %1437, %1456 : vector<8x128xf32>
    %1466 = arith.addf %1450, %1465 : vector<8x128xf32>
    %1467 = arith.mulf %1438, %1456 : vector<8x128xf32>
    %1468 = arith.addf %1452, %1467 : vector<8x128xf32>
    %1469 = arith.mulf %1439, %1456 : vector<8x128xf32>
    %1470 = arith.addf %1454, %1469 : vector<8x128xf32>
    %c13_236 = arith.constant 13 : index
    %c0_237 = arith.constant 0 : index
    %c0_238 = arith.constant 0 : index
    %1471 = vector.load %arg4[%c13_236, %c0_237, %c0_238] : memref<25x8x128xf32, #tpu.memory_space<vmem>>, vector<1x8x128xf32>
    %1472 = vector.shape_cast %1471 : vector<1x8x128xf32> to vector<8x128xf32>
    %1473 = arith.mulf %1433, %1472 : vector<8x128xf32>
    %1474 = arith.addf %1421, %1473 : vector<8x128xf32>
    %1475 = arith.mulf %1434, %1472 : vector<8x128xf32>
    %1476 = arith.addf %1458, %1475 : vector<8x128xf32>
    %1477 = arith.mulf %1435, %1472 : vector<8x128xf32>
    %1478 = arith.addf %1460, %1477 : vector<8x128xf32>
    %1479 = arith.mulf %1436, %1472 : vector<8x128xf32>
    %1480 = arith.addf %1462, %1479 : vector<8x128xf32>
    %1481 = arith.mulf %1437, %1472 : vector<8x128xf32>
    %1482 = arith.addf %1464, %1481 : vector<8x128xf32>
    %1483 = arith.mulf %1438, %1472 : vector<8x128xf32>
    %1484 = arith.addf %1466, %1483 : vector<8x128xf32>
    %1485 = arith.mulf %1439, %1472 : vector<8x128xf32>
    %1486 = arith.addf %1468, %1485 : vector<8x128xf32>
    %1487 = arith.mulf %1440, %1472 : vector<8x128xf32>
    %1488 = arith.addf %1470, %1487 : vector<8x128xf32>
    %c18_239 = arith.constant 18 : index
    %c0_240 = arith.constant 0 : index
    %c0_241 = arith.constant 0 : index
    %1489 = vector.load %arg4[%c18_239, %c0_240, %c0_241] : memref<25x8x128xf32, #tpu.memory_space<vmem>>, vector<1x8x128xf32>
    %1490 = vector.shape_cast %1489 : vector<1x8x128xf32> to vector<8x128xf32>
    %1491 = arith.mulf %1434, %1490 : vector<8x128xf32>
    %1492 = arith.addf %1474, %1491 : vector<8x128xf32>
    %1493 = arith.mulf %1435, %1490 : vector<8x128xf32>
    %1494 = arith.addf %1476, %1493 : vector<8x128xf32>
    %1495 = arith.mulf %1436, %1490 : vector<8x128xf32>
    %1496 = arith.addf %1478, %1495 : vector<8x128xf32>
    %1497 = arith.mulf %1437, %1490 : vector<8x128xf32>
    %1498 = arith.addf %1480, %1497 : vector<8x128xf32>
    %1499 = arith.mulf %1438, %1490 : vector<8x128xf32>
    %1500 = arith.addf %1482, %1499 : vector<8x128xf32>
    %1501 = arith.mulf %1439, %1490 : vector<8x128xf32>
    %1502 = arith.addf %1484, %1501 : vector<8x128xf32>
    %1503 = arith.mulf %1440, %1490 : vector<8x128xf32>
    %1504 = arith.addf %1486, %1503 : vector<8x128xf32>
    %c23_242 = arith.constant 23 : index
    %c0_243 = arith.constant 0 : index
    %c0_244 = arith.constant 0 : index
    %1505 = vector.load %arg4[%c23_242, %c0_243, %c0_244] : memref<25x8x128xf32, #tpu.memory_space<vmem>>, vector<1x8x128xf32>
    %1506 = vector.shape_cast %1505 : vector<1x8x128xf32> to vector<8x128xf32>
    %1507 = arith.mulf %1435, %1506 : vector<8x128xf32>
    %1508 = arith.addf %1492, %1507 : vector<8x128xf32>
    %1509 = arith.mulf %1436, %1506 : vector<8x128xf32>
    %1510 = arith.addf %1494, %1509 : vector<8x128xf32>
    %1511 = arith.mulf %1437, %1506 : vector<8x128xf32>
    %1512 = arith.addf %1496, %1511 : vector<8x128xf32>
    %1513 = arith.mulf %1438, %1506 : vector<8x128xf32>
    %1514 = arith.addf %1498, %1513 : vector<8x128xf32>
    %1515 = arith.mulf %1439, %1506 : vector<8x128xf32>
    %1516 = arith.addf %1500, %1515 : vector<8x128xf32>
    %1517 = arith.mulf %1440, %1506 : vector<8x128xf32>
    %1518 = arith.addf %1502, %1517 : vector<8x128xf32>
    %c62_i32_245 = arith.constant 62 : i32
    %1519 = tpu.dynamic_rotate %1179 by %c62_i32_245 dim 0 : vector<64x128xf32>, i32 -> vector<64x128xf32>
    %1520 = vector.extract_strided_slice %1519 {offsets = [0, 0], sizes = [8, 128], strides = [1, 1]} : vector<64x128xf32> to vector<8x128xf32>
    %1521 = vector.extract_strided_slice %1519 {offsets = [8, 0], sizes = [8, 128], strides = [1, 1]} : vector<64x128xf32> to vector<8x128xf32>
    %1522 = vector.extract_strided_slice %1519 {offsets = [16, 0], sizes = [8, 128], strides = [1, 1]} : vector<64x128xf32> to vector<8x128xf32>
    %1523 = vector.extract_strided_slice %1519 {offsets = [24, 0], sizes = [8, 128], strides = [1, 1]} : vector<64x128xf32> to vector<8x128xf32>
    %1524 = vector.extract_strided_slice %1519 {offsets = [32, 0], sizes = [8, 128], strides = [1, 1]} : vector<64x128xf32> to vector<8x128xf32>
    %1525 = vector.extract_strided_slice %1519 {offsets = [40, 0], sizes = [8, 128], strides = [1, 1]} : vector<64x128xf32> to vector<8x128xf32>
    %1526 = vector.extract_strided_slice %1519 {offsets = [48, 0], sizes = [8, 128], strides = [1, 1]} : vector<64x128xf32> to vector<8x128xf32>
    %1527 = vector.extract_strided_slice %1519 {offsets = [56, 0], sizes = [8, 128], strides = [1, 1]} : vector<64x128xf32> to vector<8x128xf32>
    %c4_246 = arith.constant 4 : index
    %c0_247 = arith.constant 0 : index
    %c0_248 = arith.constant 0 : index
    %1528 = vector.load %arg4[%c4_246, %c0_247, %c0_248] : memref<25x8x128xf32, #tpu.memory_space<vmem>>, vector<1x8x128xf32>
    %1529 = vector.shape_cast %1528 : vector<1x8x128xf32> to vector<8x128xf32>
    %1530 = arith.mulf %1520, %1529 : vector<8x128xf32>
    %1531 = arith.addf %1512, %1530 : vector<8x128xf32>
    %1532 = arith.mulf %1521, %1529 : vector<8x128xf32>
    %1533 = arith.addf %1514, %1532 : vector<8x128xf32>
    %1534 = arith.mulf %1522, %1529 : vector<8x128xf32>
    %1535 = arith.addf %1516, %1534 : vector<8x128xf32>
    %1536 = arith.mulf %1523, %1529 : vector<8x128xf32>
    %1537 = arith.addf %1518, %1536 : vector<8x128xf32>
    %1538 = arith.mulf %1524, %1529 : vector<8x128xf32>
    %1539 = arith.addf %1504, %1538 : vector<8x128xf32>
    %1540 = arith.mulf %1525, %1529 : vector<8x128xf32>
    %1541 = arith.addf %1488, %1540 : vector<8x128xf32>
    %c9_249 = arith.constant 9 : index
    %c0_250 = arith.constant 0 : index
    %c0_251 = arith.constant 0 : index
    %1542 = vector.load %arg4[%c9_249, %c0_250, %c0_251] : memref<25x8x128xf32, #tpu.memory_space<vmem>>, vector<1x8x128xf32>
    %1543 = vector.shape_cast %1542 : vector<1x8x128xf32> to vector<8x128xf32>
    %1544 = arith.mulf %1520, %1543 : vector<8x128xf32>
    %1545 = arith.addf %1510, %1544 : vector<8x128xf32>
    %1546 = arith.mulf %1521, %1543 : vector<8x128xf32>
    %1547 = arith.addf %1531, %1546 : vector<8x128xf32>
    %1548 = arith.mulf %1522, %1543 : vector<8x128xf32>
    %1549 = arith.addf %1533, %1548 : vector<8x128xf32>
    %1550 = arith.mulf %1523, %1543 : vector<8x128xf32>
    %1551 = arith.addf %1535, %1550 : vector<8x128xf32>
    %1552 = arith.mulf %1524, %1543 : vector<8x128xf32>
    %1553 = arith.addf %1537, %1552 : vector<8x128xf32>
    %1554 = arith.mulf %1525, %1543 : vector<8x128xf32>
    %1555 = arith.addf %1539, %1554 : vector<8x128xf32>
    %1556 = arith.mulf %1526, %1543 : vector<8x128xf32>
    %1557 = arith.addf %1541, %1556 : vector<8x128xf32>
    %c14_252 = arith.constant 14 : index
    %c0_253 = arith.constant 0 : index
    %c0_254 = arith.constant 0 : index
    %1558 = vector.load %arg4[%c14_252, %c0_253, %c0_254] : memref<25x8x128xf32, #tpu.memory_space<vmem>>, vector<1x8x128xf32>
    %1559 = vector.shape_cast %1558 : vector<1x8x128xf32> to vector<8x128xf32>
    %1560 = arith.mulf %1520, %1559 : vector<8x128xf32>
    %1561 = arith.addf %1508, %1560 : vector<8x128xf32>
    %1562 = arith.mulf %1521, %1559 : vector<8x128xf32>
    %1563 = arith.addf %1545, %1562 : vector<8x128xf32>
    %1564 = arith.mulf %1522, %1559 : vector<8x128xf32>
    %1565 = arith.addf %1547, %1564 : vector<8x128xf32>
    %1566 = arith.mulf %1523, %1559 : vector<8x128xf32>
    %1567 = arith.addf %1549, %1566 : vector<8x128xf32>
    %1568 = arith.mulf %1524, %1559 : vector<8x128xf32>
    %1569 = arith.addf %1551, %1568 : vector<8x128xf32>
    %1570 = arith.mulf %1525, %1559 : vector<8x128xf32>
    %1571 = arith.addf %1553, %1570 : vector<8x128xf32>
    %1572 = arith.mulf %1526, %1559 : vector<8x128xf32>
    %1573 = arith.addf %1555, %1572 : vector<8x128xf32>
    %1574 = arith.mulf %1527, %1559 : vector<8x128xf32>
    %1575 = arith.addf %1557, %1574 : vector<8x128xf32>
    %c19_255 = arith.constant 19 : index
    %c0_256 = arith.constant 0 : index
    %c0_257 = arith.constant 0 : index
    %1576 = vector.load %arg4[%c19_255, %c0_256, %c0_257] : memref<25x8x128xf32, #tpu.memory_space<vmem>>, vector<1x8x128xf32>
    %1577 = vector.shape_cast %1576 : vector<1x8x128xf32> to vector<8x128xf32>
    %1578 = arith.mulf %1521, %1577 : vector<8x128xf32>
    %1579 = arith.addf %1561, %1578 : vector<8x128xf32>
    %1580 = arith.mulf %1522, %1577 : vector<8x128xf32>
    %1581 = arith.addf %1563, %1580 : vector<8x128xf32>
    %1582 = arith.mulf %1523, %1577 : vector<8x128xf32>
    %1583 = arith.addf %1565, %1582 : vector<8x128xf32>
    %1584 = arith.mulf %1524, %1577 : vector<8x128xf32>
    %1585 = arith.addf %1567, %1584 : vector<8x128xf32>
    %1586 = arith.mulf %1525, %1577 : vector<8x128xf32>
    %1587 = arith.addf %1569, %1586 : vector<8x128xf32>
    %1588 = arith.mulf %1526, %1577 : vector<8x128xf32>
    %1589 = arith.addf %1571, %1588 : vector<8x128xf32>
    %1590 = arith.mulf %1527, %1577 : vector<8x128xf32>
    %1591 = arith.addf %1573, %1590 : vector<8x128xf32>
    %c24_258 = arith.constant 24 : index
    %c0_259 = arith.constant 0 : index
    %c0_260 = arith.constant 0 : index
    %1592 = vector.load %arg4[%c24_258, %c0_259, %c0_260] : memref<25x8x128xf32, #tpu.memory_space<vmem>>, vector<1x8x128xf32>
    %1593 = vector.shape_cast %1592 : vector<1x8x128xf32> to vector<8x128xf32>
    %1594 = arith.mulf %1522, %1593 : vector<8x128xf32>
    %1595 = arith.addf %1579, %1594 : vector<8x128xf32>
    %1596 = arith.mulf %1523, %1593 : vector<8x128xf32>
    %1597 = arith.addf %1581, %1596 : vector<8x128xf32>
    %1598 = arith.mulf %1524, %1593 : vector<8x128xf32>
    %1599 = arith.addf %1583, %1598 : vector<8x128xf32>
    %1600 = arith.mulf %1525, %1593 : vector<8x128xf32>
    %1601 = arith.addf %1585, %1600 : vector<8x128xf32>
    %1602 = arith.mulf %1526, %1593 : vector<8x128xf32>
    %1603 = arith.addf %1587, %1602 : vector<8x128xf32>
    %1604 = arith.mulf %1527, %1593 : vector<8x128xf32>
    %1605 = arith.addf %1589, %1604 : vector<8x128xf32>
    %1606 = arith.addf %1595, %1153 : vector<8x128xf32>
    %1607 = arith.addf %1597, %1153 : vector<8x128xf32>
    %1608 = arith.addf %1599, %1153 : vector<8x128xf32>
    %1609 = arith.addf %1601, %1153 : vector<8x128xf32>
    %1610 = arith.addf %1603, %1153 : vector<8x128xf32>
    %1611 = arith.addf %1605, %1153 : vector<8x128xf32>
    %1612 = arith.addf %1591, %1153 : vector<8x128xf32>
    %1613 = arith.addf %1575, %1153 : vector<8x128xf32>
    %1614 = tpu.concatenate %1606, %1607, %1608, %1609, %1610, %1611, %1612, %1613 in 0 : vector<8x128xf32>, vector<8x128xf32>, vector<8x128xf32>, vector<8x128xf32>, vector<8x128xf32>, vector<8x128xf32>, vector<8x128xf32>, vector<8x128xf32> -> vector<64x128xf32>
    %c1_i32_261 = arith.constant 1 : i32
    %1615 = tpu.dynamic_rotate %1614 by %c1_i32_261 dim 0 : vector<64x128xf32>, i32 -> vector<64x128xf32>
    %1616 = vector.extract_strided_slice %1615 {offsets = [0, 0], sizes = [8, 128], strides = [1, 1]} : vector<64x128xf32> to vector<8x128xf32>
    %1617 = vector.extract_strided_slice %1615 {offsets = [8, 0], sizes = [8, 128], strides = [1, 1]} : vector<64x128xf32> to vector<8x128xf32>
    %1618 = vector.extract_strided_slice %1615 {offsets = [16, 0], sizes = [8, 128], strides = [1, 1]} : vector<64x128xf32> to vector<8x128xf32>
    %1619 = vector.extract_strided_slice %1615 {offsets = [24, 0], sizes = [8, 128], strides = [1, 1]} : vector<64x128xf32> to vector<8x128xf32>
    %1620 = vector.extract_strided_slice %1615 {offsets = [32, 0], sizes = [8, 128], strides = [1, 1]} : vector<64x128xf32> to vector<8x128xf32>
    %1621 = vector.extract_strided_slice %1615 {offsets = [40, 0], sizes = [8, 128], strides = [1, 1]} : vector<64x128xf32> to vector<8x128xf32>
    %1622 = vector.extract_strided_slice %1615 {offsets = [48, 0], sizes = [8, 128], strides = [1, 1]} : vector<64x128xf32> to vector<8x128xf32>
    %1623 = vector.extract_strided_slice %1615 {offsets = [56, 0], sizes = [8, 128], strides = [1, 1]} : vector<64x128xf32> to vector<8x128xf32>
    %c0_262 = arith.constant 0 : index
    %c0_263 = arith.constant 0 : index
    %c0_264 = arith.constant 0 : index
    %1624 = vector.load %arg5[%c0_262, %c0_263, %c0_264] : memref<9x8x128xf32, #tpu.memory_space<vmem>>, vector<1x8x128xf32>
    %1625 = vector.shape_cast %1624 : vector<1x8x128xf32> to vector<8x128xf32>
    %1626 = arith.mulf %1616, %1625 : vector<8x128xf32>
    %1627 = arith.addf %1166, %1626 : vector<8x128xf32>
    %1628 = arith.mulf %1617, %1625 : vector<8x128xf32>
    %1629 = arith.addf %1168, %1628 : vector<8x128xf32>
    %1630 = arith.mulf %1618, %1625 : vector<8x128xf32>
    %1631 = arith.addf %1170, %1630 : vector<8x128xf32>
    %1632 = arith.mulf %1619, %1625 : vector<8x128xf32>
    %1633 = arith.addf %1172, %1632 : vector<8x128xf32>
    %1634 = arith.mulf %1620, %1625 : vector<8x128xf32>
    %1635 = arith.addf %1174, %1634 : vector<8x128xf32>
    %1636 = arith.mulf %1621, %1625 : vector<8x128xf32>
    %1637 = arith.addf %1176, %1636 : vector<8x128xf32>
    %1638 = arith.mulf %1622, %1625 : vector<8x128xf32>
    %1639 = arith.addf %1178, %1638 : vector<8x128xf32>
    %c3_265 = arith.constant 3 : index
    %c0_266 = arith.constant 0 : index
    %c0_267 = arith.constant 0 : index
    %1640 = vector.load %arg5[%c3_265, %c0_266, %c0_267] : memref<9x8x128xf32, #tpu.memory_space<vmem>>, vector<1x8x128xf32>
    %1641 = vector.shape_cast %1640 : vector<1x8x128xf32> to vector<8x128xf32>
    %1642 = arith.mulf %1616, %1641 : vector<8x128xf32>
    %1643 = arith.addf %1164, %1642 : vector<8x128xf32>
    %1644 = arith.mulf %1617, %1641 : vector<8x128xf32>
    %1645 = arith.addf %1627, %1644 : vector<8x128xf32>
    %1646 = arith.mulf %1618, %1641 : vector<8x128xf32>
    %1647 = arith.addf %1629, %1646 : vector<8x128xf32>
    %1648 = arith.mulf %1619, %1641 : vector<8x128xf32>
    %1649 = arith.addf %1631, %1648 : vector<8x128xf32>
    %1650 = arith.mulf %1620, %1641 : vector<8x128xf32>
    %1651 = arith.addf %1633, %1650 : vector<8x128xf32>
    %1652 = arith.mulf %1621, %1641 : vector<8x128xf32>
    %1653 = arith.addf %1635, %1652 : vector<8x128xf32>
    %1654 = arith.mulf %1622, %1641 : vector<8x128xf32>
    %1655 = arith.addf %1637, %1654 : vector<8x128xf32>
    %1656 = arith.mulf %1623, %1641 : vector<8x128xf32>
    %1657 = arith.addf %1639, %1656 : vector<8x128xf32>
    %c6_268 = arith.constant 6 : index
    %c0_269 = arith.constant 0 : index
    %c0_270 = arith.constant 0 : index
    %1658 = vector.load %arg5[%c6_268, %c0_269, %c0_270] : memref<9x8x128xf32, #tpu.memory_space<vmem>>, vector<1x8x128xf32>
    %1659 = vector.shape_cast %1658 : vector<1x8x128xf32> to vector<8x128xf32>
    %1660 = arith.mulf %1617, %1659 : vector<8x128xf32>
    %1661 = arith.addf %1643, %1660 : vector<8x128xf32>
    %1662 = arith.mulf %1618, %1659 : vector<8x128xf32>
    %1663 = arith.addf %1645, %1662 : vector<8x128xf32>
    %1664 = arith.mulf %1619, %1659 : vector<8x128xf32>
    %1665 = arith.addf %1647, %1664 : vector<8x128xf32>
    %1666 = arith.mulf %1620, %1659 : vector<8x128xf32>
    %1667 = arith.addf %1649, %1666 : vector<8x128xf32>
    %1668 = arith.mulf %1621, %1659 : vector<8x128xf32>
    %1669 = arith.addf %1651, %1668 : vector<8x128xf32>
    %1670 = arith.mulf %1622, %1659 : vector<8x128xf32>
    %1671 = arith.addf %1653, %1670 : vector<8x128xf32>
    %1672 = arith.mulf %1623, %1659 : vector<8x128xf32>
    %1673 = arith.addf %1655, %1672 : vector<8x128xf32>
    %1674 = vector.extract_strided_slice %1614 {offsets = [0, 0], sizes = [8, 128], strides = [1, 1]} : vector<64x128xf32> to vector<8x128xf32>
    %1675 = vector.extract_strided_slice %1614 {offsets = [8, 0], sizes = [8, 128], strides = [1, 1]} : vector<64x128xf32> to vector<8x128xf32>
    %1676 = vector.extract_strided_slice %1614 {offsets = [16, 0], sizes = [8, 128], strides = [1, 1]} : vector<64x128xf32> to vector<8x128xf32>
    %1677 = vector.extract_strided_slice %1614 {offsets = [24, 0], sizes = [8, 128], strides = [1, 1]} : vector<64x128xf32> to vector<8x128xf32>
    %1678 = vector.extract_strided_slice %1614 {offsets = [32, 0], sizes = [8, 128], strides = [1, 1]} : vector<64x128xf32> to vector<8x128xf32>
    %1679 = vector.extract_strided_slice %1614 {offsets = [40, 0], sizes = [8, 128], strides = [1, 1]} : vector<64x128xf32> to vector<8x128xf32>
    %1680 = vector.extract_strided_slice %1614 {offsets = [48, 0], sizes = [8, 128], strides = [1, 1]} : vector<64x128xf32> to vector<8x128xf32>
    %1681 = vector.extract_strided_slice %1614 {offsets = [56, 0], sizes = [8, 128], strides = [1, 1]} : vector<64x128xf32> to vector<8x128xf32>
    %c1_271 = arith.constant 1 : index
    %c0_272 = arith.constant 0 : index
    %c0_273 = arith.constant 0 : index
    %1682 = vector.load %arg5[%c1_271, %c0_272, %c0_273] : memref<9x8x128xf32, #tpu.memory_space<vmem>>, vector<1x8x128xf32>
    %1683 = vector.shape_cast %1682 : vector<1x8x128xf32> to vector<8x128xf32>
    %1684 = arith.mulf %1674, %1683 : vector<8x128xf32>
    %1685 = arith.addf %1663, %1684 : vector<8x128xf32>
    %1686 = arith.mulf %1675, %1683 : vector<8x128xf32>
    %1687 = arith.addf %1665, %1686 : vector<8x128xf32>
    %1688 = arith.mulf %1676, %1683 : vector<8x128xf32>
    %1689 = arith.addf %1667, %1688 : vector<8x128xf32>
    %1690 = arith.mulf %1677, %1683 : vector<8x128xf32>
    %1691 = arith.addf %1669, %1690 : vector<8x128xf32>
    %1692 = arith.mulf %1678, %1683 : vector<8x128xf32>
    %1693 = arith.addf %1671, %1692 : vector<8x128xf32>
    %1694 = arith.mulf %1679, %1683 : vector<8x128xf32>
    %1695 = arith.addf %1673, %1694 : vector<8x128xf32>
    %1696 = arith.mulf %1680, %1683 : vector<8x128xf32>
    %1697 = arith.addf %1657, %1696 : vector<8x128xf32>
    %c4_274 = arith.constant 4 : index
    %c0_275 = arith.constant 0 : index
    %c0_276 = arith.constant 0 : index
    %1698 = vector.load %arg5[%c4_274, %c0_275, %c0_276] : memref<9x8x128xf32, #tpu.memory_space<vmem>>, vector<1x8x128xf32>
    %1699 = vector.shape_cast %1698 : vector<1x8x128xf32> to vector<8x128xf32>
    %1700 = arith.mulf %1674, %1699 : vector<8x128xf32>
    %1701 = arith.addf %1661, %1700 : vector<8x128xf32>
    %1702 = arith.mulf %1675, %1699 : vector<8x128xf32>
    %1703 = arith.addf %1685, %1702 : vector<8x128xf32>
    %1704 = arith.mulf %1676, %1699 : vector<8x128xf32>
    %1705 = arith.addf %1687, %1704 : vector<8x128xf32>
    %1706 = arith.mulf %1677, %1699 : vector<8x128xf32>
    %1707 = arith.addf %1689, %1706 : vector<8x128xf32>
    %1708 = arith.mulf %1678, %1699 : vector<8x128xf32>
    %1709 = arith.addf %1691, %1708 : vector<8x128xf32>
    %1710 = arith.mulf %1679, %1699 : vector<8x128xf32>
    %1711 = arith.addf %1693, %1710 : vector<8x128xf32>
    %1712 = arith.mulf %1680, %1699 : vector<8x128xf32>
    %1713 = arith.addf %1695, %1712 : vector<8x128xf32>
    %1714 = arith.mulf %1681, %1699 : vector<8x128xf32>
    %1715 = arith.addf %1697, %1714 : vector<8x128xf32>
    %c7_277 = arith.constant 7 : index
    %c0_278 = arith.constant 0 : index
    %c0_279 = arith.constant 0 : index
    %1716 = vector.load %arg5[%c7_277, %c0_278, %c0_279] : memref<9x8x128xf32, #tpu.memory_space<vmem>>, vector<1x8x128xf32>
    %1717 = vector.shape_cast %1716 : vector<1x8x128xf32> to vector<8x128xf32>
    %1718 = arith.mulf %1675, %1717 : vector<8x128xf32>
    %1719 = arith.addf %1701, %1718 : vector<8x128xf32>
    %1720 = arith.mulf %1676, %1717 : vector<8x128xf32>
    %1721 = arith.addf %1703, %1720 : vector<8x128xf32>
    %1722 = arith.mulf %1677, %1717 : vector<8x128xf32>
    %1723 = arith.addf %1705, %1722 : vector<8x128xf32>
    %1724 = arith.mulf %1678, %1717 : vector<8x128xf32>
    %1725 = arith.addf %1707, %1724 : vector<8x128xf32>
    %1726 = arith.mulf %1679, %1717 : vector<8x128xf32>
    %1727 = arith.addf %1709, %1726 : vector<8x128xf32>
    %1728 = arith.mulf %1680, %1717 : vector<8x128xf32>
    %1729 = arith.addf %1711, %1728 : vector<8x128xf32>
    %1730 = arith.mulf %1681, %1717 : vector<8x128xf32>
    %1731 = arith.addf %1713, %1730 : vector<8x128xf32>
    %c63_i32_280 = arith.constant 63 : i32
    %1732 = tpu.dynamic_rotate %1614 by %c63_i32_280 dim 0 : vector<64x128xf32>, i32 -> vector<64x128xf32>
    %1733 = vector.extract_strided_slice %1732 {offsets = [0, 0], sizes = [8, 128], strides = [1, 1]} : vector<64x128xf32> to vector<8x128xf32>
    %1734 = vector.extract_strided_slice %1732 {offsets = [8, 0], sizes = [8, 128], strides = [1, 1]} : vector<64x128xf32> to vector<8x128xf32>
    %1735 = vector.extract_strided_slice %1732 {offsets = [16, 0], sizes = [8, 128], strides = [1, 1]} : vector<64x128xf32> to vector<8x128xf32>
    %1736 = vector.extract_strided_slice %1732 {offsets = [24, 0], sizes = [8, 128], strides = [1, 1]} : vector<64x128xf32> to vector<8x128xf32>
    %1737 = vector.extract_strided_slice %1732 {offsets = [32, 0], sizes = [8, 128], strides = [1, 1]} : vector<64x128xf32> to vector<8x128xf32>
    %1738 = vector.extract_strided_slice %1732 {offsets = [40, 0], sizes = [8, 128], strides = [1, 1]} : vector<64x128xf32> to vector<8x128xf32>
    %1739 = vector.extract_strided_slice %1732 {offsets = [48, 0], sizes = [8, 128], strides = [1, 1]} : vector<64x128xf32> to vector<8x128xf32>
    %1740 = vector.extract_strided_slice %1732 {offsets = [56, 0], sizes = [8, 128], strides = [1, 1]} : vector<64x128xf32> to vector<8x128xf32>
    %c2_281 = arith.constant 2 : index
    %c0_282 = arith.constant 0 : index
    %c0_283 = arith.constant 0 : index
    %1741 = vector.load %arg5[%c2_281, %c0_282, %c0_283] : memref<9x8x128xf32, #tpu.memory_space<vmem>>, vector<1x8x128xf32>
    %1742 = vector.shape_cast %1741 : vector<1x8x128xf32> to vector<8x128xf32>
    %1743 = arith.mulf %1733, %1742 : vector<8x128xf32>
    %1744 = arith.addf %1721, %1743 : vector<8x128xf32>
    %1745 = arith.mulf %1734, %1742 : vector<8x128xf32>
    %1746 = arith.addf %1723, %1745 : vector<8x128xf32>
    %1747 = arith.mulf %1735, %1742 : vector<8x128xf32>
    %1748 = arith.addf %1725, %1747 : vector<8x128xf32>
    %1749 = arith.mulf %1736, %1742 : vector<8x128xf32>
    %1750 = arith.addf %1727, %1749 : vector<8x128xf32>
    %1751 = arith.mulf %1737, %1742 : vector<8x128xf32>
    %1752 = arith.addf %1729, %1751 : vector<8x128xf32>
    %1753 = arith.mulf %1738, %1742 : vector<8x128xf32>
    %1754 = arith.addf %1731, %1753 : vector<8x128xf32>
    %1755 = arith.mulf %1739, %1742 : vector<8x128xf32>
    %1756 = arith.addf %1715, %1755 : vector<8x128xf32>
    %c5_284 = arith.constant 5 : index
    %c0_285 = arith.constant 0 : index
    %c0_286 = arith.constant 0 : index
    %1757 = vector.load %arg5[%c5_284, %c0_285, %c0_286] : memref<9x8x128xf32, #tpu.memory_space<vmem>>, vector<1x8x128xf32>
    %1758 = vector.shape_cast %1757 : vector<1x8x128xf32> to vector<8x128xf32>
    %1759 = arith.mulf %1733, %1758 : vector<8x128xf32>
    %1760 = arith.addf %1719, %1759 : vector<8x128xf32>
    %1761 = arith.mulf %1734, %1758 : vector<8x128xf32>
    %1762 = arith.addf %1744, %1761 : vector<8x128xf32>
    %1763 = arith.mulf %1735, %1758 : vector<8x128xf32>
    %1764 = arith.addf %1746, %1763 : vector<8x128xf32>
    %1765 = arith.mulf %1736, %1758 : vector<8x128xf32>
    %1766 = arith.addf %1748, %1765 : vector<8x128xf32>
    %1767 = arith.mulf %1737, %1758 : vector<8x128xf32>
    %1768 = arith.addf %1750, %1767 : vector<8x128xf32>
    %1769 = arith.mulf %1738, %1758 : vector<8x128xf32>
    %1770 = arith.addf %1752, %1769 : vector<8x128xf32>
    %1771 = arith.mulf %1739, %1758 : vector<8x128xf32>
    %1772 = arith.addf %1754, %1771 : vector<8x128xf32>
    %1773 = arith.mulf %1740, %1758 : vector<8x128xf32>
    %1774 = arith.addf %1756, %1773 : vector<8x128xf32>
    %c8_287 = arith.constant 8 : index
    %c0_288 = arith.constant 0 : index
    %c0_289 = arith.constant 0 : index
    %1775 = vector.load %arg5[%c8_287, %c0_288, %c0_289] : memref<9x8x128xf32, #tpu.memory_space<vmem>>, vector<1x8x128xf32>
    %1776 = vector.shape_cast %1775 : vector<1x8x128xf32> to vector<8x128xf32>
    %1777 = arith.mulf %1734, %1776 : vector<8x128xf32>
    %1778 = arith.addf %1760, %1777 : vector<8x128xf32>
    %1779 = arith.mulf %1735, %1776 : vector<8x128xf32>
    %1780 = arith.addf %1762, %1779 : vector<8x128xf32>
    %1781 = arith.mulf %1736, %1776 : vector<8x128xf32>
    %1782 = arith.addf %1764, %1781 : vector<8x128xf32>
    %1783 = arith.mulf %1737, %1776 : vector<8x128xf32>
    %1784 = arith.addf %1766, %1783 : vector<8x128xf32>
    %1785 = arith.mulf %1738, %1776 : vector<8x128xf32>
    %1786 = arith.addf %1768, %1785 : vector<8x128xf32>
    %1787 = arith.mulf %1739, %1776 : vector<8x128xf32>
    %1788 = arith.addf %1770, %1787 : vector<8x128xf32>
    %1789 = arith.mulf %1740, %1776 : vector<8x128xf32>
    %1790 = arith.addf %1772, %1789 : vector<8x128xf32>
    %1791 = tpu.concatenate %1778, %1780, %1782, %1784, %1786, %1788, %1790, %1774 in 0 : vector<8x128xf32>, vector<8x128xf32>, vector<8x128xf32>, vector<8x128xf32>, vector<8x128xf32>, vector<8x128xf32>, vector<8x128xf32>, vector<8x128xf32> -> vector<64x128xf32>
    %c0_290 = arith.constant 0 : index
    %c0_291 = arith.constant 0 : index
    %c0_292 = arith.constant 0 : index
    %1792 = vector.load %arg9[%c0_290, %c0_291, %c0_292] : memref<1x64x128xf32, #tpu.memory_space<vmem>>, vector<1x64x128xf32>
    %1793 = vector.shape_cast %1792 : vector<1x64x128xf32> to vector<64x128xf32>
    %1794 = vector.shape_cast %1791 : vector<64x128xf32> to vector<1x64x128xf32>
    tpu.vector_store %arg9[%c0_290, %c0_291, %c0_292], %1794 {strides = array<i32>} : memref<1x64x128xf32, #tpu.memory_space<vmem>>, vector<1x64x128xf32>,
    return
  }
  func.func @transform_0(%arg0: i32) -> (i32, i32, i32) {
    %c0_i32 = arith.constant 0 : i32
    %c0_i32_0 = arith.constant 0 : i32
    %c0_i32_1 = arith.constant 0 : i32
    return %arg0, %c0_i32, %c0_i32_0 : i32, i32, i32
  }
  func.func @transform_1(%arg0: i32) -> (i32, i32, i32) {
    %c0_i32 = arith.constant 0 : i32
    %c0_i32_0 = arith.constant 0 : i32
    %c0_i32_1 = arith.constant 0 : i32
    %c0_i32_2 = arith.constant 0 : i32
    return %c0_i32, %c0_i32_0, %c0_i32_1 : i32, i32, i32
  }
  func.func @transform_2(%arg0: i32) -> (i32, i32, i32) {
    %c0_i32 = arith.constant 0 : i32
    %c0_i32_0 = arith.constant 0 : i32
    %c0_i32_1 = arith.constant 0 : i32
    %c0_i32_2 = arith.constant 0 : i32
    return %c0_i32, %c0_i32_0, %c0_i32_1 : i32, i32, i32
  }
  func.func @transform_3(%arg0: i32) -> (i32, i32, i32) {
    %c0_i32 = arith.constant 0 : i32
    %c0_i32_0 = arith.constant 0 : i32
    %c0_i32_1 = arith.constant 0 : i32
    %c0_i32_2 = arith.constant 0 : i32
    return %c0_i32, %c0_i32_0, %c0_i32_1 : i32, i32, i32
  }
  func.func @transform_4(%arg0: i32) -> (i32, i32, i32) {
    %c0_i32 = arith.constant 0 : i32
    %c0_i32_0 = arith.constant 0 : i32
    %c0_i32_1 = arith.constant 0 : i32
    %c0_i32_2 = arith.constant 0 : i32
    return %c0_i32, %c0_i32_0, %c0_i32_1 : i32, i32, i32
  }
  func.func @transform_5(%arg0: i32) -> (i32, i32) {
    %c0_i32 = arith.constant 0 : i32
    %c0_i32_0 = arith.constant 0 : i32
    %c0_i32_1 = arith.constant 0 : i32
    return %c0_i32, %c0_i32_0 : i32, i32
  }
  func.func @transform_6(%arg0: i32) -> (i32, i32) {
    %c0_i32 = arith.constant 0 : i32
    %c0_i32_0 = arith.constant 0 : i32
    %c0_i32_1 = arith.constant 0 : i32
    return %c0_i32, %c0_i32_0 : i32, i32
  }
  func.func @transform_7(%arg0: i32) -> (i32, i32) {
    %c0_i32 = arith.constant 0 : i32
    %c0_i32_0 = arith.constant 0 : i32
    %c0_i32_1 = arith.constant 0 : i32
    return %c0_i32, %c0_i32_0 : i32, i32
  }
  func.func @transform_8(%arg0: i32) -> (i32, i32, i32) {
    %c0_i32 = arith.constant 0 : i32
    %c0_i32_0 = arith.constant 0 : i32
    %c0_i32_1 = arith.constant 0 : i32
    return %arg0, %c0_i32, %c0_i32_0 : i32, i32, i32
  }
}

</mosaic_0001>

<bundles_post_ra>
// kernel: tpu_custom_call.1
= control target key start
LH: loop header
LB: loop body
LE: loop exit
PB: predicated region body
PF: predicated region fallthrough
CT: control target
= control target key end

     0   :  { %13 = vsyncpa [#allocation3], 0  ;;  %s4460_s0 = inlined_call_operand.hbm [shape: f32[2,64,128], index: 0, kind: input, shape index: {}]   ;;  %s4461_s1 = inlined_call_operand.hbm [shape: f32[49,8,128], index: 1, kind: input, shape index: {}]   ;;  %s4462_s2 = inlined_call_operand.hbm [shape: f32[25,8,128], index: 2, kind: input, shape index: {}]   ;;  %s4463_s3 = inlined_call_operand.hbm [shape: f32[25,8,128], index: 3, kind: input, shape index: {}]   ;;  %s4464_s4 = inlined_call_operand.hbm [shape: f32[9,8,128], index: 4, kind: input, shape index: {}]   ;;  %s4465_s5 = inlined_call_operand.vmem [shape: f32[8,128], index: 5, kind: input, shape index: {}]   ;;  %s4466_s6 = inlined_call_operand.vmem [shape: f32[8,128], index: 6, kind: input, shape index: {}]   ;;  %s4467_s7 = inlined_call_operand.vmem [shape: f32[8,128], index: 7, kind: input, shape index: {}]   ;;  %s4468_s8 = inlined_call_operand.hbm [shape: f32[2,64,128], index: 8, kind: output, shape index: {}]  }
   0x1   :  { %15 = vsyncpa [#allocation3 + $0x1], 0 }
   0x2   :  { %16 = vsyncpa [#allocation6], 0 }
   0x3   :  { %17 = vsyncpa [#allocation9], 0 }
   0x4   :  { %18 = vsyncpa [#allocation4], 0 }
   0x5   :  { %20 = vsyncpa [#allocation4 + $0x1], 0  ;;  %s2770_s27 = smov 0   ;;  %s2772_s28 = smov 0  }
   0x6   :  { %s2774_s29 = smov 0   ;;  %s2776_s30 = smov 0  }
   0x7 LB: > { %4474 = sst [smem:[#allocation16_spill]] %s2701_s27  ;;  %s2791_s9 = sadd.s32 4294967295, %s2713_s30   ;;  %s2713_s30 = sphi %s2776_s30, %s4497_s30   ;;  %s2709_s29 = sphi %s2774_s29, %s4496_s29   ;;  %s2705_s28 = sphi %s2772_s28, %s4495_s28   ;;  %s2701_s27 = sphi %s2770_s27, %s4494_s27  }
   0x8   : > { %s2374_s10 = sadd.s32 4294967294, %s2713_s30   ;;  %p46_p0 = scmp.ne.s32.totalorder %s2705_s28, %s2701_s27 }
   0x9   : > { %p4469_p1 = scmp.eq.s32.totalorder %s2791_s9, 0  ;;  %p223_p3 = scmp.eq.s32.totalorder %s2374_s10, 1 }
   0xa   : > { %p2375_p5 = scmp.ge.s32.totalorder %s2713_s30, 1  ;;  %p230_p7 = scmp.lt.s32.totalorder %s2713_s30, 3 }
   0xb   : > { %p2800_p4 = por %p4469_p1, %p46_p0  ;;  %p2805_p6 = por %p223_p3, %p46_p0 }
   0xc   : > { %p2810_p8 = pnand %p2375_p5, %p230_p7  ;;  %s2715_s14 = smov [#allocation5]  }
   0xd   : > { %s4475_s11 = scalar_select %p2800_p4, 1, 0 }
   0xe   : > { %s4476_s12 = scalar_select %p2805_p6, 1, 0 }
   0xf   : > { %s4478_s13 = scalar_select %p2810_p8, 1, 0 }
  0x10   : > { %4477 = sst [smem:[#allocation17_spill]] %s4476_s12  ;;  %s242_s15 = sshll.u32 %s2715_s14, 4  ;;  %s2814_s15 = int_to_ptr.vmem [resolvable:$true] %s242_s15 }
  0x11   : > { %p2418_p9 = pneg %p2810_p8  ;;  %s2716_s17 = smov [#allocation8]  }
  0x12   : > { %s268_s18 = sshll.u32 %s2716_s17, 4  ;;  %s2717_s19 = smov [#allocation7]   ;;  %s2825_s18 = int_to_ptr.vmem [resolvable:$true] %s268_s18 }
  0x13   : > { %p2821_p11 = pnand %p2418_p9, %p4469_p1  ;;  %s2827_s20 = sshll.u32 %s2717_s19, 4  ;;  %s256_s20 = int_to_ptr.vmem [resolvable:$true] %s2827_s20 }
  0x14   : > { %s2497_s23 = scalar_lea.hbm %s4461_s1, 6272 }
  0x15   : > { %p2498_p12 = scmp.ne.s32.totalorder %s4461_s1, %s2497_s23  ;;  %p2837_p13 = pneg %p2821_p11 }
  0x16   : > { %p2504_p5 = scmp.lt.u32.totalorder %s2497_s23, %s4461_s1 }
  0x17   : > { %p2500_p0 = pnand %p2837_p13, %p2498_p12 }
  0x19   : > { %p2501_p3 = pneg %p2500_p0 }
  0x1b   : > { %p2506_p7 = pnand %p2504_p5, %p2501_p3 }
  0x1d   : > { %2509 = shalt.err (!%p2506_p7)
}
  0x1e   : > { %s2510_s17 = scalar_lea.vmem %s2814_s15, 6272  ;;  %p2518_p2 = scmp.lt.s32.totalorder %s2814_s15, %s2814_s15 }
  0x1f   : > { %p2511_p9 = scmp.ne.s32.totalorder %s2814_s15, %s2510_s17  ;;  %p2519_p6 = scmp.lt.s32.totalorder %s2510_s17, %s2510_s17 }
  0x21   : > { %p2513_p10 = pnand %p2511_p9, %p2837_p13  ;;  %p2520_p12 = por %p2519_p6, %p2518_p2 }
  0x23   : > { %p2514_p1 = pneg %p2513_p10 }
  0x25   : > { %p2521_p0 = pnand %p2520_p12, %p2514_p1 }
  0x27   : > { %2524 = shalt.err (!%p2521_p0)
}
  0x28   : > { %s2718_s19 = smov 128   ;;  %s2719_s21 = smov 8  }
  0x29   : > { %2421 = dma.hbm_to_vmem [thread:$0]  (!%p2821_p11), %s4461_s1, 6272, %s2814_s15, [#allocation6], %s2718_s19, %s2718_s19, %s2719_s21  }
  0x2a   : > { %s2525_s10 = scalar_lea.hbm %s4463_s3, 3200 }
  0x2b   : > { %p2526_p1 = scmp.ne.s32.totalorder %s4463_s3, %s2525_s10  ;;  %p2532_p10 = scmp.lt.u32.totalorder %s2525_s10, %s4463_s3 }
  0x2d   : > { %p2528_p2 = pnand %p2526_p1, %p2837_p13 }
  0x2f   : > { %p2529_p6 = pneg %p2528_p2 }
  0x31   : > { %p2534_p3 = pnand %p2532_p10, %p2529_p6 }
  0x33   : > { %2537 = shalt.err (!%p2534_p3)
}
  0x34   : > { %s2538_s15 = scalar_lea.vmem %s2825_s18, 3200  ;;  %p2546_p12 = scmp.lt.s32.totalorder %s2825_s18, %s2825_s18 }
  0x35   : > { %p2539_p5 = scmp.ne.s32.totalorder %s2825_s18, %s2538_s15  ;;  %p2547_p0 = scmp.lt.s32.totalorder %s2538_s15, %s2538_s15 }
  0x37   : > { %p2541_p7 = pnand %p2539_p5, %p2837_p13  ;;  %p2548_p1 = por %p2547_p0, %p2546_p12 }
  0x39   : > { %p2542_p9 = pneg %p2541_p7 }
  0x3b   : > { %p2549_p2 = pnand %p2548_p1, %p2542_p9 }
  0x3d   : > { %2552 = shalt.err (!%p2549_p2)
}
  0x3e   : > { %2427 = dma.hbm_to_vmem [thread:$0]  (!%p2821_p11), %s4463_s3, 3200, %s2825_s18, [#allocation9], %s2718_s19, %s2718_s19, %s2719_s21  }
  0x3f   : > { %s2553_s24 = scalar_lea.hbm %s4462_s2, 3200 }
  0x40   : > { %p2554_p6 = scmp.ne.s32.totalorder %s4462_s2, %s2553_s24  ;;  %p2560_p5 = scmp.lt.u32.totalorder %s2553_s24, %s4462_s2 }
  0x42   : > { %p2556_p10 = pnand %p2554_p6, %p2837_p13 }
  0x44   : > { %p2557_p3 = pneg %p2556_p10 }
  0x46   : > { %p2562_p7 = pnand %p2560_p5, %p2557_p3 }
  0x48   : > { %2565 = shalt.err (!%p2562_p7)
}
  0x49   : > { %s2566_s15 = scalar_lea.vmem %s256_s20, 3200  ;;  %p2574_p1 = scmp.lt.s32.totalorder %s256_s20, %s256_s20 }
  0x4a   : > { %p2567_p9 = scmp.ne.s32.totalorder %s256_s20, %s2566_s15  ;;  %p2575_p2 = scmp.lt.s32.totalorder %s2566_s15, %s2566_s15 }
  0x4c   : > { %p2569_p12 = pnand %p2567_p9, %p2837_p13  ;;  %p2576_p4 = por %p2575_p2, %p2574_p1 }
  0x4e   : > { %p2570_p0 = pneg %p2569_p12 }
  0x50   : > { %p2577_p8 = pnand %p2576_p4, %p2570_p0 }
  0x52   : > { %2580 = shalt.err (!%p2577_p8)
}
  0x53   : > { %2424 = dma.hbm_to_vmem [thread:$0]  (!%p2821_p11), %s4462_s2, 3200, %s256_s20, [#allocation6], %s2718_s19, %s2718_s19, %s2719_s21  }
  0x54   : > { %s2720_s12 = smov [#allocation10]   ;;  %s2581_s25 = scalar_lea.hbm %s4464_s4, 1152 }
  0x55   : > { %s281_s22 = sshll.u32 %s2720_s12, 4  ;;  %p2582_p4 = scmp.ne.s32.totalorder %s4464_s4, %s2581_s25  ;;  %s282_s22 = int_to_ptr.vmem [resolvable:$true] %s281_s22 }
  0x56   : > { %p2588_p10 = scmp.lt.u32.totalorder %s2581_s25, %s4464_s4 }
  0x57   : > { %p2584_p8 = pnand %p2582_p4, %p2837_p13 }
  0x59   : > { %p2585_p6 = pneg %p2584_p8 }
  0x5b   : > { %p2590_p3 = pnand %p2588_p10, %p2585_p6 }
  0x5d   : > { %2593 = shalt.err (!%p2590_p3)
}
  0x5e   : > { %s2594_s20 = scalar_lea.vmem %s282_s22, 1152  ;;  %p2602_p12 = scmp.lt.s32.totalorder %s282_s22, %s282_s22 }
  0x5f   : > { %p2595_p5 = scmp.ne.s32.totalorder %s282_s22, %s2594_s20  ;;  %p2603_p0 = scmp.lt.s32.totalorder %s2594_s20, %s2594_s20 }
  0x61   : > { %p2597_p7 = pnand %p2595_p5, %p2837_p13  ;;  %p2604_p1 = por %p2603_p0, %p2602_p12 }
  0x63   : > { %p2598_p9 = pneg %p2597_p7 }
  0x65   : > { %p2605_p2 = pnand %p2604_p1, %p2598_p9 }
  0x67   : > { %2608 = shalt.err (!%p2605_p2)
}
  0x68   : > { %2430 = dma.hbm_to_vmem [thread:$0]  (!%p2821_p11), %s4464_s4, 1152, %s282_s22, [#allocation9], %s2718_s19, %s2718_s19, %s2719_s21  }
  0x69   : > { %s2931_s26 = sadd.s32 1, %s2713_s30   ;;  %s33_s16 = sadd.s32 1, %s2709_s29 }
  0x6a   : > { %s30_s12 = ssub.s32 %s2713_s30, %s2931_s26  ;;  %p40_p13 = scmp.ne.s32.totalorder %s2709_s29, %s2705_s28 }
  0x6b   : > { %p31_p4 = scmp.eq.s32.totalorder %s30_s12, 0  ;;  %p41_p8 = scmp.eq.s32.totalorder %s2713_s30, 0 }
  0x6c   : > { %p4481_p6 = scmp.eq.s32.totalorder %s2791_s9, 1  ;;  %p2443_p3 = scmp.lt.s32.totalorder %s2713_s30, 2 }
  0x6d   : > { %s2947_s24 = scalar_select %p31_p4, %s2709_s29, %s33_s16  }
  0x6e   : > { %p2941_p10 = por %p4481_p6, %p40_p13  ;;  %p42_p5 = por %p41_p8, %p40_p13 }
  0x6f   : > { %s304_s25 = sand.u32 1, %s2709_s29   ;;  %s2396_s22 = sshll.u32 %s2713_s30, 10 }
  0x70   : > { %s2381_s10 = sshll.u32 %s304_s25, 6  ;;  %s2954_s15 = scalar_lea.hbm %s4460_s0, %s2396_s22 }
  0x71   : > { %s308_s20 = scalar_lea.vmem [#allocation2], %s2381_s10  ;;  %p2958_p11 = pnand %p2443_p3, %p42_p5 }
  0x72   : > { %s315_s18 = sshll.u32 %s308_s20, 4  ;;  %s2962_s16 = scalar_lea.sflag [#allocation3], %s304_s25  ;;  %s2956_s18 = int_to_ptr.vmem [resolvable:$true] %s315_s18 }
  0x73   : > { %s2609_s12 = scalar_lea.hbm %s2954_s15, 1024  ;;  %p2611_p9 = pneg %p2958_p11 }
  0x74   : > { %p2610_p7 = scmp.ne.s32.totalorder %s2954_s15, %s2609_s12  ;;  %s2614_s14 = scalar_lea.hbm %s4460_s0, 2048 }
  0x75   : > { %p2615_p1 = scmp.lt.u32.totalorder %s2954_s15, %s4460_s0  ;;  %p2616_p2 = scmp.lt.u32.totalorder %s2614_s14, %s2609_s12 }
  0x76   : > { %p2612_p12 = pnand %p2611_p9, %p2610_p7  ;;  %p2618_p4 = scmp.lt.u32.totalorder %s2609_s12, %s2954_s15 }
  0x77   : > { %p2617_p13 = por %p2616_p2, %p2615_p1 }
  0x78   : > { %p2613_p0 = pneg %p2612_p12 }
  0x79   : > { %p2619_p8 = por %p2618_p4, %p2617_p13 }
  0x7b   : > { %p2620_p6 = pnand %p2619_p8, %p2613_p0 }
  0x7d   : > { %2623 = shalt.err (!%p2620_p6)
}
  0x7e   : > { %s2624_s25 = scalar_lea.vmem %s2956_s18, 1024  ;;  %s2721_s10 = smov [#allocation2]  }
  0x7f   : > { %p2625_p3 = scmp.ne.s32.totalorder %s2956_s18, %s2624_s25  ;;  %s2629_s22 = sshll.u32 %s2721_s10, 4  ;;  %s2630_s22 = int_to_ptr.vmem [resolvable:$false] %s2629_s22 }
  0x80   : > { %s2631_s17 = scalar_lea.vmem %s2630_s22, 2048  ;;  %p2632_p12 = scmp.lt.s32.totalorder %s2956_s18, %s2630_s22 }
  0x81   : > { %p2627_p5 = pnand %p2625_p3, %p2611_p9  ;;  %p2633_p1 = scmp.lt.s32.totalorder %s2631_s17, %s2624_s25 }
  0x83   : > { %p2628_p7 = pneg %p2627_p5  ;;  %p2634_p2 = por %p2633_p1, %p2632_p12 }
  0x85   : > { %p2635_p13 = pnand %p2634_p2, %p2628_p7 }
  0x87   : > { %2638 = shalt.err (!%p2635_p13)
}
  0x88   : > { %2434 = dma.hbm_to_vmem [thread:$0]  (!%p2958_p11), %s2954_s15, 1024, %s2956_s18, %s2962_s16, %s2718_s19, %s2718_s19, %s2719_s21  }
  0x89   : > { %p4484_p9 = scmp.ne.s32.totalorder %s4478_s13, 0 }
  0x8a   : > { %s2996_s12 = sand.u32 (!%p4484_p9), 1, %s2705_s28   ;;  %p4485_p0 = scmp.ne.s32.totalorder (!%p4484_p9), %s4475_s11, 0 }
  0x8b   : > { %327 = sbr.rel (%p4484_p9) target bundleno = 583 (0x247), region = 52  ;;  %s2385_s14 = sshll.u32 (!%p4484_p9), %s2996_s12, 6 }
  0x8c   : > { %s330_s20 = scalar_lea.sflag (!%p4484_p9), [#allocation3], %s2996_s12  ;;  %s3002_s27 = scalar_lea.vmem (!%p4484_p9), [#allocation2], %s2385_s14 }
  0x92   : > { %2684 = dma.done.wait (%p4485_p0), %s330_s20, 1024  }
  0x93   : > { %2686 = vsyncadd (%p4485_p0), %s330_s20, 4294966272  ;;  %p4486_p11 = scmp.eq.s32.totalorder %s2791_s9, 0 }
  0x95   : > { %2688 = dma.done.wait (%p4486_p11), [#allocation6], 9472   ;;  %p4487_p4 = pmov %p4486_p11 }
  0x97   : > { %2690 = vsyncadd (%p4487_p4), [#allocation6], 4294957824  ;;  %p4488_p8 = pmov %p4487_p4 }
  0x98   : > { %p4489_p6 = pmov %p4487_p4 }
  0x99   : > { %2692 = dma.done.wait (%p4488_p8), [#allocation9], 4352  }
  0x9a   : > { %2694 = vsyncadd (%p4489_p6), [#allocation9], 4294962944  ;;  %v398_v0 = vlaneseq  ;;  %v3019_v2 = vld [vmem:[%s3002_s27] sm:$0xff]  ;;  %v3022_v3 = vld [vmem:[%s3002_s27 + $0x8] sm:$0xff]  ;;  %s2397_s16 = sshll.u32 %s2791_s9, 10  ;;  %s381_s25 = scalar_lea.vmem [#allocation11], %s2385_s14 }
  0x9b   : > { %v3025_v4 = vld [vmem:[%s3002_s27 + $0x10] sm:$0xff]  ;;  %v3029_v5 = vld [vmem:[%s3002_s27 + $0x18] sm:$0xff]  ;;  %v3032_v6 = vld [vmem:[%s3002_s27 + $0x20] sm:$0xff]  ;;  %v390_v8 = vrot.slane %v3019_v2, 5  ;;  %v391_v9 = vrot.slane %v3022_v3, 5  ;;  %s2263_s10 = sshll.u32 %s381_s25, 4  ;;  %s4414_s9 = scalar_lea.hbm %s4468_s8, %s2397_s16  ;;  %s4416_s10 = int_to_ptr.vmem [resolvable:$true] %s2263_s10 }
  0x9c   : > { %v3016_v1 = vshrl.u32 %v398_v0, 7  ;;  %v3035_v7 = vld [vmem:[%s3002_s27 + $0x28] sm:$0xff]  ;;  %v392_v10 = vrot.slane %v3025_v4, 5  ;;  %v3041_v11 = vld [vmem:[%s3002_s27 + $0x30] sm:$0xff]  ;;  %v3044_v12 = vld [vmem:[%s3002_s27 + $0x38] sm:$0xff]  ;;  %v393_v13 = vrot.slane %v3029_v5, 5 }
  0x9d   : > { %v394_v14 = vrot.slane %v3032_v6, 5  ;;  %v395_v15 = vrot.slane %v3035_v7, 5  ;;  %v409_v16 = vld [vmem:[#allocation5] sm:$0xff]  ;;  %v396_v17 = vrot.slane %v3041_v11, 5  ;;  %v397_v18 = vrot.slane %v3044_v12, 5  ;;  %v416_v25 = vld [vmem:[#allocation5 + $0x38] sm:$0xff] }
  0x9e   : > { %vm400_vm0 = vcmp.lt.s32.totalorder %v3016_v1, 3  ;;  %v429_v30 = vld [vmem:[#allocation5 + $0x70] sm:$0xff]  ;;  %v444_v51 = vld [vmem:[#allocation5 + $0xa8] sm:$0xff]  ;;  %vm510_vm1 = vcmp.lt.s32.totalorder %v3016_v1, 2  ;;  %vm698_vm2 = vcmp.lt.s32.totalorder %v3016_v1, 1  ;;  %vm1075_vm3 = vcmp.lt.s32.totalorder %v3016_v1, 7 }
  0x9f   : > { %v3053_v19 = vsel %vm400_vm0, %v391_v9, %v392_v10  ;;  %v407_v20 = vsel %vm400_vm0, %v390_v8, %v391_v9  ;;  %v3059_v21 = vsel %vm400_vm0, %v394_v14, %v395_v15  ;;  %v3063_v22 = vsel %vm400_vm0, %v393_v13, %v394_v14  ;;  %s2250_s14 = scalar_lea.sflag [#allocation4], %s2996_s12  ;;  %s2639_s20 = scalar_lea.vmem %s4416_s10, 1024 }
  0xa0   : > { %v3067_v23 = vsel %vm400_vm0, %v392_v10, %v393_v13  ;;  %v411_v24 = vmul.f32 %v409_v16, %v407_v20  ;;  %v3071_v26 = vsel %vm400_vm0, %v396_v17, %v397_v18  ;;  %v3075_v27 = vsel %vm400_vm0, %v395_v15, %v396_v17  ;;  %v461_v13 = vld [vmem:[#allocation5 + $0xe0] sm:$0xff]  ;;  %p2640_p3 = scmp.ne.s32.totalorder %s4416_s10, %s2639_s20 }
  0xa1   : > { %v408_v28 = vsel %vm400_vm0, %v397_v18, %v390_v8  ;;  %v412_v29 = vmul.f32 %v409_v16, %v3053_v19  ;;  %v413_v32 = vmul.f32 %v409_v16, %v3067_v23  ;;  %v414_v33 = vmul.f32 %v409_v16, %v3063_v22 }
  0xa2   : > { %v410_v31 = vmul.f32 %v409_v16, %v408_v28  ;;  %v417_v34 = vmul.f32 %v416_v25, %v408_v28  ;;  %v418_v35 = vmul.f32 %v416_v25, %v407_v20  ;;  %v420_v36 = vmul.f32 %v416_v25, %v3053_v19  ;;  %p2641_p5 = pnand %p2640_p3, %p2941_p10 }
  0xa3   : > { %v422_v37 = vmul.f32 %v416_v25, %v3067_v23  ;;  %v424_v38 = vmul.f32 %v416_v25, %v3063_v22  ;;  %v426_v39 = vmul.f32 %v416_v25, %v3059_v21  ;;  %v430_v40 = vmul.f32 %v429_v30, %v408_v28 }
  0xa4   : > { %v431_v41 = vmul.f32 %v429_v30, %v407_v20  ;;  %v433_v42 = vmul.f32 %v429_v30, %v3053_v19  ;;  %v419_v43 = vadd.f32 %v418_v35, %v410_v31  ;;  %v421_v44 = vadd.f32 %v420_v36, %v411_v24  ;;  %p2642_p7 = pneg %p2641_p5 }
  0xa5   : > { %v423_v45 = vadd.f32 %v422_v37, %v412_v29  ;;  %v425_v46 = vadd.f32 %v424_v38, %v413_v32  ;;  %v427_v47 = vadd.f32 %v426_v39, %v414_v33  ;;  %v435_v49 = vmul.f32 %v429_v30, %v3067_v23  ;;  %v477_v33 = vld [vmem:[#allocation5 + $0x118] sm:$0xff] }
  0xa6   : > { %v432_v48 = vadd.f32 %v431_v41, %v417_v34  ;;  %v437_v50 = vmul.f32 %v429_v30, %v3063_v22  ;;  %v434_v52 = vadd.f32 %v433_v42, %v419_v43  ;;  %v439_v53 = vmul.f32 %v429_v30, %v3059_v21 }
  0xa7   : > { %v441_v54 = vmul.f32 %v429_v30, %v3075_v27  ;;  %v445_v55 = vmul.f32 %v444_v51, %v408_v28  ;;  %v436_v56 = vadd.f32 %v435_v49, %v421_v44  ;;  %v446_v58 = vmul.f32 %v444_v51, %v407_v20 }
  0xa8   : > { %v438_v57 = vadd.f32 %v437_v50, %v423_v45  ;;  %v448_v59 = vmul.f32 %v444_v51, %v3053_v19  ;;  %v440_v60 = vadd.f32 %v439_v53, %v425_v46  ;;  %v450_v62 = vmul.f32 %v444_v51, %v3067_v23  ;;  %v491_v45 = vld [vmem:[#allocation5 + $0x150] sm:$0xff] }
  0xa9   : > { %v442_v61 = vadd.f32 %v441_v54, %v427_v47  ;;  %v452_v63 = vmul.f32 %v444_v51, %v3063_v22  ;;  %v447_v0 = vadd.f32 %v446_v58, %v430_v40  ;;  %v454_v9 = vmul.f32 %v444_v51, %v3059_v21 }
  0xaa   : > { %v449_v8 = vadd.f32 %v448_v59, %v432_v48  ;;  %v456_v10 = vmul.f32 %v444_v51, %v3075_v27  ;;  %v451_v14 = vadd.f32 %v450_v62, %v434_v52  ;;  %v458_v16 = vmul.f32 %v444_v51, %v3071_v26 }
  0xab   : > { %v453_v15 = vadd.f32 %v452_v63, %v436_v56  ;;  %v462_v17 = vmul.f32 %v461_v13, %v407_v20  ;;  %v455_v18 = vadd.f32 %v454_v9, %v438_v57  ;;  %v464_v25 = vmul.f32 %v461_v13, %v3053_v19 }
  0xac   : > { %v457_v24 = vadd.f32 %v456_v10, %v440_v60  ;;  %v466_v28 = vmul.f32 %v461_v13, %v3067_v23  ;;  %v3100_v29 = vadd.f32 %v458_v16, %v442_v61  ;;  %v468_v31 = vmul.f32 %v461_v13, %v3063_v22 }
  0xad   : > { %v463_v30 = vadd.f32 %v462_v17, %v445_v55  ;;  %v470_v32 = vmul.f32 %v461_v13, %v3059_v21  ;;  %v465_v34 = vadd.f32 %v464_v25, %v447_v0  ;;  %v472_v20 = vmul.f32 %v461_v13, %v3075_v27 }
  0xae   : > { %v467_v35 = vadd.f32 %v466_v28, %v449_v8  ;;  %v474_v36 = vmul.f32 %v461_v13, %v3071_v26  ;;  %v469_v37 = vadd.f32 %v468_v31, %v451_v14  ;;  %v478_v39 = vmul.f32 %v477_v33, %v3053_v19 }
  0xaf   : > { %v471_v38 = vadd.f32 %v470_v32, %v453_v15  ;;  %v480_v40 = vmul.f32 %v477_v33, %v3067_v23  ;;  %v473_v41 = vadd.f32 %v472_v20, %v455_v18  ;;  %v482_v43 = vmul.f32 %v477_v33, %v3063_v22  ;;  %v532_v18 = vld [vmem:[#allocation5 + $0x40] sm:$0xff] }
  0xb0   : > { %v475_v42 = vadd.f32 %v474_v36, %v457_v24  ;;  %v484_v44 = vmul.f32 %v477_v33, %v3059_v21  ;;  %v479_v46 = vadd.f32 %v478_v39, %v463_v30  ;;  %v486_v48 = vmul.f32 %v477_v33, %v3075_v27 }
  0xb1   : > { %v481_v47 = vadd.f32 %v480_v40, %v465_v34  ;;  %v488_v49 = vmul.f32 %v477_v33, %v3071_v26  ;;  %v483_v50 = vadd.f32 %v482_v43, %v467_v35  ;;  %v492_v52 = vmul.f32 %v491_v45, %v3067_v23  ;;  %v546_v43 = vld [vmem:[#allocation5 + $0x78] sm:$0xff] }
  0xb2   : > { %v485_v51 = vadd.f32 %v484_v44, %v469_v37  ;;  %v494_v19 = vmul.f32 %v491_v45, %v3063_v22  ;;  %v487_v53 = vadd.f32 %v486_v48, %v471_v38  ;;  %v496_v55 = vmul.f32 %v491_v45, %v3059_v21  ;;  %v520_v22 = vld [vmem:[#allocation5 + $0x8] sm:$0xff] }
  0xb3   : > { %v489_v54 = vadd.f32 %v488_v49, %v473_v41  ;;  %v498_v56 = vmul.f32 %v491_v45, %v3075_v27  ;;  %v3116_v57 = vadd.f32 %v492_v52, %v479_v46  ;;  %v500_v59 = vmul.f32 %v491_v45, %v3071_v26 }
  0xb4   : > { %v495_v58 = vadd.f32 %v494_v19, %v481_v47  ;;  %v502_v60 = vrot.slane %v3019_v2, 6  ;;  %v497_v61 = vadd.f32 %v496_v55, %v483_v50  ;;  %v503_v63 = vrot.slane %v3022_v3, 6 }
  0xb5   : > { %v499_v62 = vadd.f32 %v498_v56, %v485_v51  ;;  %v504_v23 = vrot.slane %v3025_v4, 6  ;;  %v501_v0 = vadd.f32 %v500_v59, %v487_v53  ;;  %v505_v8 = vrot.slane %v3029_v5, 6  ;;  %v562_v59 = vld [vmem:[#allocation5 + $0xb0] sm:$0xff] }
  0xb6   : > { %v506_v21 = vrot.slane %v3032_v6, 6  ;;  %v507_v27 = vrot.slane %v3035_v7, 6  ;;  %v508_v9 = vrot.slane %v3041_v11, 6  ;;  %v509_v26 = vrot.slane %v3044_v12, 6 }
  0xb7   : > { %v3129_v10 = vsel %vm510_vm1, %v503_v63, %v504_v23  ;;  %v3133_v13 = vsel %vm510_vm1, %v502_v60, %v503_v63  ;;  %v3145_v16 = vsel %vm510_vm1, %v504_v23, %v505_v8  ;;  %vm1272_vm4 = vcmp.lt.s32.totalorder %v3016_v1, 6 }
  0xb8   : > { %v3137_v14 = vsel %vm510_vm1, %v506_v21, %v507_v27  ;;  %v3141_v15 = vsel %vm510_vm1, %v505_v8, %v506_v21  ;;  %v523_v17 = vmul.f32 %v520_v22, %v3133_v13  ;;  %v3150_v24 = vsel %vm510_vm1, %v508_v9, %v509_v26 }
  0xb9   : > { %v3154_v25 = vsel %vm510_vm1, %v507_v27, %v508_v9  ;;  %v3158_v28 = vsel %vm510_vm1, %v509_v26, %v502_v60  ;;  %v525_v30 = vmul.f32 %v520_v22, %v3129_v10  ;;  %v527_v33 = vmul.f32 %v520_v22, %v3145_v16 }
  0xba   : > { %v521_v31 = vmul.f32 %v520_v22, %v3158_v28  ;;  %v524_v32 = vadd.f32 %v523_v17, %v501_v0  ;;  %v529_v34 = vmul.f32 %v520_v22, %v3141_v15  ;;  %v533_v20 = vmul.f32 %v532_v18, %v3158_v28 }
  0xbb   : > { %v526_v35 = vadd.f32 %v525_v30, %v489_v54  ;;  %v535_v36 = vmul.f32 %v532_v18, %v3133_v13  ;;  %v537_v37 = vmul.f32 %v532_v18, %v3129_v10  ;;  %v528_v39 = vadd.f32 %v527_v33, %v475_v42 }
  0xbc   : > { %v522_v38 = vadd.f32 %v521_v31, %v499_v62  ;;  %v530_v40 = vadd.f32 %v529_v34, %v3100_v29  ;;  %v539_v41 = vmul.f32 %v532_v18, %v3145_v16  ;;  %v534_v44 = vadd.f32 %v533_v20, %v497_v61  ;;  %v580_v31 = vld [vmem:[#allocation5 + $0xe8] sm:$0xff] }
  0xbd   : > { %v538_v45 = vadd.f32 %v537_v37, %v524_v32  ;;  %v541_v46 = vmul.f32 %v532_v18, %v3141_v15  ;;  %v543_v47 = vmul.f32 %v532_v18, %v3137_v14  ;;  %v547_v50 = vmul.f32 %v546_v43, %v3158_v28 }
  0xbe   : > { %v536_v48 = vadd.f32 %v535_v36, %v522_v38  ;;  %v540_v49 = vadd.f32 %v539_v41, %v526_v35  ;;  %v549_v51 = vmul.f32 %v546_v43, %v3133_v13  ;;  %v551_v42 = vmul.f32 %v546_v43, %v3129_v10 }
  0xbf   : > { %v542_v52 = vadd.f32 %v541_v46, %v528_v39  ;;  %v544_v19 = vadd.f32 %v543_v47, %v530_v40  ;;  %v553_v29 = vmul.f32 %v546_v43, %v3145_v16  ;;  %v548_v53 = vadd.f32 %v547_v50, %v495_v58 }
  0xc0   : > { %v550_v54 = vadd.f32 %v549_v51, %v534_v44  ;;  %v555_v55 = vmul.f32 %v546_v43, %v3141_v15  ;;  %v557_v56 = vmul.f32 %v546_v43, %v3137_v14  ;;  %v552_v60 = vadd.f32 %v551_v42, %v536_v48 }
  0xc1   : > { %v554_v61 = vadd.f32 %v553_v29, %v538_v45  ;;  %v559_v62 = vmul.f32 %v546_v43, %v3154_v25  ;;  %v563_v63 = vmul.f32 %v562_v59, %v3158_v28  ;;  %v565_v0 = vmul.f32 %v562_v59, %v3133_v13  ;;  %v596_v43 = vld [vmem:[#allocation5 + $0x120] sm:$0xff] }
  0xc2   : > { %v556_v23 = vadd.f32 %v555_v55, %v540_v49  ;;  %v558_v22 = vadd.f32 %v557_v56, %v542_v52  ;;  %v567_v8 = vmul.f32 %v562_v59, %v3129_v10  ;;  %v569_v27 = vmul.f32 %v562_v59, %v3145_v16 }
  0xc3   : > { %v560_v21 = vadd.f32 %v559_v62, %v544_v19  ;;  %v564_v58 = vadd.f32 %v563_v63, %v3116_v57  ;;  %v571_v9 = vmul.f32 %v562_v59, %v3141_v15  ;;  %v566_v26 = vadd.f32 %v565_v0, %v548_v53  ;;  %v610_v53 = vld [vmem:[#allocation5 + $0x158] sm:$0xff] }
  0xc4   : > { %v568_v17 = vadd.f32 %v567_v8, %v550_v54  ;;  %v573_v18 = vmul.f32 %v562_v59, %v3137_v14  ;;  %v575_v30 = vmul.f32 %v562_v59, %v3154_v25  ;;  %v570_v32 = vadd.f32 %v569_v27, %v552_v60  ;;  %v621_v60 = vld [vmem:[#allocation7] sm:$0xff] }
  0xc5   : > { %v572_v33 = vadd.f32 %v571_v9, %v554_v61  ;;  %v577_v34 = vmul.f32 %v562_v59, %v3150_v24  ;;  %v581_v35 = vmul.f32 %v580_v31, %v3133_v13  ;;  %v583_v57 = vmul.f32 %v580_v31, %v3129_v10 }
  0xc6   : > { %v574_v20 = vadd.f32 %v573_v18, %v556_v23  ;;  %v576_v36 = vadd.f32 %v575_v30, %v558_v22  ;;  %v585_v37 = vmul.f32 %v580_v31, %v3145_v16  ;;  %v587_v40 = vmul.f32 %v580_v31, %v3141_v15 }
  0xc7   : > { %v3190_v38 = vadd.f32 %v577_v34, %v560_v21  ;;  %v582_v39 = vadd.f32 %v581_v35, %v564_v58  ;;  %v589_v41 = vmul.f32 %v580_v31, %v3137_v14  ;;  %v584_v44 = vadd.f32 %v583_v57, %v566_v26 }
  0xc8   : > { %v586_v45 = vadd.f32 %v585_v37, %v568_v17  ;;  %v591_v46 = vmul.f32 %v580_v31, %v3154_v25  ;;  %v593_v47 = vmul.f32 %v580_v31, %v3150_v24  ;;  %v588_v48 = vadd.f32 %v587_v40, %v570_v32  ;;  %v629_v17 = vld [vmem:[#allocation7 + $0x28] sm:$0xff]  ;;  %v644_v40 = vld [vmem:[#allocation7 + $0x50] sm:$0xff] }
  0xc9   : > { %v590_v49 = vadd.f32 %v589_v41, %v572_v33  ;;  %v597_v50 = vmul.f32 %v596_v43, %v3129_v10  ;;  %v599_v51 = vmul.f32 %v596_v43, %v3145_v16  ;;  %v601_v42 = vmul.f32 %v596_v43, %v3141_v15 }
  0xca   : > { %v592_v52 = vadd.f32 %v591_v46, %v574_v20  ;;  %v3198_v19 = vadd.f32 %v593_v47, %v576_v36  ;;  %v603_v29 = vmul.f32 %v596_v43, %v3137_v14  ;;  %v605_v56 = vmul.f32 %v596_v43, %v3154_v25 }
  0xcb   : > { %v598_v54 = vadd.f32 %v597_v50, %v582_v39  ;;  %v600_v55 = vadd.f32 %v599_v51, %v584_v44  ;;  %v607_v59 = vmul.f32 %v596_v43, %v3150_v24  ;;  %v602_v61 = vadd.f32 %v601_v42, %v586_v45 }
  0xcc   : > { %v604_v62 = vadd.f32 %v603_v29, %v588_v48  ;;  %v611_v63 = vmul.f32 %v610_v53, %v3145_v16  ;;  %v613_v23 = vmul.f32 %v610_v53, %v3141_v15  ;;  %v606_v22 = vadd.f32 %v605_v56, %v590_v49  ;;  %v661_v56 = vld [vmem:[#allocation7 + $0x78] sm:$0xff] }
  0xcd   : > { %v3206_v0 = vadd.f32 %v607_v59, %v592_v52  ;;  %v615_v8 = vmul.f32 %v610_v53, %v3137_v14  ;;  %v617_v21 = vmul.f32 %v610_v53, %v3154_v25  ;;  %v619_v9 = vmul.f32 %v610_v53, %v3150_v24 }
  0xce   : > { %v3210_v58 = vadd.f32 %v611_v63, %v598_v54  ;;  %v3212_v27 = vadd.f32 %v613_v23, %v600_v55  ;;  %v622_v26 = vmul.f32 %v621_v60, %v3158_v28  ;;  %v623_v31 = vmul.f32 %v621_v60, %v3133_v13 }
  0xcf   : > { %v3216_v18 = vadd.f32 %v615_v8, %v602_v61  ;;  %v3218_v30 = vadd.f32 %v617_v21, %v604_v62  ;;  %v624_v32 = vmul.f32 %v621_v60, %v3129_v10  ;;  %v3222_v33 = vadd.f32 %v619_v9, %v606_v22 }
  0xd0   : > { %v625_v34 = vmul.f32 %v621_v60, %v3145_v16  ;;  %v626_v35 = vmul.f32 %v621_v60, %v3141_v15  ;;  %v627_v20 = vmul.f32 %v621_v60, %v3137_v14  ;;  %v630_v36 = vmul.f32 %v629_v17, %v3158_v28 }
  0xd1   : > { %v631_v57 = vmul.f32 %v629_v17, %v3133_v13  ;;  %v633_v37 = vmul.f32 %v629_v17, %v3129_v10  ;;  %v635_v39 = vmul.f32 %v629_v17, %v3145_v16  ;;  %v637_v41 = vmul.f32 %v629_v17, %v3141_v15 }
  0xd2   : > { %v639_v43 = vmul.f32 %v629_v17, %v3137_v14  ;;  %v641_v44 = vmul.f32 %v629_v17, %v3154_v25  ;;  %v645_v45 = vmul.f32 %v644_v40, %v3158_v28  ;;  %v646_v49 = vmul.f32 %v644_v40, %v3133_v13  ;;  %v677_v17 = vld [vmem:[#allocation7 + $0xa0] sm:$0xff] }
  0xd3   : > { %v632_v46 = vadd.f32 %v631_v57, %v622_v26  ;;  %v634_v47 = vadd.f32 %v633_v37, %v623_v31  ;;  %v636_v48 = vadd.f32 %v635_v39, %v624_v32  ;;  %v638_v50 = vadd.f32 %v637_v41, %v625_v34 }
  0xd4   : > { %v640_v51 = vadd.f32 %v639_v43, %v626_v35  ;;  %v642_v52 = vadd.f32 %v641_v44, %v627_v20  ;;  %v648_v42 = vmul.f32 %v644_v40, %v3129_v10  ;;  %v647_v29 = vadd.f32 %v646_v49, %v630_v36 }
  0xd5   : > { %v650_v53 = vmul.f32 %v644_v40, %v3145_v16  ;;  %v652_v54 = vmul.f32 %v644_v40, %v3141_v15  ;;  %v654_v55 = vmul.f32 %v644_v40, %v3137_v14  ;;  %v656_v28 = vmul.f32 %v644_v40, %v3154_v25 }
  0xd6   : > { %v649_v59 = vadd.f32 %v648_v42, %v632_v46  ;;  %v658_v60 = vmul.f32 %v644_v40, %v3150_v24  ;;  %v662_v61 = vmul.f32 %v661_v56, %v3133_v13  ;;  %v664_v22 = vmul.f32 %v661_v56, %v3129_v10 }
  0xd7   : > { %v651_v62 = vadd.f32 %v650_v53, %v634_v47  ;;  %v653_v63 = vadd.f32 %v652_v54, %v636_v48  ;;  %v655_v23 = vadd.f32 %v654_v55, %v638_v50  ;;  %v657_v8 = vadd.f32 %v656_v28, %v640_v51 }
  0xd8   : > { %v3245_v21 = vadd.f32 %v658_v60, %v642_v52  ;;  %v663_v9 = vadd.f32 %v662_v61, %v645_v45  ;;  %v666_v26 = vmul.f32 %v661_v56, %v3145_v16  ;;  %v665_v31 = vadd.f32 %v664_v22, %v647_v29  ;;  %v708_v29 = vld [vmem:[#allocation5 + $0x10] sm:$0xff]  ;;  %v720_v60 = vld [vmem:[#allocation5 + $0x48] sm:$0xff] }
  0xd9   : > { %v668_v32 = vmul.f32 %v661_v56, %v3141_v15  ;;  %v670_v34 = vmul.f32 %v661_v56, %v3137_v14  ;;  %v672_v13 = vmul.f32 %v661_v56, %v3154_v25  ;;  %v674_v20 = vmul.f32 %v661_v56, %v3150_v24 }
  0xda   : > { %v667_v35 = vadd.f32 %v666_v26, %v649_v59  ;;  %v678_v36 = vmul.f32 %v677_v17, %v3129_v10  ;;  %v680_v57 = vmul.f32 %v677_v17, %v3145_v16  ;;  %v682_v41 = vmul.f32 %v677_v17, %v3141_v15 }
  0xdb   : > { %v669_v37 = vadd.f32 %v668_v32, %v651_v62  ;;  %v671_v39 = vadd.f32 %v670_v34, %v653_v63  ;;  %v673_v40 = vadd.f32 %v672_v13, %v655_v23  ;;  %v3255_v43 = vadd.f32 %v674_v20, %v657_v8 }
  0xdc   : > { %v3257_v44 = vadd.f32 %v678_v36, %v663_v9  ;;  %v3259_v45 = vadd.f32 %v680_v57, %v665_v31  ;;  %v684_v46 = vmul.f32 %v677_v17, %v3137_v14  ;;  %v3262_v47 = vadd.f32 %v682_v41, %v667_v35  ;;  %v734_v36 = vld [vmem:[#allocation5 + $0x80] sm:$0xff] }
  0xdd   : > { %v686_v48 = vmul.f32 %v677_v17, %v3154_v25  ;;  %v688_v10 = vmul.f32 %v677_v17, %v3150_v24  ;;  %v690_v16 = vrot.slane %v3019_v2, 7  ;;  %v691_v15 = vrot.slane %v3022_v3, 7 }
  0xde   : > { %v3267_v49 = vadd.f32 %v684_v46, %v669_v37  ;;  %v692_v50 = vrot.slane %v3025_v4, 7  ;;  %v693_v51 = vrot.slane %v3029_v5, 7  ;;  %v694_v14 = vrot.slane %v3032_v6, 7 }
  0xdf   : > { %v3272_v52 = vadd.f32 %v686_v48, %v671_v39  ;;  %v3274_v42 = vadd.f32 %v688_v10, %v673_v40  ;;  %v695_v25 = vrot.slane %v3035_v7, 7  ;;  %v696_v24 = vrot.slane %v3041_v11, 7 }
  0xe0   : > { %v697_v53 = vrot.slane %v3044_v12, 7  ;;  %v3282_v54 = vsel %vm698_vm2, %v692_v50, %v693_v51  ;;  %v3286_v55 = vsel %vm698_vm2, %v691_v15, %v692_v50  ;;  %v3294_v59 = vsel %vm698_vm2, %v693_v51, %v694_v14  ;;  %v750_v51 = vld [vmem:[#allocation5 + $0xb8] sm:$0xff] }
  0xe1   : > { %v3290_v56 = vsel %vm698_vm2, %v694_v14, %v695_v25  ;;  %v3298_v28 = vsel %vm698_vm2, %v690_v16, %v691_v15  ;;  %v713_v12 = vmul.f32 %v708_v29, %v3286_v55  ;;  %v3307_v62 = vsel %vm698_vm2, %v695_v25, %v696_v24 }
  0xe2   : > { %v3303_v61 = vsel %vm698_vm2, %v696_v24, %v697_v53  ;;  %v3311_v63 = vsel %vm698_vm2, %v697_v53, %v690_v16  ;;  %v711_v23 = vmul.f32 %v708_v29, %v3298_v28  ;;  %v715_v9 = vmul.f32 %v708_v29, %v3282_v54 }
  0xe3   : > { %v709_v22 = vmul.f32 %v708_v29, %v3311_v63  ;;  %v714_v8 = vadd.f32 %v713_v12, %v3206_v0  ;;  %v717_v26 = vmul.f32 %v708_v29, %v3294_v59  ;;  %v721_v31 = vmul.f32 %v720_v60, %v3311_v63 }
  0xe4   : > { %v712_v17 = vadd.f32 %v711_v23, %v3222_v33  ;;  %v723_v32 = vmul.f32 %v720_v60, %v3298_v28  ;;  %v725_v34 = vmul.f32 %v720_v60, %v3286_v55  ;;  %v716_v35 = vadd.f32 %v715_v9, %v3198_v19 }
  0xe5   : > { %v710_v13 = vadd.f32 %v709_v22, %v3218_v30  ;;  %v718_v20 = vadd.f32 %v717_v26, %v3190_v38  ;;  %v727_v0 = vmul.f32 %v720_v60, %v3282_v54  ;;  %v722_v57 = vadd.f32 %v721_v31, %v3216_v18 }
  0xe6   : > { %v726_v37 = vadd.f32 %v725_v34, %v712_v17  ;;  %v729_v33 = vmul.f32 %v720_v60, %v3294_v59  ;;  %v731_v39 = vmul.f32 %v720_v60, %v3290_v56  ;;  %v735_v46 = vmul.f32 %v734_v36, %v3311_v63  ;;  %v768_v34 = vld [vmem:[#allocation5 + $0xf0] sm:$0xff] }
  0xe7   : > { %v724_v40 = vadd.f32 %v723_v32, %v710_v13  ;;  %v728_v41 = vadd.f32 %v727_v0, %v714_v8  ;;  %v737_v30 = vmul.f32 %v734_v36, %v3298_v28  ;;  %v739_v38 = vmul.f32 %v734_v36, %v3286_v55 }
  0xe8   : > { %v730_v48 = vadd.f32 %v729_v33, %v716_v35  ;;  %v732_v19 = vadd.f32 %v731_v39, %v718_v20  ;;  %v741_v10 = vmul.f32 %v734_v36, %v3282_v54  ;;  %v736_v16 = vadd.f32 %v735_v46, %v3212_v27  ;;  %v784_v46 = vld [vmem:[#allocation5 + $0x128] sm:$0xff] }
  0xe9   : > { %v738_v18 = vadd.f32 %v737_v30, %v722_v57  ;;  %v743_v15 = vmul.f32 %v734_v36, %v3294_v59  ;;  %v745_v50 = vmul.f32 %v734_v36, %v3290_v56  ;;  %v740_v14 = vadd.f32 %v739_v38, %v724_v40 }
  0xea   : > { %v742_v25 = vadd.f32 %v741_v10, %v726_v37  ;;  %v747_v29 = vmul.f32 %v734_v36, %v3307_v62  ;;  %v751_v24 = vmul.f32 %v750_v51, %v3311_v63  ;;  %v753_v60 = vmul.f32 %v750_v51, %v3298_v28 }
  0xeb   : > { %v744_v53 = vadd.f32 %v743_v15, %v728_v41  ;;  %v746_v12 = vadd.f32 %v745_v50, %v730_v48  ;;  %v755_v23 = vmul.f32 %v750_v51, %v3286_v55  ;;  %v757_v8 = vmul.f32 %v750_v51, %v3282_v54 }
  0xec   : > { %v748_v22 = vadd.f32 %v747_v29, %v732_v19  ;;  %v752_v27 = vadd.f32 %v751_v24, %v3210_v58  ;;  %v759_v9 = vmul.f32 %v750_v51, %v3294_v59  ;;  %v754_v26 = vadd.f32 %v753_v60, %v736_v16  ;;  %v798_v29 = vld [vmem:[#allocation5 + $0x160] sm:$0xff] }
  0xed   : > { %v756_v17 = vadd.f32 %v755_v23, %v738_v18  ;;  %v761_v31 = vmul.f32 %v750_v51, %v3290_v56  ;;  %v763_v32 = vmul.f32 %v750_v51, %v3307_v62  ;;  %v758_v13 = vadd.f32 %v757_v8, %v740_v14  ;;  %v810_v23 = vld [vmem:[#allocation7 + $0x8] sm:$0xff] }
  0xee   : > { %v760_v35 = vadd.f32 %v759_v9, %v742_v25  ;;  %v765_v20 = vmul.f32 %v750_v51, %v3303_v61  ;;  %v769_v0 = vmul.f32 %v768_v34, %v3298_v28  ;;  %v771_v58 = vmul.f32 %v768_v34, %v3286_v55 }
  0xef   : > { %v762_v36 = vadd.f32 %v761_v31, %v744_v53  ;;  %v764_v57 = vadd.f32 %v763_v32, %v746_v12  ;;  %v773_v37 = vmul.f32 %v768_v34, %v3282_v54  ;;  %v775_v40 = vmul.f32 %v768_v34, %v3294_v59 }
  0xf0   : > { %v3349_v33 = vadd.f32 %v765_v20, %v748_v22  ;;  %v770_v39 = vadd.f32 %v769_v0, %v752_v27  ;;  %v777_v41 = vmul.f32 %v768_v34, %v3290_v56  ;;  %v772_v30 = vadd.f32 %v771_v58, %v754_v26 }
  0xf1   : > { %v774_v48 = vadd.f32 %v773_v37, %v756_v17  ;;  %v779_v19 = vmul.f32 %v768_v34, %v3307_v62  ;;  %v781_v38 = vmul.f32 %v768_v34, %v3303_v61  ;;  %v776_v10 = vadd.f32 %v775_v40, %v758_v13  ;;  %v824_v37 = vld [vmem:[#allocation7 + $0x30] sm:$0xff] }
  0xf2   : > { %v778_v16 = vadd.f32 %v777_v41, %v760_v35  ;;  %v785_v18 = vmul.f32 %v784_v46, %v3286_v55  ;;  %v787_v15 = vmul.f32 %v784_v46, %v3282_v54  ;;  %v789_v14 = vmul.f32 %v784_v46, %v3294_v59 }
  0xf3   : > { %v780_v50 = vadd.f32 %v779_v19, %v762_v36  ;;  %v3357_v51 = vadd.f32 %v781_v38, %v764_v57  ;;  %v791_v25 = vmul.f32 %v784_v46, %v3290_v56  ;;  %v793_v12 = vmul.f32 %v784_v46, %v3307_v62 }
  0xf4   : > { %v786_v24 = vadd.f32 %v785_v18, %v770_v39  ;;  %v788_v53 = vadd.f32 %v787_v15, %v772_v30  ;;  %v795_v60 = vmul.f32 %v784_v46, %v3303_v61  ;;  %v790_v22 = vadd.f32 %v789_v14, %v774_v48  ;;  %v840_v14 = vld [vmem:[#allocation7 + $0x58] sm:$0xff] }
  0xf5   : > { %v792_v27 = vadd.f32 %v791_v25, %v776_v10  ;;  %v799_v8 = vmul.f32 %v798_v29, %v3282_v54  ;;  %v801_v9 = vmul.f32 %v798_v29, %v3294_v59  ;;  %v794_v26 = vadd.f32 %v793_v12, %v778_v16 }
  0xf6   : > { %v3365_v17 = vadd.f32 %v795_v60, %v780_v50  ;;  %v803_v31 = vmul.f32 %v798_v29, %v3290_v56  ;;  %v805_v32 = vmul.f32 %v798_v29, %v3307_v62  ;;  %v807_v35 = vmul.f32 %v798_v29, %v3303_v61 }
  0xf7   : > { %v3369_v34 = vadd.f32 %v799_v8, %v786_v24  ;;  %v3371_v13 = vadd.f32 %v801_v9, %v788_v53  ;;  %v811_v20 = vmul.f32 %v810_v23, %v3311_v63  ;;  %v813_v57 = vmul.f32 %v810_v23, %v3298_v28 }
  0xf8   : > { %v3375_v0 = vadd.f32 %v803_v31, %v790_v22  ;;  %v3377_v36 = vadd.f32 %v805_v32, %v792_v27  ;;  %v815_v58 = vmul.f32 %v810_v23, %v3286_v55  ;;  %v3381_v39 = vadd.f32 %v807_v35, %v794_v26  ;;  %v858_v31 = vld [vmem:[#allocation7 + $0x80] sm:$0xff] }
  0xf9   : > { %v812_v40 = vadd.f32 %v811_v20, %v3262_v47  ;;  %v817_v41 = vmul.f32 %v810_v23, %v3282_v54  ;;  %v819_v46 = vmul.f32 %v810_v23, %v3294_v59  ;;  %v814_v30 = vadd.f32 %v813_v57, %v3267_v49 }
  0xfa   : > { %v816_v48 = vadd.f32 %v815_v58, %v3272_v52  ;;  %v821_v19 = vmul.f32 %v810_v23, %v3290_v56  ;;  %v825_v38 = vmul.f32 %v824_v37, %v3311_v63  ;;  %v827_v18 = vmul.f32 %v824_v37, %v3298_v28 }
  0xfb   : > { %v818_v10 = vadd.f32 %v817_v41, %v3274_v42  ;;  %v820_v16 = vadd.f32 %v819_v46, %v3255_v43  ;;  %v829_v47 = vmul.f32 %v824_v37, %v3286_v55  ;;  %v831_v49 = vmul.f32 %v824_v37, %v3282_v54 }
  0xfc   : > { %v822_v15 = vadd.f32 %v821_v19, %v3245_v21  ;;  %v826_v50 = vadd.f32 %v825_v38, %v3259_v45  ;;  %v833_v52 = vmul.f32 %v824_v37, %v3294_v59  ;;  %v828_v25 = vadd.f32 %v827_v18, %v812_v40 }
  0xfd   : > { %v830_v29 = vadd.f32 %v829_v47, %v814_v30  ;;  %v835_v24 = vmul.f32 %v824_v37, %v3290_v56  ;;  %v837_v42 = vmul.f32 %v824_v37, %v3307_v62  ;;  %v832_v43 = vadd.f32 %v831_v49, %v816_v48  ;;  %v874_v48 = vld [vmem:[#allocation7 + $0xa8] sm:$0xff] }
  0xfe   : > { %v834_v53 = vadd.f32 %v833_v52, %v818_v10  ;;  %v841_v12 = vmul.f32 %v840_v14, %v3311_v63  ;;  %v843_v60 = vmul.f32 %v840_v14, %v3298_v28  ;;  %v845_v45 = vmul.f32 %v840_v14, %v3286_v55 }
  0xff   : > { %v836_v21 = vadd.f32 %v835_v24, %v820_v16  ;;  %v838_v23 = vadd.f32 %v837_v42, %v822_v15  ;;  %v847_v22 = vmul.f32 %v840_v14, %v3282_v54  ;;  %v849_v9 = vmul.f32 %v840_v14, %v3294_v59 }
 0x100   : > { %v842_v27 = vadd.f32 %v841_v12, %v3257_v44  ;;  %v844_v8 = vadd.f32 %v843_v60, %v826_v50  ;;  %v851_v26 = vmul.f32 %v840_v14, %v3290_v56  ;;  %v846_v32 = vadd.f32 %v845_v45, %v828_v25  ;;  %v888_v50 = vld [vmem:[#allocation5 + $0x18] sm:$0xff] }
 0x101   : > { %v848_v35 = vadd.f32 %v847_v22, %v830_v29  ;;  %v853_v63 = vmul.f32 %v840_v14, %v3307_v62  ;;  %v855_v20 = vmul.f32 %v840_v14, %v3303_v61  ;;  %v850_v57 = vadd.f32 %v849_v9, %v832_v43 }
 0x102   : > { %v852_v58 = vadd.f32 %v851_v26, %v834_v53  ;;  %v859_v37 = vmul.f32 %v858_v31, %v3298_v28  ;;  %v861_v40 = vmul.f32 %v858_v31, %v3286_v55  ;;  %v863_v46 = vmul.f32 %v858_v31, %v3282_v54 }
 0x103   : > { %v854_v41 = vadd.f32 %v853_v63, %v836_v21  ;;  %v3411_v44 = vadd.f32 %v855_v20, %v838_v23  ;;  %v865_v30 = vmul.f32 %v858_v31, %v3294_v59  ;;  %v867_v10 = vmul.f32 %v858_v31, %v3290_v56  ;;  %v900_v21 = vld [vmem:[#allocation5 + $0x50] sm:$0xff]  ;;  %v914_v63 = vld [vmem:[#allocation5 + $0x88] sm:$0xff] }
 0x104   : > { %v860_v19 = vadd.f32 %v859_v37, %v842_v27  ;;  %v862_v38 = vadd.f32 %v861_v40, %v844_v8  ;;  %v869_v16 = vmul.f32 %v858_v31, %v3307_v62  ;;  %v864_v18 = vadd.f32 %v863_v46, %v846_v32 }
 0x105   : > { %v866_v47 = vadd.f32 %v865_v30, %v848_v35  ;;  %v871_v28 = vmul.f32 %v858_v31, %v3303_v61  ;;  %v875_v15 = vmul.f32 %v874_v48, %v3286_v55  ;;  %v868_v49 = vadd.f32 %v867_v10, %v850_v57  ;;  %v930_v10 = vld [vmem:[#allocation5 + $0xc0] sm:$0xff] }
 0x106   : > { %v870_v52 = vadd.f32 %v869_v16, %v852_v58  ;;  %v877_v14 = vmul.f32 %v874_v48, %v3282_v54  ;;  %v879_v25 = vmul.f32 %v874_v48, %v3294_v59  ;;  %v881_v42 = vmul.f32 %v874_v48, %v3290_v56 }
 0x107   : > { %v3421_v29 = vadd.f32 %v871_v28, %v854_v41  ;;  %v3423_v24 = vadd.f32 %v875_v15, %v860_v19  ;;  %v883_v43 = vmul.f32 %v874_v48, %v3307_v62  ;;  %v885_v55 = vmul.f32 %v874_v48, %v3303_v61  ;;  %v3469_v28 = vld [vmem:[%s3002_s27 + $0x10] sm:$0xff] }
 0x108   : > { %v3427_v53 = vadd.f32 %v877_v14, %v862_v38  ;;  %v3429_v12 = vadd.f32 %v879_v25, %v864_v18  ;;  %v889_v60 = vmul.f32 %v888_v50, %v3019_v2  ;;  %v3433_v54 = vadd.f32 %v881_v42, %v866_v47  ;;  %v3482_v25 = vld [vmem:[%s3002_s27 + $0x28] sm:$0xff] }
 0x109   : > { %v3435_v59 = vadd.f32 %v883_v43, %v868_v49  ;;  %v891_v23 = vmul.f32 %v888_v50, %v3022_v3  ;;  %v893_v45 = vmul.f32 %v888_v50, %v3025_v4  ;;  %v3439_v56 = vadd.f32 %v885_v55, %v870_v52  ;;  %v3478_v49 = vld [vmem:[%s3002_s27 + $0x20] sm:$0xff]  ;;  %v3486_v43 = vld [vmem:[%s3002_s27 + $0x30] sm:$0xff] }
 0x10a   : > { %v890_v62 = vadd.f32 %v889_v60, %v3377_v36  ;;  %v895_v22 = vmul.f32 %v888_v50, %v3029_v5  ;;  %v897_v27 = vmul.f32 %v888_v50, %v3032_v6  ;;  %v901_v9 = vmul.f32 %v900_v21, %v3019_v2  ;;  %v3474_v50 = vld [vmem:[%s3002_s27 + $0x18] sm:$0xff] }
 0x10b   : > { %v892_v61 = vadd.f32 %v891_v23, %v3381_v39  ;;  %v894_v8 = vadd.f32 %v893_v45, %v3365_v17  ;;  %v903_v26 = vmul.f32 %v900_v21, %v3022_v3  ;;  %v905_v35 = vmul.f32 %v900_v21, %v3025_v4 }
 0x10c   : > { %v896_v31 = vadd.f32 %v895_v22, %v3357_v51  ;;  %v898_v32 = vadd.f32 %v897_v27, %v3349_v33  ;;  %v907_v36 = vmul.f32 %v900_v21, %v3029_v5  ;;  %v902_v20 = vadd.f32 %v901_v9, %v3375_v0  ;;  %v3491_v22 = vld [vmem:[%s3002_s27 + $0x38] sm:$0xff] }
 0x10d   : > { %v904_v57 = vadd.f32 %v903_v26, %v890_v62  ;;  %v909_v39 = vmul.f32 %v900_v21, %v3032_v6  ;;  %v911_v17 = vmul.f32 %v900_v21, %v3035_v7  ;;  %v906_v58 = vadd.f32 %v905_v35, %v892_v61  ;;  %v964_v35 = vld [vmem:[#allocation5 + $0x130] sm:$0xff] }
 0x10e   : > { %v908_v37 = vadd.f32 %v907_v36, %v894_v8  ;;  %v915_v40 = vmul.f32 %v914_v63, %v3019_v2  ;;  %v917_v51 = vmul.f32 %v914_v63, %v3022_v3  ;;  %v919_v46 = vmul.f32 %v914_v63, %v3025_v4 }
 0x10f   : > { %v910_v33 = vadd.f32 %v909_v39, %v896_v31  ;;  %v912_v41 = vadd.f32 %v911_v17, %v898_v32  ;;  %v921_v30 = vmul.f32 %v914_v63, %v3029_v5  ;;  %v923_v19 = vmul.f32 %v914_v63, %v3032_v6  ;;  %v3465_v5 = vld [vmem:[%s3002_s27 + $0x8] sm:$0xff] }
 0x110   : > { %v916_v0 = vadd.f32 %v915_v40, %v3371_v13  ;;  %v918_v48 = vadd.f32 %v917_v51, %v902_v20  ;;  %v925_v38 = vmul.f32 %v914_v63, %v3035_v7  ;;  %v920_v16 = vadd.f32 %v919_v46, %v904_v57  ;;  %v978_v46 = vld [vmem:[#allocation5 + $0x168] sm:$0xff] }
 0x111   : > { %v922_v18 = vadd.f32 %v921_v30, %v906_v58  ;;  %v927_v3 = vmul.f32 %v914_v63, %v3041_v11  ;;  %v931_v47 = vmul.f32 %v930_v10, %v3019_v2  ;;  %v924_v4 = vadd.f32 %v923_v19, %v908_v37 }
 0x112   : > { %v933_v13 = vmul.f32 %v3465_v5, %v930_v10  ;;  %v935_v6 = vmul.f32 %v3469_v28, %v930_v10  ;;  %v926_v15 = vadd.f32 %v925_v38, %v910_v33  ;;  %v937_v11 = vmul.f32 %v3474_v50, %v930_v10  ;;  %v990_v38 = vld [vmem:[#allocation7 + $0x10] sm:$0xff] }
 0x113   : > { %v932_v7 = vadd.f32 %v931_v47, %v3369_v34  ;;  %v939_v2 = vmul.f32 %v3478_v49, %v930_v10  ;;  %v941_v42 = vmul.f32 %v3482_v25, %v930_v10  ;;  %v943_v55 = vmul.f32 %v3486_v43, %v930_v10  ;;  %v948_v34 = vld [vmem:[#allocation5 + $0xf8] sm:$0xff] }
 0x114   : > { %v934_v52 = vadd.f32 %v933_v13, %v916_v0  ;;  %v936_v14 = vadd.f32 %v935_v6, %v918_v48  ;;  %v928_v60 = vadd.f32 %v927_v3, %v912_v41  ;;  %v938_v21 = vadd.f32 %v937_v11, %v920_v16 }
 0x115   : > { %v940_v23 = vadd.f32 %v939_v2, %v922_v18  ;;  %v949_v45 = vmul.f32 %v3465_v5, %v948_v34  ;;  %v942_v62 = vadd.f32 %v941_v42, %v924_v4  ;;  %v945_v27 = vmul.f32 %v3491_v22, %v930_v10  ;;  %v3521_v2 = vld [vmem:[%s3002_s27] sm:$0xff]  ;;  %s2722_s27 = smov [#allocation11]  }
 0x116   : > { %v951_v61 = vmul.f32 %v3469_v28, %v948_v34  ;;  %v953_v8 = vmul.f32 %v3474_v50, %v948_v34  ;;  %v944_v9 = vadd.f32 %v943_v55, %v926_v15  ;;  %v955_v31 = vmul.f32 %v3478_v49, %v948_v34  ;;  %s2643_s11 = sshll.u32 %s2722_s27, 4  ;;  %s2644_s11 = int_to_ptr.vmem [resolvable:$false] %s2643_s11 }
 0x117   : > { %v950_v26 = vadd.f32 %v949_v45, %v932_v7  ;;  %v957_v32 = vmul.f32 %v3482_v25, %v948_v34  ;;  %v959_v20 = vmul.f32 %v3486_v43, %v948_v34  ;;  %v961_v57 = vmul.f32 %v3491_v22, %v948_v34  ;;  %s2645_s13 = scalar_lea.vmem %s2644_s11, 2048  ;;  %p2646_p12 = scmp.lt.s32.totalorder %s4416_s10, %s2644_s11 }
 0x118   : > { %v952_v36 = vadd.f32 %v951_v61, %v934_v52  ;;  %v954_v63 = vadd.f32 %v953_v8, %v936_v14  ;;  %v956_v39 = vadd.f32 %v955_v31, %v938_v21  ;;  %v965_v58 = vmul.f32 %v3469_v28, %v964_v35  ;;  %p2647_p1 = scmp.lt.s32.totalorder %s2645_s13, %s2639_s20 }
 0x119   : > { %v958_v17 = vadd.f32 %v957_v32, %v940_v23  ;;  %v967_v37 = vmul.f32 %v3474_v50, %v964_v35  ;;  %v3502_v40 = vadd.f32 %v945_v27, %v928_v60  ;;  %v960_v51 = vadd.f32 %v959_v20, %v942_v62  ;;  %v1004_v60 = vld [vmem:[#allocation7 + $0x38] sm:$0xff] }
 0x11a   : > { %v969_v33 = vmul.f32 %v3478_v49, %v964_v35  ;;  %v971_v41 = vmul.f32 %v3482_v25, %v964_v35  ;;  %v966_v30 = vadd.f32 %v965_v58, %v950_v26  ;;  %v973_v48 = vmul.f32 %v3486_v43, %v964_v35  ;;  %p2648_p2 = por %p2647_p1, %p2646_p12 }
 0x11b   : > { %v968_v0 = vadd.f32 %v967_v37, %v952_v36  ;;  %v975_v19 = vmul.f32 %v3491_v22, %v964_v35  ;;  %v979_v18 = vmul.f32 %v3474_v50, %v978_v46  ;;  %v981_v3 = vmul.f32 %v3478_v49, %v978_v46 }
 0x11c   : > { %v970_v10 = vadd.f32 %v969_v33, %v954_v63  ;;  %v972_v16 = vadd.f32 %v971_v41, %v956_v39  ;;  %v3510_v47 = vadd.f32 %v961_v57, %v944_v9  ;;  %v974_v4 = vadd.f32 %v973_v48, %v958_v17  ;;  %v1020_v63 = vld [vmem:[#allocation7 + $0x60] sm:$0xff]  ;;  %v1038_v48 = vld [vmem:[#allocation7 + $0x88] sm:$0xff]  ;;  %p2649_p13 = pnand %p2648_p2, %p2642_p7 }
 0x11d   : > { %v983_v13 = vmul.f32 %v3482_v25, %v978_v46  ;;  %v985_v6 = vmul.f32 %v3486_v43, %v978_v46  ;;  %v3514_v15 = vadd.f32 %v975_v19, %v960_v51  ;;  %v3516_v7 = vadd.f32 %v979_v18, %v966_v30 }
 0x11e   : > { %v3518_v11 = vadd.f32 %v981_v3, %v968_v0  ;;  %v991_v52 = vmul.f32 %v3521_v2, %v990_v38  ;;  %v987_v42 = vmul.f32 %v3491_v22, %v978_v46  ;;  %v993_v55 = vmul.f32 %v3465_v5, %v990_v38 }
 0x11f   : > { %v3524_v14 = vadd.f32 %v983_v13, %v970_v10  ;;  %v995_v34 = vmul.f32 %v3469_v28, %v990_v38  ;;  %v3529_v21 = vadd.f32 %v985_v6, %v972_v16  ;;  %v997_v45 = vmul.f32 %v3474_v50, %v990_v38 }
 0x120   : > { %v992_v23 = vadd.f32 %v991_v52, %v3429_v12  ;;  %v999_v62 = vmul.f32 %v3478_v49, %v990_v38  ;;  %v994_v27 = vadd.f32 %v993_v55, %v3433_v54  ;;  %v1001_v8 = vmul.f32 %v3482_v25, %v990_v38  ;;  %v1054_v55 = vld [vmem:[#allocation7 + $0xb0] sm:$0xff] }
 0x121   : > { %v996_v61 = vadd.f32 %v995_v34, %v3435_v59  ;;  %v1005_v9 = vmul.f32 %v3521_v2, %v1004_v60  ;;  %v998_v26 = vadd.f32 %v997_v45, %v3439_v56  ;;  %v1007_v32 = vmul.f32 %v3465_v5, %v1004_v60 }
 0x122   : > { %v1000_v31 = vadd.f32 %v999_v62, %v3421_v29  ;;  %v1009_v12 = vmul.f32 %v3469_v28, %v1004_v60  ;;  %v1002_v35 = vadd.f32 %v1001_v8, %v3411_v44  ;;  %v1011_v54 = vmul.f32 %v3474_v50, %v1004_v60 }
 0x123   : > { %v1006_v36 = vadd.f32 %v1005_v9, %v3427_v53  ;;  %v1013_v59 = vmul.f32 %v3478_v49, %v1004_v60  ;;  %v1008_v20 = vadd.f32 %v1007_v32, %v992_v23  ;;  %v1015_v39 = vmul.f32 %v3482_v25, %v1004_v60 }
 0x124   : > { %v1010_v57 = vadd.f32 %v1009_v12, %v994_v27  ;;  %v1017_v56 = vmul.f32 %v3486_v43, %v1004_v60  ;;  %v3548_v29 = vadd.f32 %v987_v42, %v974_v4  ;;  %v1012_v17 = vadd.f32 %v1011_v54, %v996_v61 }
 0x125   : > { %v1021_v58 = vmul.f32 %v3521_v2, %v1020_v63  ;;  %v1023_v44 = vmul.f32 %v3465_v5, %v1020_v63  ;;  %v1014_v37 = vadd.f32 %v1013_v59, %v998_v26  ;;  %v1016_v53 = vadd.f32 %v1015_v39, %v1000_v31 }
 0x126   : > { %v1025_v51 = vmul.f32 %v3469_v28, %v1020_v63  ;;  %v1027_v33 = vmul.f32 %v3474_v50, %v1020_v63  ;;  %v1029_v30 = vmul.f32 %v3478_v49, %v1020_v63  ;;  %v1031_v0 = vmul.f32 %v3482_v25, %v1020_v63 }
 0x127   : > { %v1022_v41 = vadd.f32 %v1021_v58, %v3423_v24  ;;  %v1024_v46 = vadd.f32 %v1023_v44, %v1006_v36  ;;  %v1018_v19 = vadd.f32 %v1017_v56, %v1002_v35  ;;  %v1033_v16 = vmul.f32 %v3486_v43, %v1020_v63 }
 0x128   : > { %v1026_v38 = vadd.f32 %v1025_v51, %v1008_v20  ;;  %v1028_v10 = vadd.f32 %v1027_v33, %v1010_v57  ;;  %v1030_v18 = vadd.f32 %v1029_v30, %v1012_v17  ;;  %v1035_v3 = vmul.f32 %v3491_v22, %v1020_v63  ;;  %v1085_v30 = vld [vmem:[#allocation5 + $0x20] sm:$0xff] }
 0x129   : > { %v1039_v4 = vmul.f32 %v3465_v5, %v1038_v48  ;;  %v1041_v13 = vmul.f32 %v3469_v28, %v1038_v48  ;;  %v1032_v6 = vadd.f32 %v1031_v0, %v1014_v37  ;;  %v1034_v24 = vadd.f32 %v1033_v16, %v1016_v53 }
 0x12a   : > { %v1043_v52 = vmul.f32 %v3474_v50, %v1038_v48  ;;  %v1045_v42 = vmul.f32 %v3478_v49, %v1038_v48  ;;  %v1047_v23 = vmul.f32 %v3482_v25, %v1038_v48  ;;  %v1049_v45 = vmul.f32 %v3486_v43, %v1038_v48 }
 0x12b   : > { %v1040_v34 = vadd.f32 %v1039_v4, %v1022_v41  ;;  %v1042_v60 = vadd.f32 %v1041_v13, %v1024_v46  ;;  %v1051_v61 = vmul.f32 %v3491_v22, %v1038_v48  ;;  %v1055_v8 = vmul.f32 %v3469_v28, %v1054_v55 }
 0x12c   : > { %v1044_v62 = vadd.f32 %v1043_v52, %v1026_v38  ;;  %v1046_v27 = vadd.f32 %v1045_v42, %v1028_v10  ;;  %v3567_v9 = vadd.f32 %v1035_v3, %v1018_v19  ;;  %v1048_v26 = vadd.f32 %v1047_v23, %v1030_v18  ;;  %v1097_v38 = vld [vmem:[#allocation5 + $0x58] sm:$0xff] }
 0x12d   : > { %v1057_v31 = vmul.f32 %v3474_v50, %v1054_v55  ;;  %v1059_v32 = vmul.f32 %v3478_v49, %v1054_v55  ;;  %v1050_v12 = vadd.f32 %v1049_v45, %v1032_v6  ;;  %v3571_v35 = vadd.f32 %v1051_v61, %v1034_v24  ;;  %v1111_v61 = vld [vmem:[#allocation5 + $0x90] sm:$0xff] }
 0x12e   : > { %v1061_v36 = vmul.f32 %v3482_v25, %v1054_v55  ;;  %v1063_v54 = vmul.f32 %v3486_v43, %v1054_v55  ;;  %v3575_v59 = vadd.f32 %v1055_v8, %v1040_v34  ;;  %v1065_v57 = vmul.f32 %v3491_v22, %v1054_v55 }
 0x12f   : > { %v3577_v63 = vadd.f32 %v1057_v31, %v1042_v60  ;;  %v3579_v20 = vadd.f32 %v1059_v32, %v1044_v62  ;;  %v1067_v56 = vrot.slane %v3521_v2, 1  ;;  %v1068_v17 = vrot.slane %v3465_v5, 1 }
 0x130   : > { %v3582_v39 = vadd.f32 %v1061_v36, %v1046_v27  ;;  %v1069_v58 = vrot.slane %v3469_v28, 1  ;;  %v3587_v44 = vadd.f32 %v1063_v54, %v1048_v26  ;;  %v1070_v37 = vrot.slane %v3474_v50, 1 }
 0x131   : > { %v1071_v53 = vrot.slane %v3478_v49, 1  ;;  %v1072_v51 = vrot.slane %v3482_v25, 1  ;;  %v3592_v33 = vadd.f32 %v1065_v57, %v1050_v12  ;;  %v1073_v41 = vrot.slane %v3486_v43, 1 }
 0x132   : > { %v1074_v46 = vrot.slane %v3491_v22, 1  ;;  %v3603_v48 = vsel %vm1075_vm3, %v1069_v58, %v1070_v37  ;;  %v3607_v19 = vsel %vm1075_vm3, %v1068_v17, %v1069_v58  ;;  %v1264_v10 = vrot.slane %v3521_v2, 2 }
 0x133   : > { %v3599_v0 = vsel %vm1075_vm3, %v1071_v53, %v1072_v51  ;;  %v3616_v18 = vsel %vm1075_vm3, %v1072_v51, %v1073_v41  ;;  %v3620_v3 = vsel %vm1075_vm3, %v1070_v37, %v1071_v53  ;;  %v3624_v4 = vsel %vm1075_vm3, %v1067_v56, %v1068_v17  ;;  %v1127_v37 = vld [vmem:[#allocation5 + $0xc8] sm:$0xff] }
 0x134   : > { %v3612_v16 = vsel %vm1075_vm3, %v1073_v41, %v1074_v46  ;;  %v1086_v13 = vmul.f32 %v1085_v30, %v3624_v4  ;;  %v1088_v6 = vmul.f32 %v1085_v30, %v3607_v19  ;;  %v1090_v24 = vmul.f32 %v1085_v30, %v3603_v48 }
 0x135   : > { %v1092_v52 = vmul.f32 %v1085_v30, %v3620_v3  ;;  %v1094_v42 = vmul.f32 %v1085_v30, %v3599_v0  ;;  %v1098_v55 = vmul.f32 %v1097_v38, %v3624_v4  ;;  %v1100_v34 = vmul.f32 %v1097_v38, %v3607_v19 }
 0x136   : > { %v1102_v60 = vmul.f32 %v1097_v38, %v3603_v48  ;;  %v1087_v23 = vadd.f32 %v1086_v13, %v3529_v21  ;;  %v1089_v45 = vadd.f32 %v1088_v6, %v3548_v29  ;;  %v1091_v62 = vadd.f32 %v1090_v24, %v3514_v15 }
 0x137   : > { %v1093_v27 = vadd.f32 %v1092_v52, %v3510_v47  ;;  %v1095_v8 = vadd.f32 %v1094_v42, %v3502_v40  ;;  %v1099_v26 = vadd.f32 %v1098_v55, %v3524_v14  ;;  %v1104_v31 = vmul.f32 %v1097_v38, %v3620_v3 }
 0x138   : > { %v1106_v32 = vmul.f32 %v1097_v38, %v3599_v0  ;;  %v1101_v12 = vadd.f32 %v1100_v34, %v1087_v23  ;;  %v1103_v36 = vadd.f32 %v1102_v60, %v1089_v45  ;;  %v1108_v54 = vmul.f32 %v1097_v38, %v3616_v18 }
 0x139   : > { %v1112_v21 = vmul.f32 %v1111_v61, %v3624_v4  ;;  %v1105_v29 = vadd.f32 %v1104_v31, %v1091_v62  ;;  %v1114_v15 = vmul.f32 %v1111_v61, %v3607_v19  ;;  %v1116_v47 = vmul.f32 %v1111_v61, %v3603_v48  ;;  %v1145_v62 = vld [vmem:[#allocation5 + $0x100] sm:$0xff] }
 0x13a   : > { %v1107_v57 = vadd.f32 %v1106_v32, %v1093_v27  ;;  %v1109_v17 = vadd.f32 %v1108_v54, %v1095_v8  ;;  %v1118_v14 = vmul.f32 %v1111_v61, %v3620_v3  ;;  %v1120_v58 = vmul.f32 %v1111_v61, %v3599_v0 }
 0x13b   : > { %v1113_v40 = vadd.f32 %v1112_v21, %v3518_v11  ;;  %v1115_v53 = vadd.f32 %v1114_v15, %v1099_v26  ;;  %v1117_v51 = vadd.f32 %v1116_v47, %v1101_v12  ;;  %v1122_v41 = vmul.f32 %v1111_v61, %v3616_v18  ;;  %v1161_v47 = vld [vmem:[#allocation5 + $0x138] sm:$0xff] }
 0x13c   : > { %v1124_v30 = vmul.f32 %v1111_v61, %v3612_v16  ;;  %v1119_v38 = vadd.f32 %v1118_v14, %v1103_v36  ;;  %v1121_v13 = vadd.f32 %v1120_v58, %v1105_v29  ;;  %v1128_v6 = vmul.f32 %v1127_v37, %v3624_v4 }
 0x13d   : > { %v1130_v24 = vmul.f32 %v1127_v37, %v3607_v19  ;;  %v3655_v11 = vsel %vm1075_vm3, %v1074_v46, %v1067_v56  ;;  %v1123_v52 = vadd.f32 %v1122_v41, %v1107_v57  ;;  %v1132_v42 = vmul.f32 %v1127_v37, %v3603_v48 }
 0x13e   : > { %v1134_v55 = vmul.f32 %v1127_v37, %v3620_v3  ;;  %v1129_v34 = vadd.f32 %v1128_v6, %v3516_v7  ;;  %v1136_v23 = vmul.f32 %v1127_v37, %v3599_v0  ;;  %v1138_v45 = vmul.f32 %v1127_v37, %v3616_v18 }
 0x13f   : > { %v1131_v60 = vadd.f32 %v1130_v24, %v1113_v40  ;;  %v1125_v27 = vadd.f32 %v1124_v30, %v1109_v17  ;;  %v1133_v61 = vadd.f32 %v1132_v42, %v1115_v53  ;;  %v1140_v26 = vmul.f32 %v1127_v37, %v3612_v16  ;;  %v1175_v24 = vld [vmem:[#allocation5 + $0x170] sm:$0xff] }
 0x140   : > { %v1135_v8 = vadd.f32 %v1134_v55, %v1117_v51  ;;  %v1137_v56 = vadd.f32 %v1136_v23, %v1119_v38  ;;  %v1139_v46 = vadd.f32 %v1138_v45, %v1121_v13  ;;  %v1146_v31 = vmul.f32 %v1145_v62, %v3607_v19 }
 0x141   : > { %v1148_v32 = vmul.f32 %v1145_v62, %v3603_v48  ;;  %v1141_v12 = vadd.f32 %v1140_v26, %v1123_v52  ;;  %v1142_v7 = vmul.f32 %v1127_v37, %v3655_v11  ;;  %v1150_v36 = vmul.f32 %v1145_v62, %v3620_v3 }
 0x142   : > { %v1152_v54 = vmul.f32 %v1145_v62, %v3599_v0  ;;  %v1147_v21 = vadd.f32 %v1146_v31, %v1129_v34  ;;  %v1154_v57 = vmul.f32 %v1145_v62, %v3616_v18  ;;  %v1156_v15 = vmul.f32 %v1145_v62, %v3612_v16 }
 0x143   : > { %v1149_v29 = vadd.f32 %v1148_v32, %v1131_v60  ;;  %v1151_v17 = vadd.f32 %v1150_v36, %v1133_v61  ;;  %v1158_v14 = vmul.f32 %v1145_v62, %v3655_v11  ;;  %v1162_v58 = vmul.f32 %v1161_v47, %v3603_v48  ;;  %v1187_v60 = vld [vmem:[#allocation7 + $0x18] sm:$0xff] }
 0x144   : > { %v1153_v40 = vadd.f32 %v1152_v54, %v1135_v8  ;;  %v1155_v53 = vadd.f32 %v1154_v57, %v1137_v56  ;;  %v1157_v51 = vadd.f32 %v1156_v15, %v1139_v46  ;;  %v1164_v37 = vmul.f32 %v1161_v47, %v3620_v3 }
 0x145   : > { %v1166_v41 = vmul.f32 %v1161_v47, %v3599_v0  ;;  %v3674_v30 = vadd.f32 %v1142_v7, %v1125_v27  ;;  %v1163_v38 = vadd.f32 %v1162_v58, %v1147_v21  ;;  %v1168_v13 = vmul.f32 %v1161_v47, %v3616_v18  ;;  %v1201_v7 = vld [vmem:[#allocation7 + $0x40] sm:$0xff] }
 0x146   : > { %v1170_v6 = vmul.f32 %v1161_v47, %v3612_v16  ;;  %v1165_v52 = vadd.f32 %v1164_v37, %v1149_v29  ;;  %v1172_v55 = vmul.f32 %v1161_v47, %v3655_v11  ;;  %v1176_v34 = vmul.f32 %v1175_v24, %v3620_v3 }
 0x147   : > { %v1167_v42 = vadd.f32 %v1166_v41, %v1151_v17  ;;  %v3680_v23 = vadd.f32 %v1158_v14, %v1141_v12  ;;  %v1169_v45 = vadd.f32 %v1168_v13, %v1153_v40  ;;  %v1178_v62 = vmul.f32 %v1175_v24, %v3599_v0  ;;  %v1217_v41 = vld [vmem:[#allocation7 + $0x68] sm:$0xff] }
 0x148   : > { %v1180_v27 = vmul.f32 %v1175_v24, %v3616_v18  ;;  %v3684_v61 = vadd.f32 %v1170_v6, %v1155_v53  ;;  %v3686_v8 = vadd.f32 %v1172_v55, %v1157_v51  ;;  %v3688_v26 = vadd.f32 %v1176_v34, %v1163_v38 }
 0x149   : > { %v1182_v56 = vmul.f32 %v1175_v24, %v3612_v16  ;;  %v3691_v46 = vadd.f32 %v1178_v62, %v1165_v52  ;;  %v3694_v31 = vmul.f32 %v1175_v24, %v3655_v11  ;;  %v1188_v32 = vmul.f32 %v1187_v60, %v3624_v4 }
 0x14a   : > { %v1190_v12 = vmul.f32 %v1187_v60, %v3607_v19  ;;  %v3698_v36 = vadd.f32 %v1180_v27, %v1167_v42  ;;  %v1192_v21 = vmul.f32 %v1187_v60, %v3603_v48  ;;  %v1194_v29 = vmul.f32 %v1187_v60, %v3620_v3  ;;  %v1235_v27 = vld [vmem:[#allocation7 + $0x90] sm:$0xff] }
 0x14b   : > { %v3700_v54 = vadd.f32 %v1182_v56, %v1169_v45  ;;  %v1189_v57 = vadd.f32 %v1188_v32, %v3579_v20  ;;  %v1196_v47 = vmul.f32 %v1187_v60, %v3599_v0  ;;  %v1198_v17 = vmul.f32 %v1187_v60, %v3616_v18 }
 0x14c   : > { %v1191_v15 = vadd.f32 %v1190_v12, %v3582_v39  ;;  %v1193_v40 = vadd.f32 %v1192_v21, %v3587_v44  ;;  %v1195_v14 = vadd.f32 %v1194_v29, %v3592_v33  ;;  %v1202_v58 = vmul.f32 %v1201_v7, %v3624_v4 }
 0x14d   : > { %v1204_v53 = vmul.f32 %v1201_v7, %v3607_v19  ;;  %v1197_v51 = vadd.f32 %v1196_v47, %v3571_v35  ;;  %v1199_v37 = vadd.f32 %v1198_v17, %v3567_v9  ;;  %v1206_v20 = vmul.f32 %v1201_v7, %v3603_v48 }
 0x14e   : > { %v1208_v39 = vmul.f32 %v1201_v7, %v3620_v3  ;;  %v1203_v38 = vadd.f32 %v1202_v58, %v3577_v63  ;;  %v1210_v44 = vmul.f32 %v1201_v7, %v3599_v0  ;;  %v1212_v33 = vmul.f32 %v1201_v7, %v3616_v18 }
 0x14f   : > { %v1205_v13 = vadd.f32 %v1204_v53, %v1189_v57  ;;  %v1207_v6 = vadd.f32 %v1206_v20, %v1191_v15  ;;  %v1214_v52 = vmul.f32 %v1201_v7, %v3612_v16  ;;  %v1218_v35 = vmul.f32 %v1217_v41, %v3624_v4 }
 0x150   : > { %v1209_v24 = vadd.f32 %v1208_v39, %v1193_v40  ;;  %v1211_v42 = vadd.f32 %v1210_v44, %v1195_v14  ;;  %v1213_v9 = vadd.f32 %v1212_v33, %v1197_v51  ;;  %v1220_v55 = vmul.f32 %v1217_v41, %v3607_v19  ;;  %v1251_v51 = vld [vmem:[#allocation7 + $0xb8] sm:$0xff] }
 0x151   : > { %v1222_v34 = vmul.f32 %v1217_v41, %v3603_v48  ;;  %v1215_v60 = vadd.f32 %v1214_v52, %v1199_v37  ;;  %v1219_v63 = vadd.f32 %v1218_v35, %v3575_v59  ;;  %v1224_v45 = vmul.f32 %v1217_v41, %v3620_v3 }
 0x152   : > { %v1226_v62 = vmul.f32 %v1217_v41, %v3599_v0  ;;  %v1221_v56 = vadd.f32 %v1220_v55, %v1203_v38  ;;  %v1228_v12 = vmul.f32 %v1217_v41, %v3616_v18  ;;  %v1230_v4 = vmul.f32 %v1217_v41, %v3612_v16 }
 0x153   : > { %v1223_v32 = vadd.f32 %v1222_v34, %v1205_v13  ;;  %v1225_v7 = vadd.f32 %v1224_v45, %v1207_v6  ;;  %v1232_v29 = vmul.f32 %v1217_v41, %v3655_v11  ;;  %v1236_v57 = vmul.f32 %v1235_v27, %v3607_v19 }
 0x154   : > { %v1227_v21 = vadd.f32 %v1226_v62, %v1209_v24  ;;  %v1229_v15 = vadd.f32 %v1228_v12, %v1211_v42  ;;  %v1231_v47 = vadd.f32 %v1230_v4, %v1213_v9  ;;  %v1238_v59 = vmul.f32 %v1235_v27, %v3603_v48 }
 0x155   : > { %v1240_v17 = vmul.f32 %v1235_v27, %v3620_v3  ;;  %v3732_v40 = vadd.f32 %v1232_v29, %v1215_v60  ;;  %v1237_v14 = vadd.f32 %v1236_v57, %v1219_v63  ;;  %v1242_v58 = vmul.f32 %v1235_v27, %v3599_v0 }
 0x156   : > { %v1244_v53 = vmul.f32 %v1235_v27, %v3616_v18  ;;  %v1239_v37 = vadd.f32 %v1238_v59, %v1221_v56  ;;  %v1246_v39 = vmul.f32 %v1235_v27, %v3612_v16  ;;  %v1248_v19 = vmul.f32 %v1235_v27, %v3655_v11  ;;  %v1282_v27 = vld [vmem:[#allocation5 + $0x28] sm:$0xff] }
 0x157   : > { %v1241_v20 = vadd.f32 %v1240_v17, %v1223_v32  ;;  %v1243_v41 = vadd.f32 %v1242_v58, %v1225_v7  ;;  %v1252_v13 = vmul.f32 %v1251_v51, %v3603_v48  ;;  %v1254_v44 = vmul.f32 %v1251_v51, %v3620_v3  ;;  %v1294_v7 = vld [vmem:[#allocation5 + $0x60] sm:$0xff] }
 0x158   : > { %v1245_v38 = vadd.f32 %v1244_v53, %v1227_v21  ;;  %v1247_v33 = vadd.f32 %v1246_v39, %v1229_v15  ;;  %v3740_v6 = vadd.f32 %v1248_v19, %v1231_v47  ;;  %v1256_v24 = vmul.f32 %v1251_v51, %v3599_v0  ;;  %v1308_v19 = vld [vmem:[#allocation5 + $0x98] sm:$0xff] }
 0x159   : > { %v1258_v52 = vmul.f32 %v1251_v51, %v3616_v18  ;;  %v3744_v35 = vadd.f32 %v1252_v13, %v1237_v14  ;;  %v3746_v42 = vadd.f32 %v1254_v44, %v1239_v37  ;;  %v1260_v9 = vmul.f32 %v1251_v51, %v3612_v16 }
 0x15a   : > { %v1262_v55 = vmul.f32 %v1251_v51, %v3655_v11  ;;  %v3750_v34 = vadd.f32 %v1256_v24, %v1241_v20  ;;  %v1265_v3 = vrot.slane %v3465_v5, 2  ;;  %v1266_v60 = vrot.slane %v3469_v28, 2 }
 0x15b   : > { %v3752_v48 = vadd.f32 %v1258_v52, %v1243_v41  ;;  %v3756_v63 = vadd.f32 %v1260_v9, %v1245_v38  ;;  %v1267_v18 = vrot.slane %v3474_v50, 2  ;;  %v1268_v45 = vrot.slane %v3478_v49, 2 }
 0x15c   : > { %v3758_v0 = vadd.f32 %v1262_v55, %v1247_v33  ;;  %v1269_v16 = vrot.slane %v3482_v25, 2  ;;  %v1270_v11 = vrot.slane %v3486_v43, 2  ;;  %v1271_v62 = vrot.slane %v3491_v22, 2 }
 0x15d   : > { %v1185_v56 = vadd.f32 %v3694_v31, %v3684_v61  ;;  %v3770_v32 = vsel %vm1272_vm4, %v1266_v60, %v1267_v18  ;;  %v3774_v12 = vsel %vm1272_vm4, %v1265_v3, %v1266_v60  ;;  %v3780_v4 = vsel %vm1272_vm4, %v1264_v10, %v1265_v3 }
 0x15e   : > { %v3784_v21 = vsel %vm1272_vm4, %v1270_v11, %v1271_v62  ;;  %v3788_v61 = vsel %vm1272_vm4, %v1269_v16, %v1270_v11  ;;  %v3792_v31 = vsel %vm1272_vm4, %v1268_v45, %v1269_v16  ;;  %v3796_v29 = vsel %vm1272_vm4, %v1267_v18, %v1268_v45  ;;  %v1324_v18 = vld [vmem:[#allocation5 + $0xd0] sm:$0xff] }
 0x15f   : > { %v1283_v57 = vmul.f32 %v1282_v27, %v3780_v4  ;;  %v1285_v15 = vmul.f32 %v1282_v27, %v3774_v12  ;;  %v1287_v47 = vmul.f32 %v1282_v27, %v3770_v32  ;;  %v1289_v59 = vmul.f32 %v1282_v27, %v3796_v29 }
 0x160   : > { %v1291_v17 = vmul.f32 %v1282_v27, %v3792_v31  ;;  %v1295_v14 = vmul.f32 %v1294_v7, %v3780_v4  ;;  %v1297_v58 = vmul.f32 %v1294_v7, %v3774_v12  ;;  %v1299_v53 = vmul.f32 %v1294_v7, %v3770_v32 }
 0x161   : > { %v1284_v51 = vadd.f32 %v1283_v57, %v3700_v54  ;;  %v1286_v37 = vadd.f32 %v1285_v15, %v1185_v56  ;;  %v1288_v20 = vadd.f32 %v1287_v47, %v3686_v8  ;;  %v1290_v39 = vadd.f32 %v1289_v59, %v3680_v23 }
 0x162   : > { %v1292_v41 = vadd.f32 %v1291_v17, %v3674_v30  ;;  %v1296_v38 = vadd.f32 %v1295_v14, %v3698_v36  ;;  %v1301_v13 = vmul.f32 %v1294_v7, %v3796_v29  ;;  %v1303_v44 = vmul.f32 %v1294_v7, %v3792_v31 }
 0x163   : > { %v1298_v33 = vadd.f32 %v1297_v58, %v1284_v51  ;;  %v1300_v24 = vadd.f32 %v1299_v53, %v1286_v37  ;;  %v1305_v52 = vmul.f32 %v1294_v7, %v3788_v61  ;;  %v1309_v54 = vmul.f32 %v1308_v19, %v3780_v4  ;;  %v1342_v37 = vld [vmem:[#allocation5 + $0x108] sm:$0xff] }
 0x164   : > { %v1302_v9 = vadd.f32 %v1301_v13, %v1288_v20  ;;  %v1304_v55 = vadd.f32 %v1303_v44, %v1290_v39  ;;  %v1311_v8 = vmul.f32 %v1308_v19, %v3774_v12  ;;  %v1313_v23 = vmul.f32 %v1308_v19, %v3770_v32 }
 0x165   : > { %v1306_v3 = vadd.f32 %v1305_v52, %v1292_v41  ;;  %v1310_v30 = vadd.f32 %v1309_v54, %v3691_v46  ;;  %v1315_v36 = vmul.f32 %v1308_v19, %v3796_v29  ;;  %v1317_v60 = vmul.f32 %v1308_v19, %v3792_v31 }
 0x166   : > { %v1312_v45 = vadd.f32 %v1311_v8, %v1296_v38  ;;  %v1314_v16 = vadd.f32 %v1313_v23, %v1298_v33  ;;  %v1319_v11 = vmul.f32 %v1308_v19, %v3788_v61  ;;  %v1321_v27 = vmul.f32 %v1308_v19, %v3784_v21  ;;  %v1358_v8 = vld [vmem:[#allocation5 + $0x140] sm:$0xff] }
 0x167   : > { %v1316_v56 = vadd.f32 %v1315_v36, %v1300_v24  ;;  %v1318_v7 = vadd.f32 %v1317_v60, %v1302_v9  ;;  %v1325_v57 = vmul.f32 %v1324_v18, %v3780_v4  ;;  %v1327_v15 = vmul.f32 %v1324_v18, %v3774_v12 }
 0x168   : > { %v3828_v46 = vsel %vm1272_vm4, %v1271_v62, %v1264_v10  ;;  %v1320_v47 = vadd.f32 %v1319_v11, %v1304_v55  ;;  %v1329_v59 = vmul.f32 %v1324_v18, %v3770_v32  ;;  %v1331_v17 = vmul.f32 %v1324_v18, %v3796_v29 }
 0x169   : > { %v1326_v14 = vadd.f32 %v1325_v57, %v3688_v26  ;;  %v1328_v58 = vadd.f32 %v1327_v15, %v1310_v30  ;;  %v1333_v53 = vmul.f32 %v1324_v18, %v3792_v31  ;;  %v1335_v51 = vmul.f32 %v1324_v18, %v3788_v61 }
 0x16a   : > { %v1322_v20 = vadd.f32 %v1321_v27, %v1306_v3  ;;  %v1330_v39 = vadd.f32 %v1329_v59, %v1312_v45  ;;  %v1332_v19 = vadd.f32 %v1331_v17, %v1314_v16  ;;  %v1337_v41 = vmul.f32 %v1324_v18, %v3784_v21  ;;  %v1384_v59 = vld [vmem:[#allocation7 + $0x20] sm:$0xff] }
 0x16b   : > { %v1334_v10 = vadd.f32 %v1333_v53, %v1316_v56  ;;  %v1336_v62 = vadd.f32 %v1335_v51, %v1318_v7  ;;  %v1343_v38 = vmul.f32 %v1342_v37, %v3774_v12  ;;  %v1345_v13 = vmul.f32 %v1342_v37, %v3770_v32  ;;  %v1372_v7 = vld [vmem:[#allocation5 + $0x178] sm:$0xff] }
 0x16c   : > { %v1338_v44 = vadd.f32 %v1337_v41, %v1320_v47  ;;  %v1339_v26 = vmul.f32 %v1324_v18, %v3828_v46  ;;  %v1347_v33 = vmul.f32 %v1342_v37, %v3796_v29  ;;  %v1349_v24 = vmul.f32 %v1342_v37, %v3792_v31 }
 0x16d   : > { %v1344_v52 = vadd.f32 %v1343_v38, %v1326_v14  ;;  %v1346_v54 = vadd.f32 %v1345_v13, %v1328_v58  ;;  %v1351_v9 = vmul.f32 %v1342_v37, %v3788_v61  ;;  %v1353_v55 = vmul.f32 %v1342_v37, %v3784_v21  ;;  %v1398_v38 = vld [vmem:[#allocation7 + $0x48] sm:$0xff] }
 0x16e   : > { %v1348_v23 = vadd.f32 %v1347_v33, %v1330_v39  ;;  %v1350_v3 = vadd.f32 %v1349_v24, %v1332_v19  ;;  %v1355_v30 = vmul.f32 %v1342_v37, %v3828_v46  ;;  %v1359_v36 = vmul.f32 %v1358_v8, %v3770_v32 }
 0x16f   : > { %v1352_v60 = vadd.f32 %v1351_v9, %v1334_v10  ;;  %v1354_v45 = vadd.f32 %v1353_v55, %v1336_v62  ;;  %v1361_v18 = vmul.f32 %v1358_v8, %v3796_v29  ;;  %v1363_v16 = vmul.f32 %v1358_v8, %v3792_v31 }
 0x170   : > { %v1360_v11 = vadd.f32 %v1359_v36, %v1344_v52  ;;  %v1365_v27 = vmul.f32 %v1358_v8, %v3788_v61  ;;  %v1367_v56 = vmul.f32 %v1358_v8, %v3784_v21  ;;  %v1369_v15 = vmul.f32 %v1358_v8, %v3828_v46 }
 0x171   : > { %v1362_v57 = vadd.f32 %v1361_v18, %v1346_v54  ;;  %v1373_v47 = vmul.f32 %v1372_v7, %v3796_v29  ;;  %v3851_v17 = vadd.f32 %v1339_v26, %v1322_v20  ;;  %v3853_v14 = vadd.f32 %v1355_v30, %v1338_v44 }
 0x172   : > { %v3855_v58 = vadd.f32 %v1363_v16, %v1348_v23  ;;  %v1375_v53 = vmul.f32 %v1372_v7, %v3792_v31  ;;  %v3858_v51 = vadd.f32 %v1365_v27, %v1350_v3  ;;  %v3860_v37 = vadd.f32 %v1367_v56, %v1352_v60  ;;  %v1414_v60 = vld [vmem:[#allocation7 + $0x70] sm:$0xff] }
 0x173   : > { %v3862_v39 = vadd.f32 %v1369_v15, %v1354_v45  ;;  %v3865_v19 = vmul.f32 %v1372_v7, %v3788_v61  ;;  %v3867_v41 = vadd.f32 %v1373_v47, %v1360_v11  ;;  %v3870_v20 = vmul.f32 %v1372_v7, %v3784_v21 }
 0x174   : > { %v1385_v10 = vmul.f32 %v1384_v59, %v3780_v4  ;;  %v1387_v62 = vmul.f32 %v1384_v59, %v3774_v12  ;;  %v3874_v13 = vadd.f32 %v1375_v53, %v1362_v57  ;;  %v3877_v44 = vmul.f32 %v1372_v7, %v3828_v46  ;;  %v1432_v53 = vld [vmem:[#allocation7 + $0x98] sm:$0xff] }
 0x175   : > { %v1389_v26 = vmul.f32 %v1384_v59, %v3770_v32  ;;  %v1391_v33 = vmul.f32 %v1384_v59, %v3796_v29  ;;  %v1393_v54 = vmul.f32 %v1384_v59, %v3792_v31  ;;  %v1395_v9 = vmul.f32 %v1384_v59, %v3788_v61 }
 0x176   : > { %v1386_v24 = vadd.f32 %v1385_v10, %v3750_v34  ;;  %v1388_v52 = vadd.f32 %v1387_v62, %v3752_v48  ;;  %v1399_v23 = vmul.f32 %v1398_v38, %v3780_v4  ;;  %v1401_v3 = vmul.f32 %v1398_v38, %v3774_v12 }
 0x177   : > { %v1390_v55 = vadd.f32 %v1389_v26, %v3756_v63  ;;  %v1392_v8 = vadd.f32 %v1391_v33, %v3758_v0  ;;  %v1394_v30 = vadd.f32 %v1393_v54, %v3740_v6  ;;  %v1396_v36 = vadd.f32 %v1395_v9, %v3732_v40 }
 0x178   : > { %v1403_v34 = vmul.f32 %v1398_v38, %v3770_v32  ;;  %v1405_v48 = vmul.f32 %v1398_v38, %v3796_v29  ;;  %v1400_v45 = vadd.f32 %v1399_v23, %v3746_v42  ;;  %v1402_v18 = vadd.f32 %v1401_v3, %v1386_v24 }
 0x179   : > { %v1407_v63 = vmul.f32 %v1398_v38, %v3792_v31  ;;  %v1409_v0 = vmul.f32 %v1398_v38, %v3788_v61  ;;  %v1411_v27 = vmul.f32 %v1398_v38, %v3784_v21  ;;  %v1415_v6 = vmul.f32 %v1414_v60, %v3780_v4 }
 0x17a   : > { %v1404_v16 = vadd.f32 %v1403_v34, %v1388_v52  ;;  %v1406_v11 = vadd.f32 %v1405_v48, %v1390_v55  ;;  %v1417_v7 = vmul.f32 %v1414_v60, %v3774_v12  ;;  %v1419_v57 = vmul.f32 %v1414_v60, %v3770_v32 }
 0x17b   : > { %v1408_v56 = vadd.f32 %v1407_v63, %v1392_v8  ;;  %v1410_v40 = vadd.f32 %v1409_v0, %v1394_v30  ;;  %v1412_v15 = vadd.f32 %v1411_v27, %v1396_v36  ;;  %v1416_v42 = vadd.f32 %v1415_v6, %v3744_v35  ;;  %v1448_v8 = vld [vmem:[#allocation7 + $0xc0] sm:$0xff] }
 0x17c   : > { %v1421_v47 = vmul.f32 %v1414_v60, %v3796_v29  ;;  %v1423_v59 = vmul.f32 %v1414_v60, %v3792_v31  ;;  %v1418_v10 = vadd.f32 %v1417_v7, %v1400_v45  ;;  %v1420_v62 = vadd.f32 %v1419_v57, %v1402_v18 }
 0x17d   : > { %v1425_v38 = vmul.f32 %v1414_v60, %v3788_v61  ;;  %v1427_v4 = vmul.f32 %v1414_v60, %v3784_v21  ;;  %v1429_v24 = vmul.f32 %v1414_v60, %v3828_v46  ;;  %v1433_v52 = vmul.f32 %v1432_v53, %v3774_v12 }
 0x17e   : > { %v1422_v26 = vadd.f32 %v1421_v47, %v1404_v16  ;;  %v1424_v33 = vadd.f32 %v1423_v59, %v1406_v11  ;;  %v1435_v35 = vmul.f32 %v1432_v53, %v3770_v32  ;;  %v1437_v55 = vmul.f32 %v1432_v53, %v3796_v29 }
 0x17f   : > { %v1426_v54 = vadd.f32 %v1425_v38, %v1408_v56  ;;  %v1428_v9 = vadd.f32 %v1427_v4, %v1410_v40  ;;  %v3909_v23 = vadd.f32 %v1429_v24, %v1412_v15  ;;  %v1434_v3 = vadd.f32 %v1433_v52, %v1416_v42 }
 0x180   : > { %v1439_v30 = vmul.f32 %v1432_v53, %v3792_v31  ;;  %v1441_v36 = vmul.f32 %v1432_v53, %v3788_v61  ;;  %v1436_v34 = vadd.f32 %v1435_v35, %v1418_v10  ;;  %v1438_v48 = vadd.f32 %v1437_v55, %v1420_v62 }
 0x181   : > { %v1443_v60 = vmul.f32 %v1432_v53, %v3784_v21  ;;  %v1445_v12 = vmul.f32 %v1432_v53, %v3828_v46  ;;  %v1449_v63 = vmul.f32 %v1448_v8, %v3770_v32  ;;  %v1451_v0 = vmul.f32 %v1448_v8, %v3796_v29 }
 0x182   : > { %v1440_v45 = vadd.f32 %v1439_v30, %v1422_v26  ;;  %v1442_v18 = vadd.f32 %v1441_v36, %v1424_v33  ;;  %v1453_v27 = vmul.f32 %v1448_v8, %v3792_v31  ;;  %v1455_v6 = vmul.f32 %v1448_v8, %v3788_v61 }
 0x183   : > { %v1444_v16 = vadd.f32 %v1443_v60, %v1426_v54  ;;  %v3917_v11 = vadd.f32 %v1445_v12, %v1428_v9  ;;  %v3921_v56 = vadd.f32 %v1449_v63, %v1434_v3  ;;  %v3923_v40 = vadd.f32 %v1451_v0, %v1436_v34  ;;  %v1505_v54 = vld [vmem:[#allocation5 + $0xa0] sm:$0xff] }
 0x184   : > { %v1457_v7 = vmul.f32 %v1448_v8, %v3784_v21  ;;  %v1459_v57 = vmul.f32 %v1448_v8, %v3828_v46  ;;  %v3927_v15 = vadd.f32 %v1453_v27, %v1438_v48  ;;  %v3929_v32 = vadd.f32 %v1455_v6, %v1440_v45 }
 0x185   : > { %v1461_v29 = vrot.slane %v3521_v2, 3  ;;  %v1462_v42 = vrot.slane %v3465_v5, 3  ;;  %v1463_v61 = vrot.slane %v3469_v28, 3  ;;  %v1464_v59 = vrot.slane %v3474_v50, 3  ;;  %v1479_v28 = vld [vmem:[#allocation5 + $0x30] sm:$0xff] }
 0x186   : > { %v3933_v47 = vadd.f32 %v1457_v7, %v1442_v18  ;;  %v3935_v31 = vadd.f32 %v1459_v57, %v1444_v16  ;;  %v1465_v21 = vrot.slane %v3478_v49, 3  ;;  %v1466_v46 = vrot.slane %v3482_v25, 3 }
 0x187   : > { %v1467_v53 = vrot.slane %v3486_v43, 3  ;;  %v1468_v10 = vrot.slane %v3491_v22, 3  ;;  %v1378_v2 = vadd.f32 %v3865_v19, %v3855_v58  ;;  %v1380_v5 = vadd.f32 %v3870_v20, %v3858_v51  ;;  %v1491_v22 = vld [vmem:[#allocation5 + $0x68] sm:$0xff] }
 0x188   : > { %v1382_v62 = vadd.f32 %v3877_v44, %v3860_v37  ;;  %vm1469_vm5 = vcmp.lt.s32.totalorder %v3016_v1, 5 }
 0x189   : > { %v3950_v50 = vsel %vm1469_vm5, %v1467_v53, %v1468_v10  ;;  %v3952_v49 = vsel %vm1469_vm5, %v1466_v46, %v1467_v53  ;;  %v3954_v25 = vsel %vm1469_vm5, %v1465_v21, %v1466_v46  ;;  %v3956_v43 = vsel %vm1469_vm5, %v1464_v59, %v1465_v21 }
 0x18a   : > { %v3958_v38 = vsel %vm1469_vm5, %v1463_v61, %v1464_v59  ;;  %v1475_v58 = vsel %vm1469_vm5, %v1462_v42, %v1463_v61  ;;  %v1476_v19 = vsel %vm1469_vm5, %v1461_v29, %v1462_v42  ;;  %v3960_v51 = vsel %vm1469_vm5, %v1468_v10, %v1461_v29 }
 0x18b   : > { %v1480_v20 = vmul.f32 %v1479_v28, %v1476_v19  ;;  %v1482_v37 = vmul.f32 %v1479_v28, %v1475_v58  ;;  %v1484_v44 = vmul.f32 %v1479_v28, %v3958_v38  ;;  %v1486_v4 = vmul.f32 %v1479_v28, %v3956_v43 }
 0x18c   : > { %v1488_v26 = vmul.f32 %v1479_v28, %v3954_v25  ;;  %v1492_v33 = vmul.f32 %v1491_v22, %v1476_v19  ;;  %v1494_v24 = vmul.f32 %v1491_v22, %v1475_v58  ;;  %v1496_v52 = vmul.f32 %v1491_v22, %v3958_v38 }
 0x18d   : > { %v1481_v9 = vadd.f32 %v1480_v20, %v1380_v5  ;;  %v1483_v35 = vadd.f32 %v1482_v37, %v1382_v62  ;;  %v1485_v55 = vadd.f32 %v1484_v44, %v3862_v39  ;;  %v1487_v8 = vadd.f32 %v1486_v4, %v3853_v14  ;;  %v1521_v39 = vld [vmem:[#allocation5 + $0xd8] sm:$0xff]  ;;  %v1539_v5 = vld [vmem:[#allocation5 + $0x110] sm:$0xff] }
 0x18e   : > { %v1489_v3 = vadd.f32 %v1488_v26, %v3851_v17  ;;  %v1493_v30 = vadd.f32 %v1492_v33, %v1378_v2  ;;  %v1498_v36 = vmul.f32 %v1491_v22, %v3956_v43  ;;  %v1500_v34 = vmul.f32 %v1491_v22, %v3954_v25 }
 0x18f   : > { %v1495_v48 = vadd.f32 %v1494_v24, %v1481_v9  ;;  %v1497_v60 = vadd.f32 %v1496_v52, %v1483_v35  ;;  %v1502_v12 = vmul.f32 %v1491_v22, %v3952_v49  ;;  %v1506_v45 = vmul.f32 %v1505_v54, %v1476_v19 }
 0x190   : > { %v1499_v18 = vadd.f32 %v1498_v36, %v1485_v55  ;;  %v1501_v63 = vadd.f32 %v1500_v34, %v1487_v8  ;;  %v1508_v0 = vmul.f32 %v1505_v54, %v1475_v58  ;;  %v1510_v16 = vmul.f32 %v1505_v54, %v3958_v38 }
 0x191   : > { %v1503_v27 = vadd.f32 %v1502_v12, %v1489_v3  ;;  %v1507_v14 = vadd.f32 %v1506_v45, %v3874_v13  ;;  %v1512_v17 = vmul.f32 %v1505_v54, %v3956_v43  ;;  %v1514_v6 = vmul.f32 %v1505_v54, %v3954_v25  ;;  %v1569_v12 = vld [vmem:[#allocation5 + $0x180] sm:$0xff] }
 0x192   : > { %v1509_v7 = vadd.f32 %v1508_v0, %v1493_v30  ;;  %v1511_v57 = vadd.f32 %v1510_v16, %v1495_v48  ;;  %v1516_v29 = vmul.f32 %v1505_v54, %v3952_v49  ;;  %v1518_v42 = vmul.f32 %v1505_v54, %v3950_v50  ;;  %v1555_v54 = vld [vmem:[#allocation5 + $0x148] sm:$0xff] }
 0x193   : > { %v1513_v61 = vadd.f32 %v1512_v17, %v1497_v60  ;;  %v1515_v59 = vadd.f32 %v1514_v6, %v1499_v18  ;;  %v1522_v21 = vmul.f32 %v1521_v39, %v1476_v19  ;;  %v1524_v46 = vmul.f32 %v1521_v39, %v1475_v58 }
 0x194   : > { %v1517_v53 = vadd.f32 %v1516_v29, %v1501_v63  ;;  %v1519_v10 = vadd.f32 %v1518_v42, %v1503_v27  ;;  %v1526_v2 = vmul.f32 %v1521_v39, %v3958_v38  ;;  %v1528_v13 = vmul.f32 %v1521_v39, %v3956_v43 }
 0x195   : > { %v1523_v62 = vadd.f32 %v1522_v21, %v3867_v41  ;;  %v1525_v28 = vadd.f32 %v1524_v46, %v1507_v14  ;;  %v1530_v22 = vmul.f32 %v1521_v39, %v3954_v25  ;;  %v1532_v20 = vmul.f32 %v1521_v39, %v3952_v49 }
 0x196   : > { %v1527_v37 = vadd.f32 %v1526_v2, %v1509_v7  ;;  %v1529_v44 = vadd.f32 %v1528_v13, %v1511_v57  ;;  %v1534_v4 = vmul.f32 %v1521_v39, %v3950_v50  ;;  %v1536_v19 = vmul.f32 %v1521_v39, %v3960_v51 }
 0x197   : > { %v1531_v26 = vadd.f32 %v1530_v22, %v1513_v61  ;;  %v1533_v33 = vadd.f32 %v1532_v20, %v1515_v59  ;;  %v1540_v24 = vmul.f32 %v1539_v5, %v1475_v58  ;;  %v1542_v52 = vmul.f32 %v1539_v5, %v3958_v38 }
 0x198   : > { %v1535_v9 = vadd.f32 %v1534_v4, %v1517_v53  ;;  %v1537_v35 = vadd.f32 %v1536_v19, %v1519_v10  ;;  %v1544_v41 = vmul.f32 %v1539_v5, %v3956_v43  ;;  %v1546_v55 = vmul.f32 %v1539_v5, %v3954_v25 }
 0x199   : > { %v1541_v8 = vadd.f32 %v1540_v24, %v1523_v62  ;;  %v1543_v3 = vadd.f32 %v1542_v52, %v1525_v28  ;;  %v1548_v30 = vmul.f32 %v1539_v5, %v3952_v49  ;;  %v1550_v36 = vmul.f32 %v1539_v5, %v3950_v50 }
 0x19a   : > { %v1545_v34 = vadd.f32 %v1544_v41, %v1527_v37  ;;  %v1547_v48 = vadd.f32 %v1546_v55, %v1529_v44  ;;  %v1552_v60 = vmul.f32 %v1539_v5, %v3960_v51  ;;  %v1556_v58 = vmul.f32 %v1555_v54, %v3958_v38  ;;  %v1580_v38 = vld [vmem:[%s4465_s5] sm:$0xff] }
 0x19b   : > { %v1549_v45 = vadd.f32 %v1548_v30, %v1531_v26  ;;  %v1551_v18 = vadd.f32 %v1550_v36, %v1533_v33  ;;  %v1558_v63 = vmul.f32 %v1555_v54, %v3956_v43  ;;  %v1560_v0 = vmul.f32 %v1555_v54, %v3954_v25  ;;  %v1623_v36 = vld [vmem:[#allocation8] sm:$0xff] }
 0x19c   : > { %v1553_v16 = vadd.f32 %v1552_v60, %v1535_v9  ;;  %v1557_v39 = vadd.f32 %v1556_v58, %v1541_v8  ;;  %v1562_v27 = vmul.f32 %v1555_v54, %v3952_v49  ;;  %v1564_v14 = vmul.f32 %v1555_v54, %v3950_v50 }
 0x19d   : > { %v1559_v17 = vadd.f32 %v1558_v63, %v1543_v3  ;;  %v1561_v6 = vadd.f32 %v1560_v0, %v1545_v34  ;;  %v1566_v7 = vmul.f32 %v1555_v54, %v3960_v51  ;;  %v1570_v57 = vmul.f32 %v1569_v12, %v3956_v43  ;;  %v1631_v0 = vld [vmem:[#allocation8 + $0x28] sm:$0xff] }
 0x19e   : > { %v1563_v29 = vadd.f32 %v1562_v27, %v1547_v48  ;;  %v1565_v42 = vadd.f32 %v1564_v14, %v1549_v45  ;;  %v1572_v61 = vmul.f32 %v1569_v12, %v3954_v25  ;;  %v1574_v59 = vmul.f32 %v1569_v12, %v3952_v49  ;;  %v4012_v25 = vld [vmem:[%s4467_s7] sm:$0xff] }
 0x19f   : > { %v1567_v21 = vadd.f32 %v1566_v7, %v1551_v18  ;;  %v1571_v46 = vadd.f32 %v1570_v57, %v1557_v39  ;;  %v1576_v53 = vmul.f32 %v1569_v12, %v3950_v50  ;;  %v1578_v10 = vmul.f32 %v1569_v12, %v3960_v51 }
 0x1a0   : > { %v1573_v2 = vadd.f32 %v1572_v61, %v1559_v17  ;;  %v1575_v13 = vadd.f32 %v1574_v59, %v1561_v6  ;;  %v4005_v5 = vadd.f32 %v1580_v38, %v1553_v16  ;;  %v4007_v43 = vadd.f32 %v1580_v38, %v1537_v35  ;;  %v1646_v59 = vld [vmem:[#allocation8 + $0x50] sm:$0xff] }
 0x1a1   : > { %v1577_v62 = vadd.f32 %v1576_v53, %v1563_v29  ;;  %v1579_v28 = vadd.f32 %v1578_v10, %v1565_v42  ;;  %v4014_v49 = vadd.f32 %v1580_v38, %v1571_v46  ;;  %v4016_v22 = vadd.f32 %v1580_v38, %v1567_v21 }
 0x1a2   : > { %v4018_v50 = vadd.f32 %v1580_v38, %v1573_v2  ;;  %v4020_v51 = vadd.f32 %v1580_v38, %v1575_v13  ;;  %v1603_v20 = vadd.f32 %v4005_v5, %v3917_v11  ;;  %v1605_v37 = vadd.f32 %v4007_v43, %v3909_v23 }
 0x1a3   : > { %v4026_v44 = vadd.f32 %v1580_v38, %v1577_v62  ;;  %v4028_v4 = vadd.f32 %v1580_v38, %v1579_v28  ;;  %v1591_v19 = vadd.f32 %v4014_v49, %v3921_v56  ;;  %v1601_v26 = vadd.f32 %v4016_v22, %v3935_v31 }
 0x1a4   : > { %v1593_v33 = vadd.f32 %v4018_v50, %v3923_v40  ;;  %v1595_v24 = vadd.f32 %v4020_v51, %v3927_v15  ;;  %v4039_v11 = vadd.f32 %v1603_v20, %v4012_v25  ;;  %v4051_v31 = vadd.f32 %v1605_v37, %v4012_v25 }
 0x1a5   : > { %v4042_v23 = vadd.f32 %v1591_v19, %v4012_v25  ;;  %v1597_v52 = vadd.f32 %v4026_v44, %v3929_v32  ;;  %v4048_v56 = vadd.f32 %v4028_v4, %v3933_v47  ;;  %v4057_v15 = vadd.f32 %v1601_v26, %v4012_v25 }
 0x1a6   : > { %v4054_v40 = vadd.f32 %v1593_v33, %v4012_v25  ;;  %v1607_v54 = vrot.slane %v4014_v49, 6  ;;  %v1608_v9 = vrot.slane %v4018_v50, 6  ;;  %v4062_v35 = vadd.f32 %v1595_v24, %v4012_v25 }
 0x1a7   : > { %v4065_v32 = vadd.f32 %v1597_v52, %v4012_v25  ;;  %v1609_v47 = vrot.slane %v4020_v51, 6  ;;  %v1610_v41 = vrot.slane %v4026_v44, 6  ;;  %v1611_v55 = vrot.slane %v4028_v4, 6 }
 0x1a8   : > { %v1612_v8 = vrot.slane %v4016_v22, 6  ;;  %v1613_v3 = vrot.slane %v4005_v5, 6  ;;  %v1614_v30 = vrot.slane %v4007_v43, 6  ;;  %v1621_v60 = vsel %vm510_vm1, %v1607_v54, %v1608_v9 }
 0x1a9   : > { %v1619_v34 = vsel %vm510_vm1, %v1609_v47, %v1610_v41  ;;  %v1620_v48 = vsel %vm510_vm1, %v1608_v9, %v1609_v47  ;;  %v1692_v58 = vrot.slane %v4014_v49, 7  ;;  %v1618_v63 = vsel %vm510_vm1, %v1610_v41, %v1611_v55  ;;  %v1663_v9 = vld [vmem:[#allocation8 + $0x78] sm:$0xff] }
 0x1aa   : > { %v4082_v12 = vsel %vm510_vm1, %v1613_v3, %v1614_v30  ;;  %v4086_v45 = vsel %vm510_vm1, %v1612_v8, %v1613_v3  ;;  %v1617_v18 = vsel %vm510_vm1, %v1611_v55, %v1612_v8  ;;  %v1622_v16 = vsel %vm510_vm1, %v1614_v30, %v1607_v54 }
 0x1ab   : > { %v1625_v39 = vmul.f32 %v1623_v36, %v1621_v60  ;;  %v1626_v27 = vmul.f32 %v1623_v36, %v1620_v48  ;;  %v1627_v14 = vmul.f32 %v1623_v36, %v1619_v34  ;;  %v1624_v17 = vmul.f32 %v1623_v36, %v1622_v16 }
 0x1ac   : > { %v1628_v6 = vmul.f32 %v1623_v36, %v1618_v63  ;;  %v1629_v7 = vmul.f32 %v1623_v36, %v1617_v18  ;;  %v1632_v57 = vmul.f32 %v1631_v0, %v1622_v16  ;;  %v1633_v38 = vmul.f32 %v1631_v0, %v1621_v60 }
 0x1ad   : > { %v1635_v29 = vmul.f32 %v1631_v0, %v1620_v48  ;;  %v1637_v42 = vmul.f32 %v1631_v0, %v1619_v34  ;;  %v1639_v61 = vmul.f32 %v1631_v0, %v1618_v63  ;;  %v1641_v21 = vmul.f32 %v1631_v0, %v1617_v18 }
 0x1ae   : > { %v1643_v46 = vmul.f32 %v1631_v0, %v4086_v45  ;;  %v1647_v53 = vmul.f32 %v1646_v59, %v1622_v16  ;;  %v1648_v10 = vmul.f32 %v1646_v59, %v1621_v60  ;;  %v1634_v2 = vadd.f32 %v1633_v38, %v1624_v17  ;;  %v1679_v16 = vld [vmem:[#allocation8 + $0xa0] sm:$0xff] }
 0x1af   : > { %v1636_v13 = vadd.f32 %v1635_v29, %v1625_v39  ;;  %v1638_v62 = vadd.f32 %v1637_v42, %v1626_v27  ;;  %v1640_v28 = vadd.f32 %v1639_v61, %v1627_v14  ;;  %v1642_v20 = vadd.f32 %v1641_v21, %v1628_v6 }
 0x1b0   : > { %v1644_v37 = vadd.f32 %v1643_v46, %v1629_v7  ;;  %v1649_v19 = vadd.f32 %v1648_v10, %v1632_v57  ;;  %v1650_v26 = vmul.f32 %v1646_v59, %v1620_v48  ;;  %v1652_v33 = vmul.f32 %v1646_v59, %v1619_v34 }
 0x1b1   : > { %v1654_v24 = vmul.f32 %v1646_v59, %v1618_v63  ;;  %v1656_v52 = vmul.f32 %v1646_v59, %v1617_v18  ;;  %v1658_v54 = vmul.f32 %v1646_v59, %v4086_v45  ;;  %v1660_v41 = vmul.f32 %v1646_v59, %v4082_v12 }
 0x1b2   : > { %v1651_v47 = vadd.f32 %v1650_v26, %v1634_v2  ;;  %v1664_v55 = vmul.f32 %v1663_v9, %v1621_v60  ;;  %v1666_v8 = vmul.f32 %v1663_v9, %v1620_v48  ;;  %v1653_v3 = vadd.f32 %v1652_v33, %v1636_v13 }
 0x1b3   : > { %v1655_v30 = vadd.f32 %v1654_v24, %v1638_v62  ;;  %v1657_v36 = vadd.f32 %v1656_v52, %v1640_v28  ;;  %v1659_v0 = vadd.f32 %v1658_v54, %v1642_v20  ;;  %v1661_v39 = vadd.f32 %v1660_v41, %v1644_v37  ;;  %v1723_v41 = vld [vmem:[#allocation8 + $0x30] sm:$0xff] }
 0x1b4   : > { %v1665_v27 = vadd.f32 %v1664_v55, %v1647_v53  ;;  %v1667_v14 = vadd.f32 %v1666_v8, %v1649_v19  ;;  %v1668_v17 = vmul.f32 %v1663_v9, %v1619_v34  ;;  %v1670_v6 = vmul.f32 %v1663_v9, %v1618_v63 }
 0x1b5   : > { %v1672_v7 = vmul.f32 %v1663_v9, %v1617_v18  ;;  %v1674_v57 = vmul.f32 %v1663_v9, %v4086_v45  ;;  %v1676_v38 = vmul.f32 %v1663_v9, %v4082_v12  ;;  %v1680_v42 = vmul.f32 %v1679_v16, %v1620_v48 }
 0x1b6   : > { %v1669_v29 = vadd.f32 %v1668_v17, %v1651_v47  ;;  %v1682_v61 = vmul.f32 %v1679_v16, %v1619_v34  ;;  %v1684_v60 = vmul.f32 %v1679_v16, %v1618_v63  ;;  %v1671_v59 = vadd.f32 %v1670_v6, %v1653_v3 }
 0x1b7   : > { %v1673_v21 = vadd.f32 %v1672_v7, %v1655_v30  ;;  %v1675_v46 = vadd.f32 %v1674_v57, %v1657_v36  ;;  %v1677_v10 = vadd.f32 %v1676_v38, %v1659_v0  ;;  %v1681_v2 = vadd.f32 %v1680_v42, %v1665_v27 }
 0x1b8   : > { %v1683_v13 = vadd.f32 %v1682_v61, %v1667_v14  ;;  %v1685_v62 = vadd.f32 %v1684_v60, %v1669_v29  ;;  %v1686_v53 = vmul.f32 %v1679_v16, %v1617_v18  ;;  %v1688_v28 = vmul.f32 %v1679_v16, %v4086_v45  ;;  %v1709_v45 = vld [vmem:[#allocation8 + $0x8] sm:$0xff] }
 0x1b9   : > { %v1690_v20 = vmul.f32 %v1679_v16, %v4082_v12  ;;  %v1693_v37 = vrot.slane %v4018_v50, 7  ;;  %v1694_v19 = vrot.slane %v4020_v51, 7  ;;  %v1695_v34 = vrot.slane %v4026_v44, 7 }
 0x1ba   : > { %v1687_v26 = vadd.f32 %v1686_v53, %v1671_v59  ;;  %v1696_v48 = vrot.slane %v4028_v4, 7  ;;  %v1697_v63 = vrot.slane %v4016_v22, 7  ;;  %v1689_v33 = vadd.f32 %v1688_v28, %v1673_v21 }
 0x1bb   : > { %v1691_v24 = vadd.f32 %v1690_v20, %v1675_v46  ;;  %v1698_v52 = vrot.slane %v4005_v5, 7  ;;  %v1699_v18 = vrot.slane %v4007_v43, 7  ;;  %v4118_v9 = vsel %vm698_vm2, %v1694_v19, %v1695_v34 }
 0x1bc   : > { %v4110_v12 = vsel %vm698_vm2, %v1696_v48, %v1697_v63  ;;  %v4114_v54 = vsel %vm698_vm2, %v1695_v34, %v1696_v48  ;;  %v1705_v47 = vsel %vm698_vm2, %v1693_v37, %v1694_v19  ;;  %v1706_v3 = vsel %vm698_vm2, %v1692_v58, %v1693_v37 }
 0x1bd   : > { %v4124_v55 = vsel %vm698_vm2, %v1698_v52, %v1699_v18  ;;  %v4128_v8 = vsel %vm698_vm2, %v1697_v63, %v1698_v52  ;;  %v1707_v30 = vsel %vm698_vm2, %v1699_v18, %v1692_v58  ;;  %v1712_v0 = vmul.f32 %v1709_v45, %v1706_v3  ;;  %v1739_v58 = vld [vmem:[#allocation8 + $0x58] sm:$0xff]  ;;  %v1757_v52 = vld [vmem:[#allocation8 + $0x80] sm:$0xff] }
 0x1be   : > { %v1710_v36 = vmul.f32 %v1709_v45, %v1707_v30  ;;  %v1714_v16 = vmul.f32 %v1709_v45, %v1705_v47  ;;  %v1716_v27 = vmul.f32 %v1709_v45, %v4118_v9  ;;  %v1718_v14 = vmul.f32 %v1709_v45, %v4114_v54 }
 0x1bf   : > { %v1720_v17 = vmul.f32 %v1709_v45, %v4110_v12  ;;  %v1724_v6 = vmul.f32 %v1723_v41, %v1707_v30  ;;  %v1726_v7 = vmul.f32 %v1723_v41, %v1706_v3  ;;  %v1713_v38 = vadd.f32 %v1712_v0, %v1687_v26 }
 0x1c0   : > { %v1711_v57 = vadd.f32 %v1710_v36, %v1685_v62  ;;  %v1715_v29 = vadd.f32 %v1714_v16, %v1689_v33  ;;  %v1717_v42 = vadd.f32 %v1716_v27, %v1691_v24  ;;  %v1719_v61 = vadd.f32 %v1718_v14, %v1677_v10 }
 0x1c1   : > { %v1721_v60 = vadd.f32 %v1720_v17, %v1661_v39  ;;  %v1725_v59 = vadd.f32 %v1724_v6, %v1683_v13  ;;  %v1728_v21 = vmul.f32 %v1723_v41, %v1705_v47  ;;  %v1730_v53 = vmul.f32 %v1723_v41, %v4118_v9 }
 0x1c2   : > { %v1727_v46 = vadd.f32 %v1726_v7, %v1711_v57  ;;  %v1732_v28 = vmul.f32 %v1723_v41, %v4114_v54  ;;  %v1734_v20 = vmul.f32 %v1723_v41, %v4110_v12  ;;  %v1736_v19 = vmul.f32 %v1723_v41, %v4128_v8  ;;  %v1773_v7 = vld [vmem:[#allocation8 + $0xa8] sm:$0xff] }
 0x1c3   : > { %v1729_v37 = vadd.f32 %v1728_v21, %v1713_v38  ;;  %v1740_v34 = vmul.f32 %v1739_v58, %v1707_v30  ;;  %v1742_v62 = vmul.f32 %v1739_v58, %v1706_v3  ;;  %v1731_v26 = vadd.f32 %v1730_v53, %v1715_v29 }
 0x1c4   : > { %v1733_v48 = vadd.f32 %v1732_v28, %v1717_v42  ;;  %v1735_v63 = vadd.f32 %v1734_v20, %v1719_v61  ;;  %v1744_v10 = vmul.f32 %v1739_v58, %v1705_v47  ;;  %v1737_v39 = vadd.f32 %v1736_v19, %v1721_v60  ;;  %v1787_v28 = vld [vmem:[#allocation8 + $0x10] sm:$0xff] }
 0x1c5   : > { %v1741_v13 = vadd.f32 %v1740_v34, %v1681_v2  ;;  %v1743_v33 = vadd.f32 %v1742_v62, %v1725_v59  ;;  %v1746_v24 = vmul.f32 %v1739_v58, %v4118_v9  ;;  %v1748_v45 = vmul.f32 %v1739_v58, %v4114_v54 }
 0x1c6   : > { %v1745_v18 = vadd.f32 %v1744_v10, %v1727_v46  ;;  %v1750_v36 = vmul.f32 %v1739_v58, %v4110_v12  ;;  %v1752_v0 = vmul.f32 %v1739_v58, %v4128_v8  ;;  %v1754_v30 = vmul.f32 %v1739_v58, %v4124_v55 }
 0x1c7   : > { %v1747_v41 = vadd.f32 %v1746_v24, %v1729_v37  ;;  %v1758_v16 = vmul.f32 %v1757_v52, %v1706_v3  ;;  %v1760_v27 = vmul.f32 %v1757_v52, %v1705_v47  ;;  %v1749_v14 = vadd.f32 %v1748_v45, %v1731_v26 }
 0x1c8   : > { %v1751_v17 = vadd.f32 %v1750_v36, %v1733_v48  ;;  %v1753_v6 = vadd.f32 %v1752_v0, %v1735_v63  ;;  %v1762_v2 = vmul.f32 %v1757_v52, %v4118_v9  ;;  %v1755_v57 = vadd.f32 %v1754_v30, %v1737_v39 }
 0x1c9   : > { %v1759_v38 = vadd.f32 %v1758_v16, %v1741_v13  ;;  %v1761_v29 = vadd.f32 %v1760_v27, %v1743_v33  ;;  %v1764_v42 = vmul.f32 %v1757_v52, %v4114_v54  ;;  %v1766_v60 = vmul.f32 %v1757_v52, %v4110_v12  ;;  %v1801_v13 = vld [vmem:[#allocation8 + $0x38] sm:$0xff] }
 0x1ca   : > { %v1763_v61 = vadd.f32 %v1762_v2, %v1745_v18  ;;  %v1768_v59 = vmul.f32 %v1757_v52, %v4128_v8  ;;  %v1770_v21 = vmul.f32 %v1757_v52, %v4124_v55  ;;  %v1774_v58 = vmul.f32 %v1773_v7, %v1705_v47 }
 0x1cb   : > { %v1765_v3 = vadd.f32 %v1764_v42, %v1747_v41  ;;  %v1776_v46 = vmul.f32 %v1773_v7, %v4118_v9  ;;  %v1778_v53 = vmul.f32 %v1773_v7, %v4114_v54  ;;  %v1767_v20 = vadd.f32 %v1766_v60, %v1749_v14 }
 0x1cc   : > { %v1769_v37 = vadd.f32 %v1768_v59, %v1751_v17  ;;  %v1771_v19 = vadd.f32 %v1770_v21, %v1753_v6  ;;  %v1780_v34 = vmul.f32 %v1773_v7, %v4110_v12  ;;  %v1775_v62 = vadd.f32 %v1774_v58, %v1759_v38  ;;  %v1817_v17 = vld [vmem:[#allocation8 + $0x60] sm:$0xff] }
 0x1cd   : > { %v1777_v26 = vadd.f32 %v1776_v46, %v1761_v29  ;;  %v1779_v48 = vadd.f32 %v1778_v53, %v1763_v61  ;;  %v1782_v63 = vmul.f32 %v1773_v7, %v4128_v8  ;;  %v1784_v39 = vmul.f32 %v1773_v7, %v4124_v55 }
 0x1ce   : > { %v1781_v10 = vadd.f32 %v1780_v34, %v1765_v3  ;;  %v1788_v47 = vmul.f32 %v1787_v28, %v4014_v49  ;;  %v1790_v9 = vmul.f32 %v1787_v28, %v4018_v50  ;;  %v1792_v33 = vmul.f32 %v1787_v28, %v4020_v51 }
 0x1cf   : > { %v1783_v54 = vadd.f32 %v1782_v63, %v1767_v20  ;;  %v1794_v24 = vmul.f32 %v1787_v28, %v4026_v44  ;;  %v1796_v12 = vmul.f32 %v1787_v28, %v4028_v4  ;;  %v1785_v52 = vadd.f32 %v1784_v39, %v1769_v37  ;;  %v1835_v20 = vld [vmem:[#allocation8 + $0x88] sm:$0xff] }
 0x1d0   : > { %v1789_v18 = vadd.f32 %v1788_v47, %v1779_v48  ;;  %v1791_v45 = vadd.f32 %v1790_v9, %v1781_v10  ;;  %v1798_v8 = vmul.f32 %v1787_v28, %v4016_v22  ;;  %v1802_v55 = vmul.f32 %v1801_v13, %v4014_v49 }
 0x1d1   : > { %v1793_v36 = vadd.f32 %v1792_v33, %v1783_v54  ;;  %v1797_v0 = vadd.f32 %v1796_v12, %v1771_v19  ;;  %v1804_v41 = vmul.f32 %v1801_v13, %v4018_v50  ;;  %v1795_v30 = vadd.f32 %v1794_v24, %v1785_v52  ;;  %v1851_v52 = vld [vmem:[#allocation8 + $0xb0] sm:$0xff] }
 0x1d2   : > { %v1799_v16 = vadd.f32 %v1798_v8, %v1755_v57  ;;  %v1806_v27 = vmul.f32 %v1801_v13, %v4020_v51  ;;  %v1808_v14 = vmul.f32 %v1801_v13, %v4026_v44  ;;  %v1803_v6 = vadd.f32 %v1802_v55, %v1777_v26 }
 0x1d3   : > { %v1805_v2 = vadd.f32 %v1804_v41, %v1789_v18  ;;  %v1810_v7 = vmul.f32 %v1801_v13, %v4028_v4  ;;  %v1812_v38 = vmul.f32 %v1801_v13, %v4016_v22  ;;  %v1814_v61 = vmul.f32 %v1801_v13, %v4005_v5 }
 0x1d4   : > { %v1807_v29 = vadd.f32 %v1806_v27, %v1791_v45  ;;  %v1809_v42 = vadd.f32 %v1808_v14, %v1793_v36  ;;  %v1818_v60 = vmul.f32 %v1817_v17, %v4014_v49  ;;  %v1820_v57 = vmul.f32 %v1817_v17, %v4018_v50 }
 0x1d5   : > { %v1811_v59 = vadd.f32 %v1810_v7, %v1795_v30  ;;  %v1813_v21 = vadd.f32 %v1812_v38, %v1797_v0  ;;  %v1822_v3 = vmul.f32 %v1817_v17, %v4020_v51  ;;  %v1815_v58 = vadd.f32 %v1814_v61, %v1799_v16 }
 0x1d6   : > { %v1819_v46 = vadd.f32 %v1818_v60, %v1775_v62  ;;  %v1824_v53 = vmul.f32 %v1817_v17, %v4026_v44  ;;  %v1826_v28 = vmul.f32 %v1817_v17, %v4028_v4  ;;  %v1821_v37 = vadd.f32 %v1820_v57, %v1803_v6 }
 0x1d7   : > { %v1823_v19 = vadd.f32 %v1822_v3, %v1805_v2  ;;  %v1828_v34 = vmul.f32 %v1817_v17, %v4016_v22  ;;  %v1830_v26 = vmul.f32 %v1817_v17, %v4005_v5  ;;  %v1832_v10 = vmul.f32 %v1817_v17, %v4007_v43 }
 0x1d8   : > { %v1825_v48 = vadd.f32 %v1824_v53, %v1807_v29  ;;  %v1827_v63 = vadd.f32 %v1826_v28, %v1809_v42  ;;  %v1836_v39 = vmul.f32 %v1835_v20, %v4018_v50  ;;  %v1838_v62 = vmul.f32 %v1835_v20, %v4020_v51 }
 0x1d9   : > { %v1829_v47 = vadd.f32 %v1828_v34, %v1811_v59  ;;  %v1831_v9 = vadd.f32 %v1830_v26, %v1813_v21  ;;  %v1840_v13 = vmul.f32 %v1835_v20, %v4026_v44  ;;  %v1833_v54 = vadd.f32 %v1832_v10, %v1815_v58 }
 0x1da   : > { %v1837_v33 = vadd.f32 %v1836_v39, %v1819_v46  ;;  %v1842_v24 = vmul.f32 %v1835_v20, %v4028_v4  ;;  %v1844_v12 = vmul.f32 %v1835_v20, %v4016_v22  ;;  %v1839_v18 = vadd.f32 %v1838_v62, %v1821_v37 }
 0x1db   : > { %v1841_v45 = vadd.f32 %v1840_v13, %v1823_v19  ;;  %v1846_v8 = vmul.f32 %v1835_v20, %v4005_v5  ;;  %v1848_v36 = vmul.f32 %v1835_v20, %v4007_v43  ;;  %v1852_v41 = vmul.f32 %v1851_v52, %v4020_v51  ;;  %v1881_v20 = vld [vmem:[#allocation8 + $0x18] sm:$0xff] }
 0x1dc   : > { %v1843_v0 = vadd.f32 %v1842_v24, %v1825_v48  ;;  %v1845_v55 = vadd.f32 %v1844_v12, %v1827_v63  ;;  %v1854_v30 = vmul.f32 %v1851_v52, %v4026_v44  ;;  %v1856_v14 = vmul.f32 %v1851_v52, %v4028_v4 }
 0x1dd   : > { %v1847_v16 = vadd.f32 %v1846_v8, %v1829_v47  ;;  %v1849_v27 = vadd.f32 %v1848_v36, %v1831_v9  ;;  %v1858_v17 = vmul.f32 %v1851_v52, %v4016_v22  ;;  %v1853_v6 = vadd.f32 %v1852_v41, %v1837_v33  ;;  %v1895_v47 = vld [vmem:[#allocation8 + $0x40] sm:$0xff] }
 0x1de   : > { %v1855_v2 = vadd.f32 %v1854_v30, %v1839_v18  ;;  %v1860_v7 = vmul.f32 %v1851_v52, %v4005_v5  ;;  %v1862_v38 = vmul.f32 %v1851_v52, %v4007_v43  ;;  %v1857_v29 = vadd.f32 %v1856_v14, %v1841_v45  ;;  %v1911_v14 = vld [vmem:[#allocation8 + $0x68] sm:$0xff] }
 0x1df   : > { %v1859_v42 = vadd.f32 %v1858_v17, %v1843_v0  ;;  %v1864_v61 = vrot.slane %v4014_v49, 1  ;;  %v1865_v60 = vrot.slane %v4018_v50, 1  ;;  %v1866_v57 = vrot.slane %v4020_v51, 1 }
 0x1e0   : > { %v1861_v59 = vadd.f32 %v1860_v7, %v1845_v55  ;;  %v1863_v21 = vadd.f32 %v1862_v38, %v1847_v16  ;;  %v1867_v3 = vrot.slane %v4026_v44, 1  ;;  %v1868_v58 = vrot.slane %v4028_v4, 1 }
 0x1e1   : > { %v1869_v46 = vrot.slane %v4016_v22, 1  ;;  %v1870_v53 = vrot.slane %v4005_v5, 1  ;;  %v1871_v28 = vrot.slane %v4007_v43, 1  ;;  %v1877_v19 = vsel %vm1075_vm3, %v1865_v60, %v1866_v57 }
 0x1e2   : > { %v4204_v37 = vsel %vm1075_vm3, %v1866_v57, %v1867_v3  ;;  %v1878_v34 = vsel %vm1075_vm3, %v1864_v61, %v1865_v60  ;;  %v1958_v26 = vrot.slane %v4014_v49, 2  ;;  %v1875_v39 = vsel %vm1075_vm3, %v1867_v3, %v1868_v58 }
 0x1e3   : > { %v4213_v48 = vsel %vm1075_vm3, %v1870_v53, %v1871_v28  ;;  %v4217_v63 = vsel %vm1075_vm3, %v1869_v46, %v1870_v53  ;;  %v1874_v10 = vsel %vm1075_vm3, %v1868_v58, %v1869_v46  ;;  %v4225_v9 = vsel %vm1075_vm3, %v1871_v28, %v1864_v61  ;;  %v1929_v53 = vld [vmem:[#allocation8 + $0x90] sm:$0xff] }
 0x1e4   : > { %v1882_v62 = vmul.f32 %v1881_v20, %v1878_v34  ;;  %v1884_v13 = vmul.f32 %v1881_v20, %v1877_v19  ;;  %v1886_v33 = vmul.f32 %v1881_v20, %v4204_v37  ;;  %v1888_v24 = vmul.f32 %v1881_v20, %v1875_v39 }
 0x1e5   : > { %v1890_v12 = vmul.f32 %v1881_v20, %v1874_v10  ;;  %v1892_v52 = vmul.f32 %v1881_v20, %v4217_v63  ;;  %v1896_v18 = vmul.f32 %v1895_v47, %v1878_v34  ;;  %v1898_v0 = vmul.f32 %v1895_v47, %v1877_v19 }
 0x1e6   : > { %v1883_v45 = vadd.f32 %v1882_v62, %v1857_v29  ;;  %v1885_v8 = vadd.f32 %v1884_v13, %v1859_v42  ;;  %v1887_v36 = vadd.f32 %v1886_v33, %v1861_v59  ;;  %v1889_v55 = vadd.f32 %v1888_v24, %v1863_v21 }
 0x1e7   : > { %v1891_v41 = vadd.f32 %v1890_v12, %v1849_v27  ;;  %v1893_v30 = vadd.f32 %v1892_v52, %v1833_v54  ;;  %v1897_v16 = vadd.f32 %v1896_v18, %v1855_v2  ;;  %v1900_v7 = vmul.f32 %v1895_v47, %v4204_v37 }
 0x1e8   : > { %v1899_v17 = vadd.f32 %v1898_v0, %v1883_v45  ;;  %v1902_v38 = vmul.f32 %v1895_v47, %v1875_v39  ;;  %v1904_v61 = vmul.f32 %v1895_v47, %v1874_v10  ;;  %v1906_v60 = vmul.f32 %v1895_v47, %v4217_v63 }
 0x1e9   : > { %v1908_v57 = vmul.f32 %v1895_v47, %v4213_v48  ;;  %v1912_v3 = vmul.f32 %v1911_v14, %v1878_v34  ;;  %v1914_v58 = vmul.f32 %v1911_v14, %v1877_v19  ;;  %v1901_v29 = vadd.f32 %v1900_v7, %v1885_v8  ;;  %v1945_v8 = vld [vmem:[#allocation8 + $0xb8] sm:$0xff] }
 0x1ea   : > { %v1903_v42 = vadd.f32 %v1902_v38, %v1887_v36  ;;  %v1905_v59 = vadd.f32 %v1904_v61, %v1889_v55  ;;  %v1916_v21 = vmul.f32 %v1911_v14, %v4204_v37  ;;  %v1907_v27 = vadd.f32 %v1906_v60, %v1891_v41 }
 0x1eb   : > { %v1909_v54 = vadd.f32 %v1908_v57, %v1893_v30  ;;  %v1913_v2 = vadd.f32 %v1912_v3, %v1853_v6  ;;  %v1915_v46 = vadd.f32 %v1914_v58, %v1897_v16  ;;  %v1918_v20 = vmul.f32 %v1911_v14, %v1875_v39 }
 0x1ec   : > { %v1917_v28 = vadd.f32 %v1916_v21, %v1899_v17  ;;  %v1920_v62 = vmul.f32 %v1911_v14, %v1874_v10  ;;  %v1922_v13 = vmul.f32 %v1911_v14, %v4217_v63  ;;  %v1924_v33 = vmul.f32 %v1911_v14, %v4213_v48 }
 0x1ed   : > { %v1926_v34 = vmul.f32 %v1911_v14, %v4225_v9  ;;  %v1930_v47 = vmul.f32 %v1929_v53, %v1877_v19  ;;  %v1932_v24 = vmul.f32 %v1929_v53, %v4204_v37  ;;  %v1919_v12 = vadd.f32 %v1918_v20, %v1901_v29 }
 0x1ee   : > { %v1921_v52 = vadd.f32 %v1920_v62, %v1903_v42  ;;  %v1923_v18 = vadd.f32 %v1922_v13, %v1905_v59  ;;  %v1934_v45 = vmul.f32 %v1929_v53, %v1875_v39  ;;  %v1925_v6 = vadd.f32 %v1924_v33, %v1907_v27  ;;  %v1975_v62 = vld [vmem:[#allocation8 + $0x20] sm:$0xff] }
 0x1ef   : > { %v1927_v36 = vadd.f32 %v1926_v34, %v1909_v54  ;;  %v1931_v0 = vadd.f32 %v1930_v47, %v1913_v2  ;;  %v1933_v55 = vadd.f32 %v1932_v24, %v1915_v46  ;;  %v1936_v30 = vmul.f32 %v1929_v53, %v1874_v10 }
 0x1f0   : > { %v1935_v41 = vadd.f32 %v1934_v45, %v1917_v28  ;;  %v1938_v16 = vmul.f32 %v1929_v53, %v4217_v63  ;;  %v1940_v17 = vmul.f32 %v1929_v53, %v4213_v48  ;;  %v1942_v14 = vmul.f32 %v1929_v53, %v4225_v9 }
 0x1f1   : > { %v1946_v19 = vmul.f32 %v1945_v8, %v4204_v37  ;;  %v1948_v7 = vmul.f32 %v1945_v8, %v1875_v39  ;;  %v1950_v38 = vmul.f32 %v1945_v8, %v1874_v10  ;;  %v1937_v61 = vadd.f32 %v1936_v30, %v1919_v12 }
 0x1f2   : > { %v1939_v60 = vadd.f32 %v1938_v16, %v1921_v52  ;;  %v1941_v57 = vadd.f32 %v1940_v17, %v1923_v18  ;;  %v1952_v3 = vmul.f32 %v1945_v8, %v4217_v63  ;;  %v1943_v58 = vadd.f32 %v1942_v14, %v1925_v6 }
 0x1f3   : > { %v1947_v29 = vadd.f32 %v1946_v19, %v1931_v0  ;;  %v1949_v42 = vadd.f32 %v1948_v7, %v1933_v55  ;;  %v1951_v59 = vadd.f32 %v1950_v38, %v1935_v41  ;;  %v1954_v27 = vmul.f32 %v1945_v8, %v4213_v48  ;;  %v2005_v0 = vld [vmem:[#allocation8 + $0x70] sm:$0xff] }
 0x1f4   : > { %v1953_v21 = vadd.f32 %v1952_v3, %v1937_v61  ;;  %v1956_v54 = vmul.f32 %v1945_v8, %v4225_v9  ;;  %v1959_v2 = vrot.slane %v4018_v50, 2  ;;  %v1960_v37 = vrot.slane %v4020_v51, 2 }
 0x1f5   : > { %v1961_v10 = vrot.slane %v4026_v44, 2  ;;  %v1962_v39 = vrot.slane %v4028_v4, 2  ;;  %v1963_v46 = vrot.slane %v4016_v22, 2  ;;  %v1955_v63 = vadd.f32 %v1954_v27, %v1939_v60  ;;  %v1989_v44 = vld [vmem:[#allocation8 + $0x48] sm:$0xff] }
 0x1f6   : > { %v1957_v53 = vadd.f32 %v1956_v54, %v1941_v57  ;;  %v1964_v28 = vrot.slane %v4005_v5, 2  ;;  %v1965_v20 = vrot.slane %v4007_v43, 2  ;;  %v1971_v22 = vsel %vm1272_vm4, %v1959_v2, %v1960_v37 }
 0x1f7   : > { %v4253_v48 = vsel %vm1272_vm4, %v1962_v39, %v1963_v46  ;;  %v4257_v50 = vsel %vm1272_vm4, %v1961_v10, %v1962_v39  ;;  %v4261_v51 = vsel %vm1272_vm4, %v1960_v37, %v1961_v10  ;;  %v1972_v4 = vsel %vm1272_vm4, %v1958_v26, %v1959_v2 }
 0x1f8   : > { %v4267_v5 = vsel %vm1272_vm4, %v1964_v28, %v1965_v20  ;;  %v4271_v43 = vsel %vm1272_vm4, %v1963_v46, %v1964_v28  ;;  %v4281_v9 = vsel %vm1272_vm4, %v1965_v20, %v1958_v26  ;;  %v1976_v13 = vmul.f32 %v1975_v62, %v1972_v4 }
 0x1f9   : > { %v1978_v33 = vmul.f32 %v1975_v62, %v1971_v22  ;;  %v1980_v34 = vmul.f32 %v1975_v62, %v4261_v51  ;;  %v1982_v47 = vmul.f32 %v1975_v62, %v4257_v50  ;;  %v1984_v24 = vmul.f32 %v1975_v62, %v4253_v48 }
 0x1fa   : > { %v1986_v12 = vmul.f32 %v1975_v62, %v4271_v43  ;;  %v1990_v52 = vmul.f32 %v1989_v44, %v1972_v4  ;;  %v1992_v18 = vmul.f32 %v1989_v44, %v1971_v22  ;;  %v1977_v45 = vadd.f32 %v1976_v13, %v1951_v59 }
 0x1fb   : > { %v1979_v8 = vadd.f32 %v1978_v33, %v1953_v21  ;;  %v1981_v6 = vadd.f32 %v1980_v34, %v1955_v63  ;;  %v1983_v49 = vadd.f32 %v1982_v47, %v1957_v53  ;;  %v1985_v55 = vadd.f32 %v1984_v24, %v1943_v58  ;;  %v2023_v58 = vld [vmem:[#allocation8 + $0x98] sm:$0xff] }
 0x1fc   : > { %v1987_v26 = vadd.f32 %v1986_v12, %v1927_v36  ;;  %v1991_v41 = vadd.f32 %v1990_v52, %v1949_v42  ;;  %v1994_v30 = vmul.f32 %v1989_v44, %v4261_v51  ;;  %v1993_v16 = vadd.f32 %v1992_v18, %v1977_v45  ;;  %v1581_v18 = vld [vmem:[%s4466_s6] sm:$0xff] }
 0x1fd   : > { %v1996_v17 = vmul.f32 %v1989_v44, %v4257_v50  ;;  %v1998_v14 = vmul.f32 %v1989_v44, %v4253_v48  ;;  %v2000_v19 = vmul.f32 %v1989_v44, %v4271_v43  ;;  %v2002_v38 = vmul.f32 %v1989_v44, %v4267_v5 }
 0x1fe   : > { %v1995_v7 = vadd.f32 %v1994_v30, %v1979_v8  ;;  %v2006_v61 = vmul.f32 %v2005_v0, %v1972_v4  ;;  %v2008_v60 = vmul.f32 %v2005_v0, %v1971_v22  ;;  %v2010_v36 = vmul.f32 %v2005_v0, %v4261_v51  ;;  %v2039_v4 = vld [vmem:[#allocation8 + $0xc0] sm:$0xff] }
 0x1ff   : > { %v1997_v57 = vadd.f32 %v1996_v17, %v1981_v6  ;;  %v1999_v3 = vadd.f32 %v1998_v14, %v1983_v49  ;;  %v2001_v59 = vadd.f32 %v2000_v19, %v1985_v55  ;;  %v2003_v42 = vadd.f32 %v2002_v38, %v1987_v26 }
 0x200   : > { %v2007_v21 = vadd.f32 %v2006_v61, %v1947_v29  ;;  %v2009_v27 = vadd.f32 %v2008_v60, %v1991_v41  ;;  %v2012_v54 = vmul.f32 %v2005_v0, %v4257_v50  ;;  %v2011_v2 = vadd.f32 %v2010_v36, %v1993_v16 }
 0x201   : > { %v2014_v37 = vmul.f32 %v2005_v0, %v4253_v48  ;;  %v2016_v10 = vmul.f32 %v2005_v0, %v4271_v43  ;;  %v2018_v39 = vmul.f32 %v2005_v0, %v4267_v5  ;;  %v2020_v63 = vmul.f32 %v2005_v0, %v4281_v9 }
 0x202   : > { %v2013_v46 = vadd.f32 %v2012_v54, %v1995_v7  ;;  %v2024_v53 = vmul.f32 %v2023_v58, %v1971_v22  ;;  %v2026_v28 = vmul.f32 %v2023_v58, %v4261_v51  ;;  %v2028_v29 = vmul.f32 %v2023_v58, %v4257_v50 }
 0x203   : > { %v2015_v20 = vadd.f32 %v2014_v37, %v1997_v57  ;;  %v2017_v62 = vadd.f32 %v2016_v10, %v1999_v3  ;;  %v2019_v44 = vadd.f32 %v2018_v39, %v2001_v59  ;;  %v2021_v13 = vadd.f32 %v2020_v63, %v2003_v42  ;;  %v2076_v42 = vld [vmem:[#allocation10] sm:$0xff] }
 0x204   : > { %v2025_v33 = vadd.f32 %v2024_v53, %v2007_v21  ;;  %v2027_v34 = vadd.f32 %v2026_v28, %v2009_v27  ;;  %v2030_v47 = vmul.f32 %v2023_v58, %v4253_v48  ;;  %v2029_v24 = vadd.f32 %v2028_v29, %v2011_v2  ;;  %v2092_v28 = vld [vmem:[#allocation10 + $0x18] sm:$0xff] }
 0x205   : > { %v2032_v12 = vmul.f32 %v2023_v58, %v4271_v43  ;;  %v2034_v52 = vmul.f32 %v2023_v58, %v4267_v5  ;;  %v2036_v22 = vmul.f32 %v2023_v58, %v4281_v9  ;;  %v2040_v8 = vmul.f32 %v2039_v4, %v4261_v51 }
 0x206   : > { %v2031_v45 = vadd.f32 %v2030_v47, %v2013_v46  ;;  %v2042_v6 = vmul.f32 %v2039_v4, %v4257_v50  ;;  %v2044_v49 = vmul.f32 %v2039_v4, %v4253_v48  ;;  %v2046_v41 = vmul.f32 %v2039_v4, %v4271_v43 }
 0x207   : > { %v2033_v0 = vadd.f32 %v2032_v12, %v2015_v20  ;;  %v2035_v55 = vadd.f32 %v2034_v52, %v2017_v62  ;;  %v2037_v26 = vadd.f32 %v2036_v22, %v2019_v44  ;;  %v2041_v30 = vadd.f32 %v2040_v8, %v2025_v33 }
 0x208   : > { %v2043_v16 = vadd.f32 %v2042_v6, %v2027_v34  ;;  %v2045_v17 = vadd.f32 %v2044_v49, %v2029_v24  ;;  %v2048_v14 = vmul.f32 %v2039_v4, %v4267_v5  ;;  %v2047_v19 = vadd.f32 %v2046_v41, %v2031_v45 }
 0x209   : > { %v2050_v7 = vmul.f32 %v2039_v4, %v4281_v9  ;;  %v4313_v38 = vadd.f32 %v2037_v26, %v1581_v18  ;;  %v4315_v51 = vadd.f32 %v2021_v13, %v1581_v18  ;;  %v4317_v61 = vadd.f32 %v2041_v30, %v1581_v18  ;;  %v2110_v26 = vld [vmem:[#allocation10 + $0x30] sm:$0xff]  ;;  %v2126_v30 = vld [vmem:[#allocation10 + $0x8] sm:$0xff] }
 0x20a   : > { %v2049_v50 = vadd.f32 %v2048_v14, %v2033_v0  ;;  %v4319_v48 = vadd.f32 %v2043_v16, %v1581_v18  ;;  %v4321_v60 = vadd.f32 %v2045_v17, %v1581_v18  ;;  %v4323_v57 = vadd.f32 %v2047_v19, %v1581_v18 }
 0x20b   : > { %v2051_v43 = vadd.f32 %v2050_v7, %v2035_v55  ;;  %v2066_v3 = vrot.slane %v4313_v38, 7  ;;  %v2067_v5 = vrot.slane %v4315_v51, 7  ;;  %v2060_v9 = vrot.slane %v4317_v61, 7 }
 0x20c   : > { %v4327_v59 = vadd.f32 %v2049_v50, %v1581_v18  ;;  %v2061_v36 = vrot.slane %v4319_v48, 7  ;;  %v2062_v58 = vrot.slane %v4321_v60, 7  ;;  %v1600_v21 = vadd.f32 %v4048_v56, %v4012_v25 }
 0x20d   : > { %v4334_v27 = vadd.f32 %v2051_v43, %v1581_v18  ;;  %v2063_v54 = vrot.slane %v4323_v57, 7  ;;  %v2068_v2 = vsel %vm698_vm2, %v2066_v3, %v2067_v5  ;;  %v2075_v46 = vsel %vm698_vm2, %v2067_v5, %v2060_v9 }
 0x20e   : > { %v2064_v37 = vrot.slane %v4327_v59, 7  ;;  %v2073_v10 = vsel %vm698_vm2, %v2061_v36, %v2062_v58  ;;  %v2074_v39 = vsel %vm698_vm2, %v2060_v9, %v2061_v36  ;;  %v2077_v63 = vmul.f32 %v2076_v42, %v2075_v46 }
 0x20f   : > { %v2065_v25 = vrot.slane %v4334_v27, 7  ;;  %v2072_v56 = vsel %vm698_vm2, %v2062_v58, %v2063_v54  ;;  %v2079_v53 = vmul.f32 %v2076_v42, %v2074_v39  ;;  %v2081_v62 = vmul.f32 %v2076_v42, %v2073_v10 }
 0x210   : > { %v2071_v20 = vsel %vm698_vm2, %v2063_v54, %v2064_v37  ;;  %v2083_v44 = vmul.f32 %v2076_v42, %v2072_v56  ;;  %v2093_v29 = vmul.f32 %v2092_v28, %v2075_v46  ;;  %v2078_v33 = vadd.f32 %v2077_v63, %v4054_v40 }
 0x211   : > { %v2069_v4 = vsel %vm698_vm2, %v2065_v25, %v2066_v3  ;;  %v2070_v13 = vsel %vm698_vm2, %v2064_v37, %v2065_v25  ;;  %v2080_v34 = vadd.f32 %v2079_v53, %v4062_v35  ;;  %v2082_v47 = vadd.f32 %v2081_v62, %v4065_v32 }
 0x212   : > { %v2084_v24 = vadd.f32 %v2083_v44, %v1600_v21  ;;  %v2085_v12 = vmul.f32 %v2076_v42, %v2071_v20  ;;  %v2087_v52 = vmul.f32 %v2076_v42, %v2070_v13  ;;  %v2089_v22 = vmul.f32 %v2076_v42, %v2069_v4 }
 0x213   : > { %v2094_v18 = vadd.f32 %v2093_v29, %v4042_v23  ;;  %v2095_v45 = vmul.f32 %v2092_v28, %v2074_v39  ;;  %v2097_v8 = vmul.f32 %v2092_v28, %v2073_v10  ;;  %v2099_v0 = vmul.f32 %v2092_v28, %v2072_v56 }
 0x214   : > { %v2086_v6 = vadd.f32 %v2085_v12, %v4057_v15  ;;  %v2088_v49 = vadd.f32 %v2087_v52, %v4039_v11  ;;  %v2101_v55 = vmul.f32 %v2092_v28, %v2071_v20  ;;  %v2090_v40 = vadd.f32 %v2089_v22, %v4051_v31  ;;  %v2160_v22 = vld [vmem:[#allocation10 + $0x38] sm:$0xff] }
 0x215   : > { %v2096_v35 = vadd.f32 %v2095_v45, %v2078_v33  ;;  %v2098_v41 = vadd.f32 %v2097_v8, %v2080_v34  ;;  %v2103_v32 = vmul.f32 %v2092_v28, %v2070_v13  ;;  %v2100_v16 = vadd.f32 %v2099_v0, %v2082_v47 }
 0x216   : > { %v2102_v17 = vadd.f32 %v2101_v55, %v2084_v24  ;;  %v2105_v14 = vmul.f32 %v2092_v28, %v2069_v4  ;;  %v2107_v19 = vmul.f32 %v2092_v28, %v2068_v2  ;;  %v2111_v7 = vmul.f32 %v2110_v26, %v2074_v39 }
 0x217   : > { %v2104_v23 = vadd.f32 %v2103_v32, %v2086_v6  ;;  %v2113_v50 = vmul.f32 %v2110_v26, %v2073_v10  ;;  %v2115_v43 = vmul.f32 %v2110_v26, %v2072_v56  ;;  %v2117_v3 = vmul.f32 %v2110_v26, %v2071_v20  ;;  %v2142_v56 = vld [vmem:[#allocation10 + $0x20] sm:$0xff] }
 0x218   : > { %v2106_v15 = vadd.f32 %v2105_v14, %v2088_v49  ;;  %v2119_v11 = vmul.f32 %v2110_v26, %v2070_v13  ;;  %v2127_v5 = vmul.f32 %v2126_v30, %v4317_v61  ;;  %v2108_v9 = vadd.f32 %v2107_v19, %v2090_v40 }
 0x219   : > { %v2114_v36 = vadd.f32 %v2113_v50, %v2096_v35  ;;  %v2116_v31 = vadd.f32 %v2115_v43, %v2098_v41  ;;  %v2121_v58 = vmul.f32 %v2110_v26, %v2069_v4  ;;  %v2118_v42 = vadd.f32 %v2117_v3, %v2100_v16 }
 0x21a   : > { %v2120_v21 = vadd.f32 %v2119_v11, %v2102_v17  ;;  %v2123_v54 = vmul.f32 %v2110_v26, %v2068_v2  ;;  %v2129_v37 = vmul.f32 %v2126_v30, %v4319_v48  ;;  %v2112_v46 = vadd.f32 %v2111_v7, %v2094_v18 }
 0x21b   : > { %v2122_v25 = vadd.f32 %v2121_v58, %v2104_v23  ;;  %v2131_v39 = vmul.f32 %v2126_v30, %v4321_v60  ;;  %v2133_v10 = vmul.f32 %v2126_v30, %v4323_v57  ;;  %v2128_v53 = vadd.f32 %v2127_v5, %v2114_v36 }
 0x21c   : > { %v2124_v63 = vadd.f32 %v2123_v54, %v2106_v15  ;;  %v2135_v28 = vmul.f32 %v2126_v30, %v4327_v59  ;;  %v2137_v20 = vmul.f32 %v2126_v30, %v4334_v27  ;;  %v2130_v62 = vadd.f32 %v2129_v37, %v2116_v31  ;;  %v2192_v37 = vld [vmem:[#allocation10 + $0x10] sm:$0xff] }
 0x21d   : > { %v2132_v44 = vadd.f32 %v2131_v39, %v2118_v42  ;;  %v2139_v29 = vmul.f32 %v2126_v30, %v4313_v38  ;;  %v2143_v2 = vmul.f32 %v2142_v56, %v4317_v61  ;;  %v2134_v4 = vadd.f32 %v2133_v10, %v2120_v21 }
 0x21e   : > { %v2136_v13 = vadd.f32 %v2135_v28, %v2122_v25  ;;  %v2145_v33 = vmul.f32 %v2142_v56, %v4319_v48  ;;  %v2147_v34 = vmul.f32 %v2142_v56, %v4321_v60  ;;  %v2138_v47 = vadd.f32 %v2137_v20, %v2124_v63 }
 0x21f   : > { %v2140_v24 = vadd.f32 %v2139_v29, %v2108_v9  ;;  %v2149_v12 = vmul.f32 %v2142_v56, %v4323_v57  ;;  %v2151_v52 = vmul.f32 %v2142_v56, %v4327_v59  ;;  %v2144_v18 = vadd.f32 %v2143_v2, %v2112_v46 }
 0x220   : > { %v2146_v45 = vadd.f32 %v2145_v33, %v2128_v53  ;;  %v2153_v8 = vmul.f32 %v2142_v56, %v4334_v27  ;;  %v2155_v6 = vmul.f32 %v2142_v56, %v4313_v38  ;;  %v2148_v49 = vadd.f32 %v2147_v34, %v2130_v62 }
 0x221   : > { %v2150_v0 = vadd.f32 %v2149_v12, %v2132_v44  ;;  %v2157_v55 = vmul.f32 %v2142_v56, %v4315_v51  ;;  %v2161_v26 = vmul.f32 %v2160_v22, %v4319_v48  ;;  %v2152_v40 = vadd.f32 %v2151_v52, %v2134_v4 }
 0x222   : > { %v2154_v35 = vadd.f32 %v2153_v8, %v2136_v13  ;;  %v2163_v41 = vmul.f32 %v2160_v22, %v4321_v60  ;;  %v2165_v32 = vmul.f32 %v2160_v22, %v4323_v57  ;;  %v2156_v30 = vadd.f32 %v2155_v6, %v2138_v47  ;;  %v2226_v47 = vld [vmem:[#allocation10 + $0x40] sm:$0xff] }
 0x223   : > { %v2158_v16 = vadd.f32 %v2157_v55, %v2140_v24  ;;  %v2167_v17 = vmul.f32 %v2160_v22, %v4327_v59  ;;  %v2169_v14 = vmul.f32 %v2160_v22, %v4334_v27  ;;  %v2162_v19 = vadd.f32 %v2161_v26, %v2144_v18 }
 0x224   : > { %v2164_v23 = vadd.f32 %v2163_v41, %v2146_v45  ;;  %v2171_v7 = vmul.f32 %v2160_v22, %v4313_v38  ;;  %v2173_v50 = vmul.f32 %v2160_v22, %v4315_v51  ;;  %v2166_v43 = vadd.f32 %v2165_v32, %v2148_v49 }
 0x225   : > { %v2168_v15 = vadd.f32 %v2167_v17, %v2150_v0  ;;  %v2175_v3 = vrot.slane %v4317_v61, 1  ;;  %v2176_v11 = vrot.slane %v4319_v48, 1  ;;  %v2170_v5 = vadd.f32 %v2169_v14, %v2152_v40 }
 0x226   : > { %v2172_v9 = vadd.f32 %v2171_v7, %v2154_v35  ;;  %v2177_v36 = vrot.slane %v4321_v60, 1  ;;  %v2178_v31 = vrot.slane %v4323_v57, 1  ;;  %v2179_v58 = vrot.slane %v4327_v59, 1 }
 0x227   : > { %v2180_v42 = vrot.slane %v4334_v27, 1  ;;  %v2181_v21 = vrot.slane %v4313_v38, 1  ;;  %v2182_v54 = vrot.slane %v4315_v51, 1  ;;  %v2174_v46 = vadd.f32 %v2173_v50, %v2156_v30  ;;  %v2208_v27 = vld [vmem:[#allocation10 + $0x28] sm:$0xff] }
 0x228   : > { %v2187_v61 = vsel %vm1075_vm3, %v2177_v36, %v2178_v31  ;;  %v2188_v48 = vsel %vm1075_vm3, %v2176_v11, %v2177_v36  ;;  %v2189_v60 = vsel %vm1075_vm3, %v2175_v3, %v2176_v11  ;;  %v2186_v51 = vsel %vm1075_vm3, %v2178_v31, %v2179_v58 }
 0x229   : > { %v2183_v57 = vsel %vm1075_vm3, %v2181_v21, %v2182_v54  ;;  %v2184_v59 = vsel %vm1075_vm3, %v2180_v42, %v2181_v21  ;;  %v2185_v38 = vsel %vm1075_vm3, %v2179_v58, %v2180_v42  ;;  %v2190_v25 = vsel %vm1075_vm3, %v2182_v54, %v2175_v3 }
 0x22a   : > { %v2193_v39 = vmul.f32 %v2192_v37, %v2189_v60  ;;  %v2195_v10 = vmul.f32 %v2192_v37, %v2188_v48  ;;  %v2197_v56 = vmul.f32 %v2192_v37, %v2187_v61  ;;  %v2199_v63 = vmul.f32 %v2192_v37, %v2186_v51 }
 0x22b   : > { %v2201_v53 = vmul.f32 %v2192_v37, %v2185_v38  ;;  %v2203_v28 = vmul.f32 %v2192_v37, %v2184_v59  ;;  %v2205_v20 = vmul.f32 %v2192_v37, %v2183_v57  ;;  %v2209_v2 = vmul.f32 %v2208_v27, %v2189_v60 }
 0x22c   : > { %v2194_v62 = vadd.f32 %v2193_v39, %v2164_v23  ;;  %v2196_v44 = vadd.f32 %v2195_v10, %v2166_v43  ;;  %v2198_v29 = vadd.f32 %v2197_v56, %v2168_v15  ;;  %v2200_v4 = vadd.f32 %v2199_v63, %v2170_v5 }
 0x22d   : > { %v2202_v13 = vadd.f32 %v2201_v53, %v2172_v9  ;;  %v2204_v33 = vadd.f32 %v2203_v28, %v2174_v46  ;;  %v2206_v34 = vadd.f32 %v2205_v20, %v2158_v16  ;;  %v2210_v24 = vadd.f32 %v2209_v2, %v2162_v19 }
 0x22e   : > { %v2211_v1 = vmul.f32 %v2208_v27, %v2188_v48  ;;  %v2213_v12 = vmul.f32 %v2208_v27, %v2187_v61  ;;  %v2215_v52 = vmul.f32 %v2208_v27, %v2186_v51  ;;  %v2217_v22 = vmul.f32 %v2208_v27, %v2185_v38 }
 0x22f   : > { %v2219_v18 = vmul.f32 %v2208_v27, %v2184_v59  ;;  %v2221_v45 = vmul.f32 %v2208_v27, %v2183_v57  ;;  %v2223_v8 = vmul.f32 %v2208_v27, %v2190_v25  ;;  %v2227_v55 = vmul.f32 %v2226_v47, %v2188_v48 }
 0x230   : > { %v2212_v6 = vadd.f32 %v2211_v1, %v2194_v62  ;;  %v2214_v49 = vadd.f32 %v2213_v12, %v2196_v44  ;;  %v2216_v0 = vadd.f32 %v2215_v52, %v2198_v29  ;;  %v2218_v26 = vadd.f32 %v2217_v22, %v2200_v4 }
 0x231   : > { %v2220_v40 = vadd.f32 %v2219_v18, %v2202_v13  ;;  %v2222_v35 = vadd.f32 %v2221_v45, %v2204_v33  ;;  %v2224_v41 = vadd.f32 %v2223_v8, %v2206_v34  ;;  %v2228_v32 = vadd.f32 %v2227_v55, %v2210_v24 }
 0x232   : > { %v2229_v30 = vmul.f32 %v2226_v47, %v2187_v61  ;;  %v2231_v16 = vmul.f32 %v2226_v47, %v2186_v51  ;;  %v2233_v17 = vmul.f32 %v2226_v47, %v2185_v38  ;;  %v2235_v14 = vmul.f32 %v2226_v47, %v2184_v59 }
 0x233   : > { %v2237_v19 = vmul.f32 %v2226_v47, %v2183_v57  ;;  %v2239_v23 = vmul.f32 %v2226_v47, %v2190_v25  ;;  %2248 = vst [vmem:[%s381_s25 + $0x38] sm:$0xff] %v2224_v41  ;;  %2241 = vst [vmem:[%s381_s25] sm:$0xff] %v2228_v32 }
 0x234   : > { %v2230_v7 = vadd.f32 %v2229_v30, %v2212_v6  ;;  %v2232_v50 = vadd.f32 %v2231_v16, %v2214_v49  ;;  %v2234_v43 = vadd.f32 %v2233_v17, %v2216_v0  ;;  %v2236_v15 = vadd.f32 %v2235_v14, %v2218_v26 }
 0x235   : > { %v2238_v3 = vadd.f32 %v2237_v19, %v2220_v40  ;;  %v2240_v11 = vadd.f32 %v2239_v23, %v2222_v35 }
 0x236   : > { %2242 = vst [vmem:[%s381_s25 + $0x8] sm:$0xff] %v2230_v7  ;;  %2243 = vst [vmem:[%s381_s25 + $0x10] sm:$0xff] %v2232_v50 }
 0x237   : > { %2244 = vst [vmem:[%s381_s25 + $0x18] sm:$0xff] %v2234_v43  ;;  %2245 = vst [vmem:[%s381_s25 + $0x20] sm:$0xff] %v2236_v15 }
 0x238   : > { %2246 = vst [vmem:[%s381_s25 + $0x28] sm:$0xff] %v2238_v3  ;;  %2247 = vst [vmem:[%s381_s25 + $0x30] sm:$0xff] %v2240_v11 }
 0x239   : > { %2652 = shalt.err (!%p2649_p13)
}
 0x23a   : > { %s2653_s19 = scalar_lea.hbm %s4414_s9, 1024  ;;  %s2657_s18 = scalar_lea.hbm %s4468_s8, 2048 }
 0x23b   : > { %p2654_p9 = scmp.ne.s32.totalorder %s4414_s9, %s2653_s19  ;;  %p2658_p4 = scmp.lt.u32.totalorder %s4414_s9, %s4468_s8 }
 0x23c   : > { %p2659_p8 = scmp.lt.u32.totalorder %s2657_s18, %s2653_s19  ;;  %p2661_p3 = scmp.lt.u32.totalorder %s2653_s19, %s4414_s9 }
 0x23d   : > { %p2655_p0 = pnand %p2654_p9, %p2941_p10 }
 0x23e   : > { %p2660_p6 = por %p2659_p8, %p2658_p4 }
 0x23f   : > { %p2656_p11 = pneg %p2655_p0 }
 0x240   : > { %p2662_p5 = por %p2661_p3, %p2660_p6 }
 0x242   : > { %p2663_p7 = pnand %p2662_p5, %p2656_p11 }
 0x244   : > { %2666 = shalt.err (!%p2663_p7)
}
 0x245   : > { %s2723_s22 = smov 128   ;;  %s2724_s17 = smov 8  }
 0x246   : > { %2416 = dma.vmem_to_hbm [thread:$0]  (%p2941_p10), %s4416_s10, 1024, %s4414_s9, %s2250_s14, %s2723_s22, %s2723_s22, %s2724_s17  }
 0x247 PF: > { %s4490_s20 = sld [smem:[#allocation16_spill]]  ;;  %s4491_s27 = sld [smem:[#allocation17_spill]] }
 0x248   : > { %p4493_p1 = scmp.ge.s32.totalorder %s2713_s30, 2 }
 0x24d   : > { %s2278_s11 = sand.u32 1, %s4490_s20   ;;  %p4492_p12 = scmp.ne.s32.totalorder %s4491_s27, 0 }
 0x24e   : > { %s2279_s13 = scalar_lea.sflag [#allocation4], %s2278_s11 }
 0x24f   : > { %p2436_p2 = pnand %p4493_p1, %p4492_p12 }
 0x251   : > { %2696 = dma.done.wait (!%p2436_p2), %s2279_s13, 1024  }
 0x252   : > { %2698 = vsyncadd (!%p2436_p2), %s2279_s13, 4294966272  ;;  %p23_p13 = scmp.ge.s32.totalorder %s2931_s26, 4   ;;  %s4494_s27 = smov %s2705_s28 }
 0x253   : > { %s4495_s28 = smov %s2709_s29  ;;  %s4496_s29 = smov %s2947_s24 }
 0x254   : > { %s4497_s30 = smov %s2931_s26  ;;  %25 = sbr.rel (!%p23_p13) target bundleno = 7 (0x7), region = 217 }
 0x25b   :  { %2284 = vsyncpa [#allocation3], 1 }
 0x25c   :  { %2286 = vsyncpa [#allocation3 + $0x1], 1 }
 0x25d   :  { %2287 = vsyncpa [#allocation6], 1 }
 0x25e   :  { %2288 = vsyncpa [#allocation9], 1 }
 0x25f   :  { %2289 = vsyncpa [#allocation4], 1 }
 0x260   :  { %2291 = vsyncpa [#allocation4 + $0x1], 1 }

</bundles_post_ra>
